<compile_context>
chip_gen: v5e
topology: v5e:2x2
jax: 0.10.0
libtpu: 0.0.40
codegen_flags: <defaults>
</compile_context>

<pallas_src>
import functools

import jax
import jax.numpy as jnp
from jax.experimental import pallas as pl
from jax.experimental.pallas import tpu as pltpu

NEG_SLOPE = 0.2
BN_EPS = 1e-5
MXU_DTYPE = jnp.bfloat16          # MXU operand dtype (accumulation stays f32)
ACT_DTYPE = jnp.bfloat16          # storage dtype for x1..x4 / gathered neighbours


def _vmem_capacity_bytes():
    try:
        return int(pltpu.get_tpu_info().vmem_capacity_bytes)
    except Exception:
        return 64 * 1024 * 1024   # conservative (v7x-sized) fallback


_VMEM_CAP = _vmem_capacity_bytes()
VMEM_LIMIT = min(_VMEM_CAP // 2, 64 * 1024 * 1024)       # 32 MiB on v7x, 64 MiB on v5e/v6e
MAX_TILE = 512 if _VMEM_CAP >= 96 * 1024 * 1024 else 256  # bigger tiles on 128-MiB-VMEM parts


def _pick_tile(n, max_tile=None):
    """Largest tile <= max_tile (multiple of 8) dividing n; n itself if small; -1 if none."""
    max_tile = MAX_TILE if max_tile is None else max_tile
    if n <= max_tile:
        return n
    t = max_tile
    while t >= 8:
        if n % t == 0:
            return t
        t -= 8
    return -1


def _maybe_pad_points(x):
    """Pad the point dim (replicating the last point) so a clean tile exists.

    Padded points are masked out of every kNN search, and being exact duplicates
    of a real point they cannot change the global max, so results are exact."""
    B, N, C = x.shape
    if N % 8 == 0 and _pick_tile(N) > 0:
        return x, N
    step = MAX_TILE if N > MAX_TILE else 8
    n_pad = ((N + step - 1) // step) * step
    pad = jnp.broadcast_to(x[:, N - 1:N, :], (B, n_pad - N, C))
    return jnp.concatenate([x, pad], axis=1), N


def _leaky(y):
    return jnp.where(y > 0.0, y, NEG_SLOPE * y)


# ---------------------------------------------------------------------------
# Kernel 1: fused pairwise distance + k-NN selection.
#   d[i,j] = 2 x_i.x_j - ||x_i||^2 - ||x_j||^2   (row tile vs all points)
#   then k unrolled passes of row-argmax + mask emit (TN, k) int32 indices.
#   The (B, N, N) distance matrix never leaves VMEM.
# ---------------------------------------------------------------------------
def _knn_kernel(xr_ref, xt_ref, sq_ref, idx_ref):
    k = idx_ref.shape[-1]
    xr = xr_ref[...]                                          # (TN, C)
    inner = jnp.dot(xr, xt_ref[...],                          # (TN, N) f32 accumulate
                    preferred_element_type=jnp.float32)
    xr32 = xr.astype(jnp.float32)
    sq_row = jnp.sum(xr32 * xr32, axis=-1, keepdims=True)     # (TN, 1)
    d = 2.0 * inner - sq_row - sq_ref[...]                    # (TN, N), sq_ref: (1, N)

    lane_f = jax.lax.broadcasted_iota(jnp.int32, d.shape, 1).astype(jnp.float32)
    kcol = jax.lax.broadcasted_iota(jnp.int32, idx_ref.shape, 1)
    sentinel = jnp.float32(d.shape[-1])
    out = jnp.zeros(idx_ref.shape, jnp.int32)
    for j in range(k):                                        # k is small & static -> unrolled
        m = jnp.max(d, axis=-1, keepdims=True)                # row max
        sel = jnp.min(jnp.where(d == m, lane_f, sentinel),    # first index of the max
                      axis=-1, keepdims=True)
        out = jnp.where(kcol == j, sel.astype(jnp.int32), out)
        d = jnp.where(lane_f == sel, -jnp.inf, d)             # knock out the selected column
    idx_ref[...] = out


def knn_indices(x, xt, sq, k):
    B, N, C = x.shape
    TN = _pick_tile(N)
    assert TN > 0 and N % TN == 0, (N, TN)
    ab = jnp.dtype(x.dtype).itemsize
    cost = pl.CostEstimate(
        flops=2 * B * N * N * C + 6 * B * N * N * k,
        transcendentals=0,
        bytes_accessed=ab * B * N * C * (1 + N // TN) + 4 * B * N + 4 * B * N * k,
    )
    return pl.pallas_call(
        _knn_kernel,
        out_shape=jax.ShapeDtypeStruct((B, N, k), jnp.int32),
        grid=(B, N // TN),
        in_specs=[
            pl.BlockSpec((None, TN, C), lambda b, i: (b, i, 0)),   # row tile of points
            pl.BlockSpec((None, C, N), lambda b, i: (b, 0, 0)),    # all points, pre-transposed
            pl.BlockSpec((None, 1, N), lambda b, i: (b, 0, 0)),    # ||x_j||^2 (+ pad mask)
        ],
        out_specs=pl.BlockSpec((None, TN, k), lambda b, i: (b, i, 0)),
        compiler_params=pltpu.CompilerParams(
            dimension_semantics=("parallel", "parallel"),
            vmem_limit_bytes=VMEM_LIMIT,
        ),
        cost_estimate=cost,
    )(x, xt, sq)


def knn_gather(x, k, n_valid=None):
    """k-NN graph (self-inclusive, matching get_graph_feature) -> neighbour-major
    features (B, k, N, C) in the dtype of x."""
    B, N, C = x.shape
    x32 = x.astype(jnp.float32)
    sq = jnp.sum(x32 * x32, axis=-1)[:, None, :]               # (B, 1, N) f32
    if n_valid is not None and n_valid < N:
        col = jax.lax.broadcasted_iota(jnp.int32, (1, 1, N), 2)
        sq = jnp.where(col >= n_valid, jnp.float32(1e30), sq)  # padded points never picked
    xt = jnp.transpose(x, (0, 2, 1))                           # (B, C, N): lane-dense RHS
    idx = knn_indices(x, xt, sq, k)                            # (B, N, k) int32
    # TODO(synk): replace this XLA gather with a scalar-prefetched per-row DMA gather
    # inside the edge-conv kernel so the Kx-inflated neighbour tensor never hits HBM.
    idx_t = jnp.transpose(idx, (0, 2, 1))                      # (B, k, N)
    nbrs = jax.vmap(lambda xb, ib: xb[ib])(x, idx_t)           # (B, k, N, C) neighbour-major
    return nbrs


# ---------------------------------------------------------------------------
# Kernel 2: edge conv = split-weight 1x1 conv + folded-BN bias + LeakyReLU
#           + max over the K neighbours.
#   y = nbr @ W1 + ctr @ (W2 - W1) + b ; the K small dots are merged into one
#   (K*TN, Cin) @ (Cin, Cout) MXU matmul via a leading-dim reshape.
# ---------------------------------------------------------------------------
def _edge_conv_kernel(nbr_ref, ctr_ref, w1_ref, wd_ref, b_ref, o_ref):
    K, TN, Cin = nbr_ref.shape
    Cout = w1_ref.shape[-1]
    ctr = ctr_ref[...].astype(MXU_DTYPE)                       # (TN, Cin)
    cb = jnp.dot(ctr, wd_ref[...], preferred_element_type=jnp.float32) + b_ref[...]
    nbr = nbr_ref[...].astype(MXU_DTYPE).reshape(K * TN, Cin)  # leading-dim merge, no data move
    y = jnp.dot(nbr, w1_ref[...], preferred_element_type=jnp.float32)
    y = _leaky(y.reshape(K, TN, Cout) + cb[None, :, :])
    o_ref[...] = jnp.max(y, axis=0).astype(o_ref.dtype)


def edge_conv(nbr, ctr, w1, wd, b):
    B, K, N, Cin = nbr.shape
    Cout = w1.shape[1]
    TN = _pick_tile(N)
    assert TN > 0 and N % TN == 0, (N, TN)
    ab = jnp.dtype(nbr.dtype).itemsize
    cost = pl.CostEstimate(
        flops=2 * B * N * (K + 1) * Cin * Cout,
        transcendentals=0,
        bytes_accessed=ab * B * N * (K * Cin + Cin) + 2 * B * N * Cout + 2 * 2 * Cin * Cout,
    )
    return pl.pallas_call(
        _edge_conv_kernel,
        out_shape=jax.ShapeDtypeStruct((B, N, Cout), ACT_DTYPE),
        grid=(B, N // TN),
        in_specs=[
            pl.BlockSpec((None, K, TN, Cin), lambda b_, i: (b_, 0, i, 0)),
            pl.BlockSpec((None, TN, Cin), lambda b_, i: (b_, i, 0)),
            pl.BlockSpec((Cin, Cout), lambda b_, i: (0, 0)),
            pl.BlockSpec((Cin, Cout), lambda b_, i: (0, 0)),
            pl.BlockSpec((1, Cout), lambda b_, i: (0, 0)),
        ],
        out_specs=pl.BlockSpec((None, TN, Cout), lambda b_, i: (b_, i, 0)),
        compiler_params=pltpu.CompilerParams(
            dimension_semantics=("parallel", "parallel"),
            vmem_limit_bytes=VMEM_LIMIT,
        ),
        cost_estimate=cost,
    )(nbr, ctr, w1, wd, b)


# ---------------------------------------------------------------------------
# Kernel 3: conv5 + LeakyReLU + global max over points.
#   Fed by x1..x4 against row-slices of W5 (no (B,N,512) concat).
#   N-tile axis is a running-max accumulator ("arbitrary").
# ---------------------------------------------------------------------------
# TODO(synk): on v7x with small B, add a 2-way parallel split of the N tiles plus a
# tiny second-stage max so both TensorCores work on this reduction.
def _gmax_kernel(x1_ref, x2_ref, x3_ref, x4_ref,
                 w1_ref, w2_ref, w3_ref, w4_ref, b_ref, o_ref):
    i = pl.program_id(1)
    y = jnp.dot(x1_ref[...].astype(MXU_DTYPE), w1_ref[...], preferred_element_type=jnp.float32)
    y = y + jnp.dot(x2_ref[...].astype(MXU_DTYPE), w2_ref[...], preferred_element_type=jnp.float32)
    y = y + jnp.dot(x3_ref[...].astype(MXU_DTYPE), w3_ref[...], preferred_element_type=jnp.float32)
    y = y + jnp.dot(x4_ref[...].astype(MXU_DTYPE), w4_ref[...], preferred_element_type=jnp.float32)
    y = _leaky(y + b_ref[...])
    m = jnp.max(y, axis=0, keepdims=True)              # (1, F)

    @pl.when(i == 0)
    def _init():
        o_ref[...] = m

    @pl.when(i > 0)
    def _acc():
        o_ref[...] = jnp.maximum(o_ref[...], m)


def conv5_global_max(x1, x2, x3, x4, w1, w2, w3, w4, b):
    B, N, _ = x1.shape
    F = w1.shape[1]
    TN = _pick_tile(N)
    assert TN > 0 and N % TN == 0, (N, TN)
    cin_total = x1.shape[2] + x2.shape[2] + x3.shape[2] + x4.shape[2]

    def xspec(c):
        return pl.BlockSpec((None, TN, c), lambda b_, i: (b_, i, 0))

    def wspec(c):
        return pl.BlockSpec((c, F), lambda b_, i: (0, 0))

    cost = pl.CostEstimate(
        flops=2 * B * N * cin_total * F,
        transcendentals=0,
        bytes_accessed=2 * B * N * cin_total + 2 * cin_total * F + 4 * B * F,
    )
    return pl.pallas_call(
        _gmax_kernel,
        out_shape=jax.ShapeDtypeStruct((B, 1, F), jnp.float32),
        grid=(B, N // TN),
        in_specs=[
            xspec(x1.shape[2]), xspec(x2.shape[2]), xspec(x3.shape[2]), xspec(x4.shape[2]),
            wspec(x1.shape[2]), wspec(x2.shape[2]), wspec(x3.shape[2]), wspec(x4.shape[2]),
            pl.BlockSpec((1, F), lambda b_, i: (0, 0)),
        ],
        out_specs=pl.BlockSpec((None, 1, F), lambda b_, i: (b_, 0, 0)),
        compiler_params=pltpu.CompilerParams(
            dimension_semantics=("parallel", "arbitrary"),
            vmem_limit_bytes=VMEM_LIMIT,
        ),
        cost_estimate=cost,
    )(x1, x2, x3, x4, w1, w2, w3, w4, b)


# ---------------------------------------------------------------------------
# Kernel 4: fused conv6 + conv7 tail.
#   conv6 input concat(g, x1..x4) is never materialized: x1..x4 hit row-slices
#   of W6, the global-feature contribution g@W6_g arrives precomputed as a
#   (1, 512) broadcast.  conv6->conv7 stays in VMEM (no HBM round trip).
# ---------------------------------------------------------------------------
def _tail_kernel(x1_ref, x2_ref, x3_ref, x4_ref, g6_ref,
                 w61_ref, w62_ref, w63_ref, w64_ref, b6_ref,
                 w7_ref, b7_ref, o_ref):
    y = jnp.dot(x1_ref[...].astype(MXU_DTYPE), w61_ref[...], preferred_element_type=jnp.float32)
    y = y + jnp.dot(x2_ref[...].astype(MXU_DTYPE), w62_ref[...], preferred_element_type=jnp.float32)
    y = y + jnp.dot(x3_ref[...].astype(MXU_DTYPE), w63_ref[...], preferred_element_type=jnp.float32)
    y = y + jnp.dot(x4_ref[...].astype(MXU_DTYPE), w64_ref[...], preferred_element_type=jnp.float32)
    y = _leaky(y + g6_ref[...] + b6_ref[...])                       # conv6 out (TN, 512)
    z = jnp.dot(y.astype(MXU_DTYPE), w7_ref[...], preferred_element_type=jnp.float32) + b7_ref[...]
    o_ref[...] = _leaky(z)                                          # conv7 out (TN, c_dim)


def fused_tail(x1, x2, x3, x4, g6, w61, w62, w63, w64, b6, w7, b7):
    B, N, _ = x1.shape
    H = w7.shape[0]           # 512
    Cd = w7.shape[1]          # c_dim
    TN = _pick_tile(N)
    assert TN > 0 and N % TN == 0, (N, TN)
    cin_total = x1.shape[2] + x2.shape[2] + x3.shape[2] + x4.shape[2]

    def xspec(c):
        return pl.BlockSpec((None, TN, c), lambda b_, i: (b_, i, 0))

    def wspec(c, cout):
        return pl.BlockSpec((c, cout), lambda b_, i: (0, 0))

    cost = pl.CostEstimate(
        flops=2 * B * N * (cin_total * H + H * Cd),
        transcendentals=0,
        bytes_accessed=2 * B * N * cin_total + 4 * B * N * Cd + 4 * B * H
        + 2 * (cin_total * H + H * Cd),
    )
    return pl.pallas_call(
        _tail_kernel,
        out_shape=jax.ShapeDtypeStruct((B, N, Cd), jnp.float32),
        grid=(B, N // TN),
        in_specs=[
            xspec(x1.shape[2]), xspec(x2.shape[2]), xspec(x3.shape[2]), xspec(x4.shape[2]),
            pl.BlockSpec((None, 1, H), lambda b_, i: (b_, 0, 0)),     # g@W6_g (per batch)
            wspec(x1.shape[2], H), wspec(x2.shape[2], H),
            wspec(x3.shape[2], H), wspec(x4.shape[2], H),
            pl.BlockSpec((1, H), lambda b_, i: (0, 0)),
            wspec(H, Cd),
            pl.BlockSpec((1, Cd), lambda b_, i: (0, 0)),
        ],
        out_specs=pl.BlockSpec((None, TN, Cd), lambda b_, i: (b_, i, 0)),
        compiler_params=pltpu.CompilerParams(
            dimension_semantics=("parallel", "parallel"),
            vmem_limit_bytes=VMEM_LIMIT,
        ),
        cost_estimate=cost,
    )(x1, x2, x3, x4, g6, w61, w62, w63, w64, b6, w7, b7)


# ---------------------------------------------------------------------------
# Parameters (deterministic, synthetic).  BatchNorm is folded in eval mode with
# default running stats (mean=0, var=1, gamma=1, beta=0): scale is multiplied
# into the weights, bias stays 0.  (With real trained stats the bias must carry
# beta - gamma*mu/sigma.)  Weights stored in bf16 (MXU operands).
# ---------------------------------------------------------------------------
_BN_SCALE = (1.0 + BN_EPS) ** -0.5


def _edge_conv_params(key, cin, cout):
    bound = 1.0 / (2 * cin) ** 0.5
    w = jax.random.uniform(key, (2 * cin, cout), jnp.float32, -bound, bound) * _BN_SCALE
    w1 = w[:cin].astype(MXU_DTYPE)                     # multiplies (nbr - center)
    wd = (w[cin:] - w[:cin]).astype(MXU_DTYPE)         # center term: W2 - W1
    b = jnp.zeros((1, cout), jnp.float32)
    return w1, wd, b


def _lin_params(key, cin, cout):
    bound = 1.0 / cin ** 0.5
    w = jax.random.uniform(key, (cin, cout), jnp.float32, -bound, bound) * _BN_SCALE
    b = jnp.zeros((1, cout), jnp.float32)
    return w, b


def init_params(key, feat_dim=64, c_dim=32):
    keys = jax.random.split(key, 7)
    F = feat_dim
    params = {
        "ec1": _edge_conv_params(keys[0], 3, 64),
        "ec2": _edge_conv_params(keys[1], 64, 64),
        "ec3": _edge_conv_params(keys[2], 64, 128),
        "ec4": _edge_conv_params(keys[3], 128, 256),
    }
    w5, b5 = _lin_params(keys[4], 512, F)              # input order: x1,x2,x3,x4
    params["c5"] = (w5[0:64].astype(MXU_DTYPE), w5[64:128].astype(MXU_DTYPE),
                    w5[128:256].astype(MXU_DTYPE), w5[256:512].astype(MXU_DTYPE), b5)
    w6, b6 = _lin_params(keys[5], F + 512, 512)        # input order: g,x1,x2,x3,x4
    params["c6"] = (w6[0:F].astype(MXU_DTYPE),
                    w6[F:F + 64].astype(MXU_DTYPE), w6[F + 64:F + 128].astype(MXU_DTYPE),
                    w6[F + 128:F + 256].astype(MXU_DTYPE), w6[F + 256:F + 512].astype(MXU_DTYPE),
                    b6)
    w7, b7 = _lin_params(keys[6], 512, c_dim)
    params["c7"] = (w7.astype(MXU_DTYPE), b7)
    return params


# ---------------------------------------------------------------------------
# Full forward pass (matches DGCNN_Cls_Encoder.forward; channels-last output,
# i.e. already the torch output after .permute(0, 2, 1)).
# ---------------------------------------------------------------------------
def dgcnn_cls_encoder(x_pts, params, k=4):
    # x_pts: (B, N, 3) — same as the nn.Module input.
    x_pts, n_valid = _maybe_pad_points(x_pts)          # replicate-pad -> tileable N (exact)

    nbr = knn_gather(x_pts, k, n_valid)                # layer-1 kNN on f32 raw coords
    x1 = edge_conv(nbr, x_pts, *params["ec1"])         # (B, N, 64)  bf16
    nbr = knn_gather(x1, k, n_valid)
    x2 = edge_conv(nbr, x1, *params["ec2"])            # (B, N, 64)  bf16
    nbr = knn_gather(x2, k, n_valid)
    x3 = edge_conv(nbr, x2, *params["ec3"])            # (B, N, 128) bf16
    nbr = knn_gather(x3, k, n_valid)
    x4 = edge_conv(nbr, x3, *params["ec4"])            # (B, N, 256) bf16

    g = conv5_global_max(x1, x2, x3, x4, *params["c5"])            # (B, 1, feat_dim)

    w6g = params["c6"][0]
    g6 = jnp.dot(g[:, 0, :].astype(MXU_DTYPE), w6g,
                 preferred_element_type=jnp.float32)[:, None, :]   # (B, 1, 512)

    out = fused_tail(x1, x2, x3, x4, g6,
                     params["c6"][1], params["c6"][2], params["c6"][3], params["c6"][4],
                     params["c6"][5], *params["c7"])               # (B, N, c_dim)
    return out[:, :n_valid, :]                                     # drop padded points


if __name__ == "__main__":
    key = jax.random.PRNGKey(0)
    pkey, xkey = jax.random.split(key)

    B, N = 2, 16
    feat_dim, c_dim, k = 64, 32, 4                     # small synthetic sizes

    params = init_params(pkey, feat_dim=feat_dim, c_dim=c_dim)
    x = jax.random.normal(xkey, (B, N, 3), jnp.float32)

    fwd = jax.jit(functools.partial(dgcnn_cls_encoder, k=k))
    out = fwd(x, params)
    jax.block_until_ready(out)

    assert out.shape == (B, N, c_dim), out.shape
    assert bool(jnp.all(jnp.isfinite(out)))
    print("KERNEL_OK")
</pallas_src>

<mosaic_0001>
module attributes {stable_mosaic.version = 11 : i64} {
  func.func @_knn_kernel(%arg0: i32, %arg1: i32, %arg2: memref<1x16x3xf32, #tpu.memory_space<vmem>>, %arg3: memref<1x3x16xf32, #tpu.memory_space<vmem>>, %arg4: memref<1x1x16xf32, #tpu.memory_space<vmem>>, %arg5: memref<1x16x4xi32, #tpu.memory_space<vmem>>) attributes {dimension_semantics = [#tpu.dimension_semantics<parallel>, #tpu.dimension_semantics<parallel>], iteration_bounds = array<i64: 2, 1>, scalar_prefetch = 0 : i64, scratch_operands = 0 : i64, tpu.core_type = #tpu.core_type<tc>, window_params = [{transform_indices = @transform_0, window_bounds = array<i64: 1, 16, 3>}, {transform_indices = @transform_1, window_bounds = array<i64: 1, 3, 16>}, {transform_indices = @transform_2, window_bounds = array<i64: 1, 1, 16>}, {transform_indices = @transform_3, window_bounds = array<i64: 1, 16, 4>}]} {
    %c0 = arith.constant 0 : index
    %c0_0 = arith.constant 0 : index
    %c0_1 = arith.constant 0 : index
    %0 = vector.load %arg2[%c0, %c0_0, %c0_1] : memref<1x16x3xf32, #tpu.memory_space<vmem>>, vector<1x16x3xf32>
    %1 = vector.shape_cast %0 : vector<1x16x3xf32> to vector<16x3xf32>
    %c0_2 = arith.constant 0 : index
    %c0_3 = arith.constant 0 : index
    %c0_4 = arith.constant 0 : index
    %2 = vector.load %arg3[%c0_2, %c0_3, %c0_4] : memref<1x3x16xf32, #tpu.memory_space<vmem>>, vector<1x3x16xf32>
    %3 = vector.shape_cast %2 : vector<1x3x16xf32> to vector<3x16xf32>
    %cst = arith.constant dense<0.000000e+00> : vector<16x16xf32>
    %4 = tpu.matmul %1, %3, %cst {dimension_numbers = #tpu.dot_dimension_numbers<[1], [0], [0], [1], [0, 0, 1, 1], [], []>} : vector<16x3xf32>, vector<3x16xf32>, vector<16x16xf32> -> vector<16x16xf32>
    %5 = arith.mulf %1, %1 : vector<16x3xf32>
    %cst_5 = arith.constant dense<0.000000e+00> : vector<16xf32>
    %6 = vector.multi_reduction <add>, %5, %cst_5 [1] : vector<16x3xf32> to vector<16xf32>
    %7 = vector.shape_cast %6 : vector<16xf32> to vector<16x1xf32>
    %cst_6 = arith.constant 2.000000e+00 : f32
    %8 = vector.broadcast %cst_6 : f32 to vector<16x16xf32>
    %9 = arith.mulf %8, %4 : vector<16x16xf32>
    %10 = vector.broadcast %7 : vector<16x1xf32> to vector<16x16xf32>
    %11 = arith.subf %9, %10 : vector<16x16xf32>
    %c0_7 = arith.constant 0 : index
    %c0_8 = arith.constant 0 : index
    %c0_9 = arith.constant 0 : index
    %12 = vector.load %arg4[%c0_7, %c0_8, %c0_9] : memref<1x1x16xf32, #tpu.memory_space<vmem>>, vector<1x1x16xf32>
    %13 = vector.shape_cast %12 : vector<1x1x16xf32> to vector<1x16xf32>
    %14 = vector.broadcast %13 : vector<1x16xf32> to vector<16x16xf32>
    %15 = arith.subf %11, %14 : vector<16x16xf32>
    %16 = tpu.iota {dimensions = array<i32: 1>} : vector<16x16xi32>
    %17 = arith.sitofp %16 : vector<16x16xi32> to vector<16x16xf32>
    %18 = tpu.iota {dimensions = array<i32: 1>} : vector<16x4xi32>
    %c0_i32 = arith.constant 0 : i32
    %19 = vector.broadcast %c0_i32 : i32 to vector<16x4xi32>
    %cst_10 = arith.constant dense<0xFF800000> : vector<16xf32>
    %20 = vector.multi_reduction <maximumf>, %15, %cst_10 [1] : vector<16x16xf32> to vector<16xf32>
    %21 = vector.shape_cast %20 : vector<16xf32> to vector<16x1xf32>
    %22 = vector.broadcast %21 : vector<16x1xf32> to vector<16x16xf32>
    %23 = arith.cmpf oeq, %15, %22 : vector<16x16xf32>
    %cst_11 = arith.constant 1.600000e+01 : f32
    %24 = vector.broadcast %cst_11 : f32 to vector<16x16xf32>
    %25 = arith.select %23, %17, %24 : vector<16x16xi1>, vector<16x16xf32>
    %cst_12 = arith.constant dense<0x7F800000> : vector<16xf32>
    %26 = vector.multi_reduction <minimumf>, %25, %cst_12 [1] : vector<16x16xf32> to vector<16xf32>
    %27 = vector.shape_cast %26 : vector<16xf32> to vector<16x1xf32>
    %c0_i32_13 = arith.constant 0 : i32
    %28 = vector.broadcast %c0_i32_13 : i32 to vector<16x4xi32>
    %29 = arith.cmpi eq, %18, %28 : vector<16x4xi32>
    %30 = arith.fptosi %27 : vector<16x1xf32> to vector<16x1xi32>
    %31 = vector.shape_cast %30 : vector<16x1xi32> to vector<16x1xi32>
    %32 = vector.broadcast %31 : vector<16x1xi32> to vector<16x4xi32>
    %33 = arith.select %29, %32, %19 : vector<16x4xi1>, vector<16x4xi32>
    %34 = vector.broadcast %27 : vector<16x1xf32> to vector<16x16xf32>
    %35 = arith.cmpf oeq, %17, %34 : vector<16x16xf32>
    %cst_14 = arith.constant 0xFF800000 : f32
    %36 = vector.broadcast %cst_14 : f32 to vector<16x16xf32>
    %37 = arith.select %35, %36, %15 : vector<16x16xi1>, vector<16x16xf32>
    %cst_15 = arith.constant dense<0xFF800000> : vector<16xf32>
    %38 = vector.multi_reduction <maximumf>, %37, %cst_15 [1] : vector<16x16xf32> to vector<16xf32>
    %39 = vector.shape_cast %38 : vector<16xf32> to vector<16x1xf32>
    %40 = vector.broadcast %39 : vector<16x1xf32> to vector<16x16xf32>
    %41 = arith.cmpf oeq, %37, %40 : vector<16x16xf32>
    %cst_16 = arith.constant 1.600000e+01 : f32
    %42 = vector.broadcast %cst_16 : f32 to vector<16x16xf32>
    %43 = arith.select %41, %17, %42 : vector<16x16xi1>, vector<16x16xf32>
    %cst_17 = arith.constant dense<0x7F800000> : vector<16xf32>
    %44 = vector.multi_reduction <minimumf>, %43, %cst_17 [1] : vector<16x16xf32> to vector<16xf32>
    %45 = vector.shape_cast %44 : vector<16xf32> to vector<16x1xf32>
    %c1_i32 = arith.constant 1 : i32
    %46 = vector.broadcast %c1_i32 : i32 to vector<16x4xi32>
    %47 = arith.cmpi eq, %18, %46 : vector<16x4xi32>
    %48 = arith.fptosi %45 : vector<16x1xf32> to vector<16x1xi32>
    %49 = vector.shape_cast %48 : vector<16x1xi32> to vector<16x1xi32>
    %50 = vector.broadcast %49 : vector<16x1xi32> to vector<16x4xi32>
    %51 = arith.select %47, %50, %33 : vector<16x4xi1>, vector<16x4xi32>
    %52 = vector.broadcast %45 : vector<16x1xf32> to vector<16x16xf32>
    %53 = arith.cmpf oeq, %17, %52 : vector<16x16xf32>
    %cst_18 = arith.constant 0xFF800000 : f32
    %54 = vector.broadcast %cst_18 : f32 to vector<16x16xf32>
    %55 = arith.select %53, %54, %37 : vector<16x16xi1>, vector<16x16xf32>
    %cst_19 = arith.constant dense<0xFF800000> : vector<16xf32>
    %56 = vector.multi_reduction <maximumf>, %55, %cst_19 [1] : vector<16x16xf32> to vector<16xf32>
    %57 = vector.shape_cast %56 : vector<16xf32> to vector<16x1xf32>
    %58 = vector.broadcast %57 : vector<16x1xf32> to vector<16x16xf32>
    %59 = arith.cmpf oeq, %55, %58 : vector<16x16xf32>
    %cst_20 = arith.constant 1.600000e+01 : f32
    %60 = vector.broadcast %cst_20 : f32 to vector<16x16xf32>
    %61 = arith.select %59, %17, %60 : vector<16x16xi1>, vector<16x16xf32>
    %cst_21 = arith.constant dense<0x7F800000> : vector<16xf32>
    %62 = vector.multi_reduction <minimumf>, %61, %cst_21 [1] : vector<16x16xf32> to vector<16xf32>
    %63 = vector.shape_cast %62 : vector<16xf32> to vector<16x1xf32>
    %c2_i32 = arith.constant 2 : i32
    %64 = vector.broadcast %c2_i32 : i32 to vector<16x4xi32>
    %65 = arith.cmpi eq, %18, %64 : vector<16x4xi32>
    %66 = arith.fptosi %63 : vector<16x1xf32> to vector<16x1xi32>
    %67 = vector.shape_cast %66 : vector<16x1xi32> to vector<16x1xi32>
    %68 = vector.broadcast %67 : vector<16x1xi32> to vector<16x4xi32>
    %69 = arith.select %65, %68, %51 : vector<16x4xi1>, vector<16x4xi32>
    %70 = vector.broadcast %63 : vector<16x1xf32> to vector<16x16xf32>
    %71 = arith.cmpf oeq, %17, %70 : vector<16x16xf32>
    %cst_22 = arith.constant 0xFF800000 : f32
    %72 = vector.broadcast %cst_22 : f32 to vector<16x16xf32>
    %73 = arith.select %71, %72, %55 : vector<16x16xi1>, vector<16x16xf32>
    %cst_23 = arith.constant dense<0xFF800000> : vector<16xf32>
    %74 = vector.multi_reduction <maximumf>, %73, %cst_23 [1] : vector<16x16xf32> to vector<16xf32>
    %75 = vector.shape_cast %74 : vector<16xf32> to vector<16x1xf32>
    %76 = vector.broadcast %75 : vector<16x1xf32> to vector<16x16xf32>
    %77 = arith.cmpf oeq, %73, %76 : vector<16x16xf32>
    %cst_24 = arith.constant 1.600000e+01 : f32
    %78 = vector.broadcast %cst_24 : f32 to vector<16x16xf32>
    %79 = arith.select %77, %17, %78 : vector<16x16xi1>, vector<16x16xf32>
    %cst_25 = arith.constant dense<0x7F800000> : vector<16xf32>
    %80 = vector.multi_reduction <minimumf>, %79, %cst_25 [1] : vector<16x16xf32> to vector<16xf32>
    %81 = vector.shape_cast %80 : vector<16xf32> to vector<16x1xf32>
    %c3_i32 = arith.constant 3 : i32
    %82 = vector.broadcast %c3_i32 : i32 to vector<16x4xi32>
    %83 = arith.cmpi eq, %18, %82 : vector<16x4xi32>
    %84 = arith.fptosi %81 : vector<16x1xf32> to vector<16x1xi32>
    %85 = vector.shape_cast %84 : vector<16x1xi32> to vector<16x1xi32>
    %86 = vector.broadcast %85 : vector<16x1xi32> to vector<16x4xi32>
    %87 = arith.select %83, %86, %69 : vector<16x4xi1>, vector<16x4xi32>
    %c0_26 = arith.constant 0 : index
    %c0_27 = arith.constant 0 : index
    %c0_28 = arith.constant 0 : index
    %88 = vector.load %arg5[%c0_26, %c0_27, %c0_28] : memref<1x16x4xi32, #tpu.memory_space<vmem>>, vector<1x16x4xi32>
    %89 = vector.shape_cast %88 : vector<1x16x4xi32> to vector<16x4xi32>
    %90 = vector.shape_cast %87 : vector<16x4xi32> to vector<1x16x4xi32>
    tpu.vector_store %arg5[%c0_26, %c0_27, %c0_28], %90 {strides = array<i32>} : memref<1x16x4xi32, #tpu.memory_space<vmem>>, vector<1x16x4xi32>,
    return
  }
  func.func @transform_0(%arg0: i32, %arg1: i32) -> (i32, i32, i32) {
    %c0_i32 = arith.constant 0 : i32
    %c0_i32_0 = arith.constant 0 : i32
    return %arg0, %arg1, %c0_i32 : i32, i32, i32
  }
  func.func @transform_1(%arg0: i32, %arg1: i32) -> (i32, i32, i32) {
    %c0_i32 = arith.constant 0 : i32
    %c0_i32_0 = arith.constant 0 : i32
    %c0_i32_1 = arith.constant 0 : i32
    return %arg0, %c0_i32, %c0_i32_0 : i32, i32, i32
  }
  func.func @transform_2(%arg0: i32, %arg1: i32) -> (i32, i32, i32) {
    %c0_i32 = arith.constant 0 : i32
    %c0_i32_0 = arith.constant 0 : i32
    %c0_i32_1 = arith.constant 0 : i32
    return %arg0, %c0_i32, %c0_i32_0 : i32, i32, i32
  }
  func.func @transform_3(%arg0: i32, %arg1: i32) -> (i32, i32, i32) {
    %c0_i32 = arith.constant 0 : i32
    %c0_i32_0 = arith.constant 0 : i32
    return %arg0, %arg1, %c0_i32 : i32, i32, i32
  }
}

module attributes {stable_mosaic.version = 11 : i64} {
  func.func @_edge_conv_kernel(%arg0: i32, %arg1: i32, %arg2: memref<1x4x16x3xf32, #tpu.memory_space<vmem>>, %arg3: memref<1x16x3xf32, #tpu.memory_space<vmem>>, %arg4: memref<3x64xbf16, #tpu.memory_space<vmem>>, %arg5: memref<3x64xbf16, #tpu.memory_space<vmem>>, %arg6: memref<1x64xf32, #tpu.memory_space<vmem>>, %arg7: memref<1x16x64xbf16, #tpu.memory_space<vmem>>) attributes {dimension_semantics = [#tpu.dimension_semantics<parallel>, #tpu.dimension_semantics<parallel>], iteration_bounds = array<i64: 2, 1>, scalar_prefetch = 0 : i64, scratch_operands = 0 : i64, tpu.core_type = #tpu.core_type<tc>, window_params = [{transform_indices = @transform_0, window_bounds = array<i64: 1, 4, 16, 3>}, {transform_indices = @transform_1, window_bounds = array<i64: 1, 16, 3>}, {pipeline_mode = #tpu.pipeline_mode<synchronous>, transform_indices = @transform_2, window_bounds = array<i64: 3, 64>}, {pipeline_mode = #tpu.pipeline_mode<synchronous>, transform_indices = @transform_3, window_bounds = array<i64: 3, 64>}, {pipeline_mode = #tpu.pipeline_mode<synchronous>, transform_indices = @transform_4, window_bounds = array<i64: 1, 64>}, {transform_indices = @transform_5, window_bounds = array<i64: 1, 16, 64>}]} {
    %c0 = arith.constant 0 : index
    %c0_0 = arith.constant 0 : index
    %c0_1 = arith.constant 0 : index
    %0 = vector.load %arg3[%c0, %c0_0, %c0_1] : memref<1x16x3xf32, #tpu.memory_space<vmem>>, vector<1x16x3xf32>
    %1 = vector.shape_cast %0 : vector<1x16x3xf32> to vector<16x3xf32>
    %2 = arith.truncf %1 : vector<16x3xf32> to vector<16x3xbf16>
    %c0_2 = arith.constant 0 : index
    %c0_3 = arith.constant 0 : index
    %3 = vector.load %arg5[%c0_2, %c0_3] : memref<3x64xbf16, #tpu.memory_space<vmem>>, vector<3x64xbf16>
    %cst = arith.constant dense<0.000000e+00> : vector<16x64xf32>
    %4 = tpu.matmul %2, %3, %cst {dimension_numbers = #tpu.dot_dimension_numbers<[1], [0], [0], [1], [0, 0, 1, 1], [], []>} : vector<16x3xbf16>, vector<3x64xbf16>, vector<16x64xf32> -> vector<16x64xf32>
    %c0_4 = arith.constant 0 : index
    %c0_5 = arith.constant 0 : index
    %5 = vector.load %arg6[%c0_4, %c0_5] : memref<1x64xf32, #tpu.memory_space<vmem>>, vector<1x64xf32>
    %6 = vector.broadcast %5 : vector<1x64xf32> to vector<16x64xf32>
    %7 = arith.addf %4, %6 : vector<16x64xf32>
    %c0_6 = arith.constant 0 : index
    %c0_7 = arith.constant 0 : index
    %c0_8 = arith.constant 0 : index
    %c0_9 = arith.constant 0 : index
    %8 = vector.load %arg2[%c0_6, %c0_7, %c0_8, %c0_9] : memref<1x4x16x3xf32, #tpu.memory_space<vmem>>, vector<1x4x16x3xf32>
    %9 = vector.shape_cast %8 : vector<1x4x16x3xf32> to vector<4x16x3xf32>
    %10 = arith.truncf %9 : vector<4x16x3xf32> to vector<4x16x3xbf16>
    %11 = vector.shape_cast %10 : vector<4x16x3xbf16> to vector<64x3xbf16>
    %c0_10 = arith.constant 0 : index
    %c0_11 = arith.constant 0 : index
    %12 = vector.load %arg4[%c0_10, %c0_11] : memref<3x64xbf16, #tpu.memory_space<vmem>>, vector<3x64xbf16>
    %cst_12 = arith.constant dense<0.000000e+00> : vector<64x64xf32>
    %13 = tpu.matmul %11, %12, %cst_12 {dimension_numbers = #tpu.dot_dimension_numbers<[1], [0], [0], [1], [0, 0, 1, 1], [], []>} : vector<64x3xbf16>, vector<3x64xbf16>, vector<64x64xf32> -> vector<64x64xf32>
    %14 = vector.shape_cast %13 : vector<64x64xf32> to vector<4x16x64xf32>
    %15 = vector.shape_cast %7 : vector<16x64xf32> to vector<1x16x64xf32>
    %16 = vector.broadcast %15 : vector<1x16x64xf32> to vector<4x16x64xf32>
    %17 = arith.addf %14, %16 : vector<4x16x64xf32>
    %cst_13 = arith.constant 0.000000e+00 : f32
    %18 = vector.broadcast %cst_13 : f32 to vector<4x16x64xf32>
    %19 = arith.cmpf ogt, %17, %18 : vector<4x16x64xf32>
    %cst_14 = arith.constant 2.000000e-01 : f32
    %20 = vector.broadcast %cst_14 : f32 to vector<4x16x64xf32>
    %21 = arith.mulf %20, %17 : vector<4x16x64xf32>
    %22 = arith.select %19, %17, %21 : vector<4x16x64xi1>, vector<4x16x64xf32>
    %cst_15 = arith.constant dense<0xFF800000> : vector<16x64xf32>
    %23 = vector.multi_reduction <maximumf>, %22, %cst_15 [0] : vector<4x16x64xf32> to vector<16x64xf32>
    %24 = arith.truncf %23 : vector<16x64xf32> to vector<16x64xbf16>
    %c0_16 = arith.constant 0 : index
    %c0_17 = arith.constant 0 : index
    %c0_18 = arith.constant 0 : index
    %25 = vector.load %arg7[%c0_16, %c0_17, %c0_18] : memref<1x16x64xbf16, #tpu.memory_space<vmem>>, vector<1x16x64xbf16>
    %26 = vector.shape_cast %25 : vector<1x16x64xbf16> to vector<16x64xbf16>
    %27 = vector.shape_cast %24 : vector<16x64xbf16> to vector<1x16x64xbf16>
    tpu.vector_store %arg7[%c0_16, %c0_17, %c0_18], %27 {strides = array<i32>} : memref<1x16x64xbf16, #tpu.memory_space<vmem>>, vector<1x16x64xbf16>,
    return
  }
  func.func @transform_0(%arg0: i32, %arg1: i32) -> (i32, i32, i32, i32) {
    %c0_i32 = arith.constant 0 : i32
    %c0_i32_0 = arith.constant 0 : i32
    %c0_i32_1 = arith.constant 0 : i32
    return %arg0, %c0_i32, %arg1, %c0_i32_0 : i32, i32, i32, i32
  }
  func.func @transform_1(%arg0: i32, %arg1: i32) -> (i32, i32, i32) {
    %c0_i32 = arith.constant 0 : i32
    %c0_i32_0 = arith.constant 0 : i32
    return %arg0, %arg1, %c0_i32 : i32, i32, i32
  }
  func.func @transform_2(%arg0: i32, %arg1: i32) -> (i32, i32) {
    %c0_i32 = arith.constant 0 : i32
    %c0_i32_0 = arith.constant 0 : i32
    %c0_i32_1 = arith.constant 0 : i32
    return %c0_i32, %c0_i32_0 : i32, i32
  }
  func.func @transform_3(%arg0: i32, %arg1: i32) -> (i32, i32) {
    %c0_i32 = arith.constant 0 : i32
    %c0_i32_0 = arith.constant 0 : i32
    %c0_i32_1 = arith.constant 0 : i32
    return %c0_i32, %c0_i32_0 : i32, i32
  }
  func.func @transform_4(%arg0: i32, %arg1: i32) -> (i32, i32) {
    %c0_i32 = arith.constant 0 : i32
    %c0_i32_0 = arith.constant 0 : i32
    %c0_i32_1 = arith.constant 0 : i32
    return %c0_i32, %c0_i32_0 : i32, i32
  }
  func.func @transform_5(%arg0: i32, %arg1: i32) -> (i32, i32, i32) {
    %c0_i32 = arith.constant 0 : i32
    %c0_i32_0 = arith.constant 0 : i32
    return %arg0, %arg1, %c0_i32 : i32, i32, i32
  }
}

module attributes {stable_mosaic.version = 11 : i64} {
  func.func @_knn_kernel(%arg0: i32, %arg1: i32, %arg2: memref<1x16x64xbf16, #tpu.memory_space<vmem>>, %arg3: memref<1x64x16xbf16, #tpu.memory_space<vmem>>, %arg4: memref<1x1x16xf32, #tpu.memory_space<vmem>>, %arg5: memref<1x16x4xi32, #tpu.memory_space<vmem>>) attributes {dimension_semantics = [#tpu.dimension_semantics<parallel>, #tpu.dimension_semantics<parallel>], iteration_bounds = array<i64: 2, 1>, scalar_prefetch = 0 : i64, scratch_operands = 0 : i64, tpu.core_type = #tpu.core_type<tc>, window_params = [{transform_indices = @transform_0, window_bounds = array<i64: 1, 16, 64>}, {transform_indices = @transform_1, window_bounds = array<i64: 1, 64, 16>}, {transform_indices = @transform_2, window_bounds = array<i64: 1, 1, 16>}, {transform_indices = @transform_3, window_bounds = array<i64: 1, 16, 4>}]} {
    %c0 = arith.constant 0 : index
    %c0_0 = arith.constant 0 : index
    %c0_1 = arith.constant 0 : index
    %0 = vector.load %arg2[%c0, %c0_0, %c0_1] : memref<1x16x64xbf16, #tpu.memory_space<vmem>>, vector<1x16x64xbf16>
    %1 = vector.shape_cast %0 : vector<1x16x64xbf16> to vector<16x64xbf16>
    %c0_2 = arith.constant 0 : index
    %c0_3 = arith.constant 0 : index
    %c0_4 = arith.constant 0 : index
    %2 = vector.load %arg3[%c0_2, %c0_3, %c0_4] : memref<1x64x16xbf16, #tpu.memory_space<vmem>>, vector<1x64x16xbf16>
    %3 = vector.shape_cast %2 : vector<1x64x16xbf16> to vector<64x16xbf16>
    %cst = arith.constant dense<0.000000e+00> : vector<16x16xf32>
    %4 = tpu.matmul %1, %3, %cst {dimension_numbers = #tpu.dot_dimension_numbers<[1], [0], [0], [1], [0, 0, 1, 1], [], []>} : vector<16x64xbf16>, vector<64x16xbf16>, vector<16x16xf32> -> vector<16x16xf32>
    %5 = arith.extf %1 : vector<16x64xbf16> to vector<16x64xf32>
    %6 = arith.mulf %5, %5 : vector<16x64xf32>
    %cst_5 = arith.constant dense<0.000000e+00> : vector<16xf32>
    %7 = vector.multi_reduction <add>, %6, %cst_5 [1] : vector<16x64xf32> to vector<16xf32>
    %8 = vector.shape_cast %7 : vector<16xf32> to vector<16x1xf32>
    %cst_6 = arith.constant 2.000000e+00 : f32
    %9 = vector.broadcast %cst_6 : f32 to vector<16x16xf32>
    %10 = arith.mulf %9, %4 : vector<16x16xf32>
    %11 = vector.broadcast %8 : vector<16x1xf32> to vector<16x16xf32>
    %12 = arith.subf %10, %11 : vector<16x16xf32>
    %c0_7 = arith.constant 0 : index
    %c0_8 = arith.constant 0 : index
    %c0_9 = arith.constant 0 : index
    %13 = vector.load %arg4[%c0_7, %c0_8, %c0_9] : memref<1x1x16xf32, #tpu.memory_space<vmem>>, vector<1x1x16xf32>
    %14 = vector.shape_cast %13 : vector<1x1x16xf32> to vector<1x16xf32>
    %15 = vector.broadcast %14 : vector<1x16xf32> to vector<16x16xf32>
    %16 = arith.subf %12, %15 : vector<16x16xf32>
    %17 = tpu.iota {dimensions = array<i32: 1>} : vector<16x16xi32>
    %18 = arith.sitofp %17 : vector<16x16xi32> to vector<16x16xf32>
    %19 = tpu.iota {dimensions = array<i32: 1>} : vector<16x4xi32>
    %c0_i32 = arith.constant 0 : i32
    %20 = vector.broadcast %c0_i32 : i32 to vector<16x4xi32>
    %cst_10 = arith.constant dense<0xFF800000> : vector<16xf32>
    %21 = vector.multi_reduction <maximumf>, %16, %cst_10 [1] : vector<16x16xf32> to vector<16xf32>
    %22 = vector.shape_cast %21 : vector<16xf32> to vector<16x1xf32>
    %23 = vector.broadcast %22 : vector<16x1xf32> to vector<16x16xf32>
    %24 = arith.cmpf oeq, %16, %23 : vector<16x16xf32>
    %cst_11 = arith.constant 1.600000e+01 : f32
    %25 = vector.broadcast %cst_11 : f32 to vector<16x16xf32>
    %26 = arith.select %24, %18, %25 : vector<16x16xi1>, vector<16x16xf32>
    %cst_12 = arith.constant dense<0x7F800000> : vector<16xf32>
    %27 = vector.multi_reduction <minimumf>, %26, %cst_12 [1] : vector<16x16xf32> to vector<16xf32>
    %28 = vector.shape_cast %27 : vector<16xf32> to vector<16x1xf32>
    %c0_i32_13 = arith.constant 0 : i32
    %29 = vector.broadcast %c0_i32_13 : i32 to vector<16x4xi32>
    %30 = arith.cmpi eq, %19, %29 : vector<16x4xi32>
    %31 = arith.fptosi %28 : vector<16x1xf32> to vector<16x1xi32>
    %32 = vector.shape_cast %31 : vector<16x1xi32> to vector<16x1xi32>
    %33 = vector.broadcast %32 : vector<16x1xi32> to vector<16x4xi32>
    %34 = arith.select %30, %33, %20 : vector<16x4xi1>, vector<16x4xi32>
    %35 = vector.broadcast %28 : vector<16x1xf32> to vector<16x16xf32>
    %36 = arith.cmpf oeq, %18, %35 : vector<16x16xf32>
    %cst_14 = arith.constant 0xFF800000 : f32
    %37 = vector.broadcast %cst_14 : f32 to vector<16x16xf32>
    %38 = arith.select %36, %37, %16 : vector<16x16xi1>, vector<16x16xf32>
    %cst_15 = arith.constant dense<0xFF800000> : vector<16xf32>
    %39 = vector.multi_reduction <maximumf>, %38, %cst_15 [1] : vector<16x16xf32> to vector<16xf32>
    %40 = vector.shape_cast %39 : vector<16xf32> to vector<16x1xf32>
    %41 = vector.broadcast %40 : vector<16x1xf32> to vector<16x16xf32>
    %42 = arith.cmpf oeq, %38, %41 : vector<16x16xf32>
    %cst_16 = arith.constant 1.600000e+01 : f32
    %43 = vector.broadcast %cst_16 : f32 to vector<16x16xf32>
    %44 = arith.select %42, %18, %43 : vector<16x16xi1>, vector<16x16xf32>
    %cst_17 = arith.constant dense<0x7F800000> : vector<16xf32>
    %45 = vector.multi_reduction <minimumf>, %44, %cst_17 [1] : vector<16x16xf32> to vector<16xf32>
    %46 = vector.shape_cast %45 : vector<16xf32> to vector<16x1xf32>
    %c1_i32 = arith.constant 1 : i32
    %47 = vector.broadcast %c1_i32 : i32 to vector<16x4xi32>
    %48 = arith.cmpi eq, %19, %47 : vector<16x4xi32>
    %49 = arith.fptosi %46 : vector<16x1xf32> to vector<16x1xi32>
    %50 = vector.shape_cast %49 : vector<16x1xi32> to vector<16x1xi32>
    %51 = vector.broadcast %50 : vector<16x1xi32> to vector<16x4xi32>
    %52 = arith.select %48, %51, %34 : vector<16x4xi1>, vector<16x4xi32>
    %53 = vector.broadcast %46 : vector<16x1xf32> to vector<16x16xf32>
    %54 = arith.cmpf oeq, %18, %53 : vector<16x16xf32>
    %cst_18 = arith.constant 0xFF800000 : f32
    %55 = vector.broadcast %cst_18 : f32 to vector<16x16xf32>
    %56 = arith.select %54, %55, %38 : vector<16x16xi1>, vector<16x16xf32>
    %cst_19 = arith.constant dense<0xFF800000> : vector<16xf32>
    %57 = vector.multi_reduction <maximumf>, %56, %cst_19 [1] : vector<16x16xf32> to vector<16xf32>
    %58 = vector.shape_cast %57 : vector<16xf32> to vector<16x1xf32>
    %59 = vector.broadcast %58 : vector<16x1xf32> to vector<16x16xf32>
    %60 = arith.cmpf oeq, %56, %59 : vector<16x16xf32>
    %cst_20 = arith.constant 1.600000e+01 : f32
    %61 = vector.broadcast %cst_20 : f32 to vector<16x16xf32>
    %62 = arith.select %60, %18, %61 : vector<16x16xi1>, vector<16x16xf32>
    %cst_21 = arith.constant dense<0x7F800000> : vector<16xf32>
    %63 = vector.multi_reduction <minimumf>, %62, %cst_21 [1] : vector<16x16xf32> to vector<16xf32>
    %64 = vector.shape_cast %63 : vector<16xf32> to vector<16x1xf32>
    %c2_i32 = arith.constant 2 : i32
    %65 = vector.broadcast %c2_i32 : i32 to vector<16x4xi32>
    %66 = arith.cmpi eq, %19, %65 : vector<16x4xi32>
    %67 = arith.fptosi %64 : vector<16x1xf32> to vector<16x1xi32>
    %68 = vector.shape_cast %67 : vector<16x1xi32> to vector<16x1xi32>
    %69 = vector.broadcast %68 : vector<16x1xi32> to vector<16x4xi32>
    %70 = arith.select %66, %69, %52 : vector<16x4xi1>, vector<16x4xi32>
    %71 = vector.broadcast %64 : vector<16x1xf32> to vector<16x16xf32>
    %72 = arith.cmpf oeq, %18, %71 : vector<16x16xf32>
    %cst_22 = arith.constant 0xFF800000 : f32
    %73 = vector.broadcast %cst_22 : f32 to vector<16x16xf32>
    %74 = arith.select %72, %73, %56 : vector<16x16xi1>, vector<16x16xf32>
    %cst_23 = arith.constant dense<0xFF800000> : vector<16xf32>
    %75 = vector.multi_reduction <maximumf>, %74, %cst_23 [1] : vector<16x16xf32> to vector<16xf32>
    %76 = vector.shape_cast %75 : vector<16xf32> to vector<16x1xf32>
    %77 = vector.broadcast %76 : vector<16x1xf32> to vector<16x16xf32>
    %78 = arith.cmpf oeq, %74, %77 : vector<16x16xf32>
    %cst_24 = arith.constant 1.600000e+01 : f32
    %79 = vector.broadcast %cst_24 : f32 to vector<16x16xf32>
    %80 = arith.select %78, %18, %79 : vector<16x16xi1>, vector<16x16xf32>
    %cst_25 = arith.constant dense<0x7F800000> : vector<16xf32>
    %81 = vector.multi_reduction <minimumf>, %80, %cst_25 [1] : vector<16x16xf32> to vector<16xf32>
    %82 = vector.shape_cast %81 : vector<16xf32> to vector<16x1xf32>
    %c3_i32 = arith.constant 3 : i32
    %83 = vector.broadcast %c3_i32 : i32 to vector<16x4xi32>
    %84 = arith.cmpi eq, %19, %83 : vector<16x4xi32>
    %85 = arith.fptosi %82 : vector<16x1xf32> to vector<16x1xi32>
    %86 = vector.shape_cast %85 : vector<16x1xi32> to vector<16x1xi32>
    %87 = vector.broadcast %86 : vector<16x1xi32> to vector<16x4xi32>
    %88 = arith.select %84, %87, %70 : vector<16x4xi1>, vector<16x4xi32>
    %c0_26 = arith.constant 0 : index
    %c0_27 = arith.constant 0 : index
    %c0_28 = arith.constant 0 : index
    %89 = vector.load %arg5[%c0_26, %c0_27, %c0_28] : memref<1x16x4xi32, #tpu.memory_space<vmem>>, vector<1x16x4xi32>
    %90 = vector.shape_cast %89 : vector<1x16x4xi32> to vector<16x4xi32>
    %91 = vector.shape_cast %88 : vector<16x4xi32> to vector<1x16x4xi32>
    tpu.vector_store %arg5[%c0_26, %c0_27, %c0_28], %91 {strides = array<i32>} : memref<1x16x4xi32, #tpu.memory_space<vmem>>, vector<1x16x4xi32>,
    return
  }
  func.func @transform_0(%arg0: i32, %arg1: i32) -> (i32, i32, i32) {
    %c0_i32 = arith.constant 0 : i32
    %c0_i32_0 = arith.constant 0 : i32
    return %arg0, %arg1, %c0_i32 : i32, i32, i32
  }
  func.func @transform_1(%arg0: i32, %arg1: i32) -> (i32, i32, i32) {
    %c0_i32 = arith.constant 0 : i32
    %c0_i32_0 = arith.constant 0 : i32
    %c0_i32_1 = arith.constant 0 : i32
    return %arg0, %c0_i32, %c0_i32_0 : i32, i32, i32
  }
  func.func @transform_2(%arg0: i32, %arg1: i32) -> (i32, i32, i32) {
    %c0_i32 = arith.constant 0 : i32
    %c0_i32_0 = arith.constant 0 : i32
    %c0_i32_1 = arith.constant 0 : i32
    return %arg0, %c0_i32, %c0_i32_0 : i32, i32, i32
  }
  func.func @transform_3(%arg0: i32, %arg1: i32) -> (i32, i32, i32) {
    %c0_i32 = arith.constant 0 : i32
    %c0_i32_0 = arith.constant 0 : i32
    return %arg0, %arg1, %c0_i32 : i32, i32, i32
  }
}

module attributes {stable_mosaic.version = 11 : i64} {
  func.func @_edge_conv_kernel(%arg0: i32, %arg1: i32, %arg2: memref<1x4x16x64xbf16, #tpu.memory_space<vmem>>, %arg3: memref<1x16x64xbf16, #tpu.memory_space<vmem>>, %arg4: memref<64x64xbf16, #tpu.memory_space<vmem>>, %arg5: memref<64x64xbf16, #tpu.memory_space<vmem>>, %arg6: memref<1x64xf32, #tpu.memory_space<vmem>>, %arg7: memref<1x16x64xbf16, #tpu.memory_space<vmem>>) attributes {dimension_semantics = [#tpu.dimension_semantics<parallel>, #tpu.dimension_semantics<parallel>], iteration_bounds = array<i64: 2, 1>, scalar_prefetch = 0 : i64, scratch_operands = 0 : i64, tpu.core_type = #tpu.core_type<tc>, window_params = [{transform_indices = @transform_0, window_bounds = array<i64: 1, 4, 16, 64>}, {transform_indices = @transform_1, window_bounds = array<i64: 1, 16, 64>}, {pipeline_mode = #tpu.pipeline_mode<synchronous>, transform_indices = @transform_2, window_bounds = array<i64: 64, 64>}, {pipeline_mode = #tpu.pipeline_mode<synchronous>, transform_indices = @transform_3, window_bounds = array<i64: 64, 64>}, {pipeline_mode = #tpu.pipeline_mode<synchronous>, transform_indices = @transform_4, window_bounds = array<i64: 1, 64>}, {transform_indices = @transform_5, window_bounds = array<i64: 1, 16, 64>}]} {
    %c0 = arith.constant 0 : index
    %c0_0 = arith.constant 0 : index
    %c0_1 = arith.constant 0 : index
    %0 = vector.load %arg3[%c0, %c0_0, %c0_1] : memref<1x16x64xbf16, #tpu.memory_space<vmem>>, vector<1x16x64xbf16>
    %1 = vector.shape_cast %0 : vector<1x16x64xbf16> to vector<16x64xbf16>
    %c0_2 = arith.constant 0 : index
    %c0_3 = arith.constant 0 : index
    %2 = vector.load %arg5[%c0_2, %c0_3] : memref<64x64xbf16, #tpu.memory_space<vmem>>, vector<64x64xbf16>
    %cst = arith.constant dense<0.000000e+00> : vector<16x64xf32>
    %3 = tpu.matmul %1, %2, %cst {dimension_numbers = #tpu.dot_dimension_numbers<[1], [0], [0], [1], [0, 0, 1, 1], [], []>} : vector<16x64xbf16>, vector<64x64xbf16>, vector<16x64xf32> -> vector<16x64xf32>
    %c0_4 = arith.constant 0 : index
    %c0_5 = arith.constant 0 : index
    %4 = vector.load %arg6[%c0_4, %c0_5] : memref<1x64xf32, #tpu.memory_space<vmem>>, vector<1x64xf32>
    %5 = vector.broadcast %4 : vector<1x64xf32> to vector<16x64xf32>
    %6 = arith.addf %3, %5 : vector<16x64xf32>
    %c0_6 = arith.constant 0 : index
    %c0_7 = arith.constant 0 : index
    %c0_8 = arith.constant 0 : index
    %c0_9 = arith.constant 0 : index
    %7 = vector.load %arg2[%c0_6, %c0_7, %c0_8, %c0_9] : memref<1x4x16x64xbf16, #tpu.memory_space<vmem>>, vector<1x4x16x64xbf16>
    %8 = vector.shape_cast %7 : vector<1x4x16x64xbf16> to vector<4x16x64xbf16>
    %9 = vector.shape_cast %8 : vector<4x16x64xbf16> to vector<64x64xbf16>
    %c0_10 = arith.constant 0 : index
    %c0_11 = arith.constant 0 : index
    %10 = vector.load %arg4[%c0_10, %c0_11] : memref<64x64xbf16, #tpu.memory_space<vmem>>, vector<64x64xbf16>
    %cst_12 = arith.constant dense<0.000000e+00> : vector<64x64xf32>
    %11 = tpu.matmul %9, %10, %cst_12 {dimension_numbers = #tpu.dot_dimension_numbers<[1], [0], [0], [1], [0, 0, 1, 1], [], []>} : vector<64x64xbf16>, vector<64x64xbf16>, vector<64x64xf32> -> vector<64x64xf32>
    %12 = vector.shape_cast %11 : vector<64x64xf32> to vector<4x16x64xf32>
    %13 = vector.shape_cast %6 : vector<16x64xf32> to vector<1x16x64xf32>
    %14 = vector.broadcast %13 : vector<1x16x64xf32> to vector<4x16x64xf32>
    %15 = arith.addf %12, %14 : vector<4x16x64xf32>
    %cst_13 = arith.constant 0.000000e+00 : f32
    %16 = vector.broadcast %cst_13 : f32 to vector<4x16x64xf32>
    %17 = arith.cmpf ogt, %15, %16 : vector<4x16x64xf32>
    %cst_14 = arith.constant 2.000000e-01 : f32
    %18 = vector.broadcast %cst_14 : f32 to vector<4x16x64xf32>
    %19 = arith.mulf %18, %15 : vector<4x16x64xf32>
    %20 = arith.select %17, %15, %19 : vector<4x16x64xi1>, vector<4x16x64xf32>
    %cst_15 = arith.constant dense<0xFF800000> : vector<16x64xf32>
    %21 = vector.multi_reduction <maximumf>, %20, %cst_15 [0] : vector<4x16x64xf32> to vector<16x64xf32>
    %22 = arith.truncf %21 : vector<16x64xf32> to vector<16x64xbf16>
    %c0_16 = arith.constant 0 : index
    %c0_17 = arith.constant 0 : index
    %c0_18 = arith.constant 0 : index
    %23 = vector.load %arg7[%c0_16, %c0_17, %c0_18] : memref<1x16x64xbf16, #tpu.memory_space<vmem>>, vector<1x16x64xbf16>
    %24 = vector.shape_cast %23 : vector<1x16x64xbf16> to vector<16x64xbf16>
    %25 = vector.shape_cast %22 : vector<16x64xbf16> to vector<1x16x64xbf16>
    tpu.vector_store %arg7[%c0_16, %c0_17, %c0_18], %25 {strides = array<i32>} : memref<1x16x64xbf16, #tpu.memory_space<vmem>>, vector<1x16x64xbf16>,
    return
  }
  func.func @transform_0(%arg0: i32, %arg1: i32) -> (i32, i32, i32, i32) {
    %c0_i32 = arith.constant 0 : i32
    %c0_i32_0 = arith.constant 0 : i32
    %c0_i32_1 = arith.constant 0 : i32
    return %arg0, %c0_i32, %arg1, %c0_i32_0 : i32, i32, i32, i32
  }
  func.func @transform_1(%arg0: i32, %arg1: i32) -> (i32, i32, i32) {
    %c0_i32 = arith.constant 0 : i32
    %c0_i32_0 = arith.constant 0 : i32
    return %arg0, %arg1, %c0_i32 : i32, i32, i32
  }
  func.func @transform_2(%arg0: i32, %arg1: i32) -> (i32, i32) {
    %c0_i32 = arith.constant 0 : i32
    %c0_i32_0 = arith.constant 0 : i32
    %c0_i32_1 = arith.constant 0 : i32
    return %c0_i32, %c0_i32_0 : i32, i32
  }
  func.func @transform_3(%arg0: i32, %arg1: i32) -> (i32, i32) {
    %c0_i32 = arith.constant 0 : i32
    %c0_i32_0 = arith.constant 0 : i32
    %c0_i32_1 = arith.constant 0 : i32
    return %c0_i32, %c0_i32_0 : i32, i32
  }
  func.func @transform_4(%arg0: i32, %arg1: i32) -> (i32, i32) {
    %c0_i32 = arith.constant 0 : i32
    %c0_i32_0 = arith.constant 0 : i32
    %c0_i32_1 = arith.constant 0 : i32
    return %c0_i32, %c0_i32_0 : i32, i32
  }
  func.func @transform_5(%arg0: i32, %arg1: i32) -> (i32, i32, i32) {
    %c0_i32 = arith.constant 0 : i32
    %c0_i32_0 = arith.constant 0 : i32
    return %arg0, %arg1, %c0_i32 : i32, i32, i32
  }
}

module attributes {stable_mosaic.version = 11 : i64} {
  func.func @_edge_conv_kernel(%arg0: i32, %arg1: i32, %arg2: memref<1x4x16x64xbf16, #tpu.memory_space<vmem>>, %arg3: memref<1x16x64xbf16, #tpu.memory_space<vmem>>, %arg4: memref<64x128xbf16, #tpu.memory_space<vmem>>, %arg5: memref<64x128xbf16, #tpu.memory_space<vmem>>, %arg6: memref<1x128xf32, #tpu.memory_space<vmem>>, %arg7: memref<1x16x128xbf16, #tpu.memory_space<vmem>>) attributes {dimension_semantics = [#tpu.dimension_semantics<parallel>, #tpu.dimension_semantics<parallel>], iteration_bounds = array<i64: 2, 1>, scalar_prefetch = 0 : i64, scratch_operands = 0 : i64, tpu.core_type = #tpu.core_type<tc>, window_params = [{transform_indices = @transform_0, window_bounds = array<i64: 1, 4, 16, 64>}, {transform_indices = @transform_1, window_bounds = array<i64: 1, 16, 64>}, {pipeline_mode = #tpu.pipeline_mode<synchronous>, transform_indices = @transform_2, window_bounds = array<i64: 64, 128>}, {pipeline_mode = #tpu.pipeline_mode<synchronous>, transform_indices = @transform_3, window_bounds = array<i64: 64, 128>}, {pipeline_mode = #tpu.pipeline_mode<synchronous>, transform_indices = @transform_4, window_bounds = array<i64: 1, 128>}, {transform_indices = @transform_5, window_bounds = array<i64: 1, 16, 128>}]} {
    %c0 = arith.constant 0 : index
    %c0_0 = arith.constant 0 : index
    %c0_1 = arith.constant 0 : index
    %0 = vector.load %arg3[%c0, %c0_0, %c0_1] : memref<1x16x64xbf16, #tpu.memory_space<vmem>>, vector<1x16x64xbf16>
    %1 = vector.shape_cast %0 : vector<1x16x64xbf16> to vector<16x64xbf16>
    %c0_2 = arith.constant 0 : index
    %c0_3 = arith.constant 0 : index
    %2 = vector.load %arg5[%c0_2, %c0_3] : memref<64x128xbf16, #tpu.memory_space<vmem>>, vector<64x128xbf16>
    %cst = arith.constant dense<0.000000e+00> : vector<16x128xf32>
    %3 = tpu.matmul %1, %2, %cst {dimension_numbers = #tpu.dot_dimension_numbers<[1], [0], [0], [1], [0, 0, 1, 1], [], []>} : vector<16x64xbf16>, vector<64x128xbf16>, vector<16x128xf32> -> vector<16x128xf32>
    %c0_4 = arith.constant 0 : index
    %c0_5 = arith.constant 0 : index
    %4 = vector.load %arg6[%c0_4, %c0_5] : memref<1x128xf32, #tpu.memory_space<vmem>>, vector<1x128xf32>
    %5 = vector.broadcast %4 : vector<1x128xf32> to vector<16x128xf32>
    %6 = arith.addf %3, %5 : vector<16x128xf32>
    %c0_6 = arith.constant 0 : index
    %c0_7 = arith.constant 0 : index
    %c0_8 = arith.constant 0 : index
    %c0_9 = arith.constant 0 : index
    %7 = vector.load %arg2[%c0_6, %c0_7, %c0_8, %c0_9] : memref<1x4x16x64xbf16, #tpu.memory_space<vmem>>, vector<1x4x16x64xbf16>
    %8 = vector.shape_cast %7 : vector<1x4x16x64xbf16> to vector<4x16x64xbf16>
    %9 = vector.shape_cast %8 : vector<4x16x64xbf16> to vector<64x64xbf16>
    %c0_10 = arith.constant 0 : index
    %c0_11 = arith.constant 0 : index
    %10 = vector.load %arg4[%c0_10, %c0_11] : memref<64x128xbf16, #tpu.memory_space<vmem>>, vector<64x128xbf16>
    %cst_12 = arith.constant dense<0.000000e+00> : vector<64x128xf32>
    %11 = tpu.matmul %9, %10, %cst_12 {dimension_numbers = #tpu.dot_dimension_numbers<[1], [0], [0], [1], [0, 0, 1, 1], [], []>} : vector<64x64xbf16>, vector<64x128xbf16>, vector<64x128xf32> -> vector<64x128xf32>
    %12 = vector.shape_cast %11 : vector<64x128xf32> to vector<4x16x128xf32>
    %13 = vector.shape_cast %6 : vector<16x128xf32> to vector<1x16x128xf32>
    %14 = vector.broadcast %13 : vector<1x16x128xf32> to vector<4x16x128xf32>
    %15 = arith.addf %12, %14 : vector<4x16x128xf32>
    %cst_13 = arith.constant 0.000000e+00 : f32
    %16 = vector.broadcast %cst_13 : f32 to vector<4x16x128xf32>
    %17 = arith.cmpf ogt, %15, %16 : vector<4x16x128xf32>
    %cst_14 = arith.constant 2.000000e-01 : f32
    %18 = vector.broadcast %cst_14 : f32 to vector<4x16x128xf32>
    %19 = arith.mulf %18, %15 : vector<4x16x128xf32>
    %20 = arith.select %17, %15, %19 : vector<4x16x128xi1>, vector<4x16x128xf32>
    %cst_15 = arith.constant dense<0xFF800000> : vector<16x128xf32>
    %21 = vector.multi_reduction <maximumf>, %20, %cst_15 [0] : vector<4x16x128xf32> to vector<16x128xf32>
    %22 = arith.truncf %21 : vector<16x128xf32> to vector<16x128xbf16>
    %c0_16 = arith.constant 0 : index
    %c0_17 = arith.constant 0 : index
    %c0_18 = arith.constant 0 : index
    %23 = vector.load %arg7[%c0_16, %c0_17, %c0_18] : memref<1x16x128xbf16, #tpu.memory_space<vmem>>, vector<1x16x128xbf16>
    %24 = vector.shape_cast %23 : vector<1x16x128xbf16> to vector<16x128xbf16>
    %25 = vector.shape_cast %22 : vector<16x128xbf16> to vector<1x16x128xbf16>
    tpu.vector_store %arg7[%c0_16, %c0_17, %c0_18], %25 {strides = array<i32>} : memref<1x16x128xbf16, #tpu.memory_space<vmem>>, vector<1x16x128xbf16>,
    return
  }
  func.func @transform_0(%arg0: i32, %arg1: i32) -> (i32, i32, i32, i32) {
    %c0_i32 = arith.constant 0 : i32
    %c0_i32_0 = arith.constant 0 : i32
    %c0_i32_1 = arith.constant 0 : i32
    return %arg0, %c0_i32, %arg1, %c0_i32_0 : i32, i32, i32, i32
  }
  func.func @transform_1(%arg0: i32, %arg1: i32) -> (i32, i32, i32) {
    %c0_i32 = arith.constant 0 : i32
    %c0_i32_0 = arith.constant 0 : i32
    return %arg0, %arg1, %c0_i32 : i32, i32, i32
  }
  func.func @transform_2(%arg0: i32, %arg1: i32) -> (i32, i32) {
    %c0_i32 = arith.constant 0 : i32
    %c0_i32_0 = arith.constant 0 : i32
    %c0_i32_1 = arith.constant 0 : i32
    return %c0_i32, %c0_i32_0 : i32, i32
  }
  func.func @transform_3(%arg0: i32, %arg1: i32) -> (i32, i32) {
    %c0_i32 = arith.constant 0 : i32
    %c0_i32_0 = arith.constant 0 : i32
    %c0_i32_1 = arith.constant 0 : i32
    return %c0_i32, %c0_i32_0 : i32, i32
  }
  func.func @transform_4(%arg0: i32, %arg1: i32) -> (i32, i32) {
    %c0_i32 = arith.constant 0 : i32
    %c0_i32_0 = arith.constant 0 : i32
    %c0_i32_1 = arith.constant 0 : i32
    return %c0_i32, %c0_i32_0 : i32, i32
  }
  func.func @transform_5(%arg0: i32, %arg1: i32) -> (i32, i32, i32) {
    %c0_i32 = arith.constant 0 : i32
    %c0_i32_0 = arith.constant 0 : i32
    return %arg0, %arg1, %c0_i32 : i32, i32, i32
  }
}

module attributes {stable_mosaic.version = 11 : i64} {
  func.func @_knn_kernel(%arg0: i32, %arg1: i32, %arg2: memref<1x16x128xbf16, #tpu.memory_space<vmem>>, %arg3: memref<1x128x16xbf16, #tpu.memory_space<vmem>>, %arg4: memref<1x1x16xf32, #tpu.memory_space<vmem>>, %arg5: memref<1x16x4xi32, #tpu.memory_space<vmem>>) attributes {dimension_semantics = [#tpu.dimension_semantics<parallel>, #tpu.dimension_semantics<parallel>], iteration_bounds = array<i64: 2, 1>, scalar_prefetch = 0 : i64, scratch_operands = 0 : i64, tpu.core_type = #tpu.core_type<tc>, window_params = [{transform_indices = @transform_0, window_bounds = array<i64: 1, 16, 128>}, {transform_indices = @transform_1, window_bounds = array<i64: 1, 128, 16>}, {transform_indices = @transform_2, window_bounds = array<i64: 1, 1, 16>}, {transform_indices = @transform_3, window_bounds = array<i64: 1, 16, 4>}]} {
    %c0 = arith.constant 0 : index
    %c0_0 = arith.constant 0 : index
    %c0_1 = arith.constant 0 : index
    %0 = vector.load %arg2[%c0, %c0_0, %c0_1] : memref<1x16x128xbf16, #tpu.memory_space<vmem>>, vector<1x16x128xbf16>
    %1 = vector.shape_cast %0 : vector<1x16x128xbf16> to vector<16x128xbf16>
    %c0_2 = arith.constant 0 : index
    %c0_3 = arith.constant 0 : index
    %c0_4 = arith.constant 0 : index
    %2 = vector.load %arg3[%c0_2, %c0_3, %c0_4] : memref<1x128x16xbf16, #tpu.memory_space<vmem>>, vector<1x128x16xbf16>
    %3 = vector.shape_cast %2 : vector<1x128x16xbf16> to vector<128x16xbf16>
    %cst = arith.constant dense<0.000000e+00> : vector<16x16xf32>
    %4 = tpu.matmul %1, %3, %cst {dimension_numbers = #tpu.dot_dimension_numbers<[1], [0], [0], [1], [0, 0, 1, 1], [], []>} : vector<16x128xbf16>, vector<128x16xbf16>, vector<16x16xf32> -> vector<16x16xf32>
    %5 = arith.extf %1 : vector<16x128xbf16> to vector<16x128xf32>
    %6 = arith.mulf %5, %5 : vector<16x128xf32>
    %cst_5 = arith.constant dense<0.000000e+00> : vector<16xf32>
    %7 = vector.multi_reduction <add>, %6, %cst_5 [1] : vector<16x128xf32> to vector<16xf32>
    %8 = vector.shape_cast %7 : vector<16xf32> to vector<16x1xf32>
    %cst_6 = arith.constant 2.000000e+00 : f32
    %9 = vector.broadcast %cst_6 : f32 to vector<16x16xf32>
    %10 = arith.mulf %9, %4 : vector<16x16xf32>
    %11 = vector.broadcast %8 : vector<16x1xf32> to vector<16x16xf32>
    %12 = arith.subf %10, %11 : vector<16x16xf32>
    %c0_7 = arith.constant 0 : index
    %c0_8 = arith.constant 0 : index
    %c0_9 = arith.constant 0 : index
    %13 = vector.load %arg4[%c0_7, %c0_8, %c0_9] : memref<1x1x16xf32, #tpu.memory_space<vmem>>, vector<1x1x16xf32>
    %14 = vector.shape_cast %13 : vector<1x1x16xf32> to vector<1x16xf32>
    %15 = vector.broadcast %14 : vector<1x16xf32> to vector<16x16xf32>
    %16 = arith.subf %12, %15 : vector<16x16xf32>
    %17 = tpu.iota {dimensions = array<i32: 1>} : vector<16x16xi32>
    %18 = arith.sitofp %17 : vector<16x16xi32> to vector<16x16xf32>
    %19 = tpu.iota {dimensions = array<i32: 1>} : vector<16x4xi32>
    %c0_i32 = arith.constant 0 : i32
    %20 = vector.broadcast %c0_i32 : i32 to vector<16x4xi32>
    %cst_10 = arith.constant dense<0xFF800000> : vector<16xf32>
    %21 = vector.multi_reduction <maximumf>, %16, %cst_10 [1] : vector<16x16xf32> to vector<16xf32>
    %22 = vector.shape_cast %21 : vector<16xf32> to vector<16x1xf32>
    %23 = vector.broadcast %22 : vector<16x1xf32> to vector<16x16xf32>
    %24 = arith.cmpf oeq, %16, %23 : vector<16x16xf32>
    %cst_11 = arith.constant 1.600000e+01 : f32
    %25 = vector.broadcast %cst_11 : f32 to vector<16x16xf32>
    %26 = arith.select %24, %18, %25 : vector<16x16xi1>, vector<16x16xf32>
    %cst_12 = arith.constant dense<0x7F800000> : vector<16xf32>
    %27 = vector.multi_reduction <minimumf>, %26, %cst_12 [1] : vector<16x16xf32> to vector<16xf32>
    %28 = vector.shape_cast %27 : vector<16xf32> to vector<16x1xf32>
    %c0_i32_13 = arith.constant 0 : i32
    %29 = vector.broadcast %c0_i32_13 : i32 to vector<16x4xi32>
    %30 = arith.cmpi eq, %19, %29 : vector<16x4xi32>
    %31 = arith.fptosi %28 : vector<16x1xf32> to vector<16x1xi32>
    %32 = vector.shape_cast %31 : vector<16x1xi32> to vector<16x1xi32>
    %33 = vector.broadcast %32 : vector<16x1xi32> to vector<16x4xi32>
    %34 = arith.select %30, %33, %20 : vector<16x4xi1>, vector<16x4xi32>
    %35 = vector.broadcast %28 : vector<16x1xf32> to vector<16x16xf32>
    %36 = arith.cmpf oeq, %18, %35 : vector<16x16xf32>
    %cst_14 = arith.constant 0xFF800000 : f32
    %37 = vector.broadcast %cst_14 : f32 to vector<16x16xf32>
    %38 = arith.select %36, %37, %16 : vector<16x16xi1>, vector<16x16xf32>
    %cst_15 = arith.constant dense<0xFF800000> : vector<16xf32>
    %39 = vector.multi_reduction <maximumf>, %38, %cst_15 [1] : vector<16x16xf32> to vector<16xf32>
    %40 = vector.shape_cast %39 : vector<16xf32> to vector<16x1xf32>
    %41 = vector.broadcast %40 : vector<16x1xf32> to vector<16x16xf32>
    %42 = arith.cmpf oeq, %38, %41 : vector<16x16xf32>
    %cst_16 = arith.constant 1.600000e+01 : f32
    %43 = vector.broadcast %cst_16 : f32 to vector<16x16xf32>
    %44 = arith.select %42, %18, %43 : vector<16x16xi1>, vector<16x16xf32>
    %cst_17 = arith.constant dense<0x7F800000> : vector<16xf32>
    %45 = vector.multi_reduction <minimumf>, %44, %cst_17 [1] : vector<16x16xf32> to vector<16xf32>
    %46 = vector.shape_cast %45 : vector<16xf32> to vector<16x1xf32>
    %c1_i32 = arith.constant 1 : i32
    %47 = vector.broadcast %c1_i32 : i32 to vector<16x4xi32>
    %48 = arith.cmpi eq, %19, %47 : vector<16x4xi32>
    %49 = arith.fptosi %46 : vector<16x1xf32> to vector<16x1xi32>
    %50 = vector.shape_cast %49 : vector<16x1xi32> to vector<16x1xi32>
    %51 = vector.broadcast %50 : vector<16x1xi32> to vector<16x4xi32>
    %52 = arith.select %48, %51, %34 : vector<16x4xi1>, vector<16x4xi32>
    %53 = vector.broadcast %46 : vector<16x1xf32> to vector<16x16xf32>
    %54 = arith.cmpf oeq, %18, %53 : vector<16x16xf32>
    %cst_18 = arith.constant 0xFF800000 : f32
    %55 = vector.broadcast %cst_18 : f32 to vector<16x16xf32>
    %56 = arith.select %54, %55, %38 : vector<16x16xi1>, vector<16x16xf32>
    %cst_19 = arith.constant dense<0xFF800000> : vector<16xf32>
    %57 = vector.multi_reduction <maximumf>, %56, %cst_19 [1] : vector<16x16xf32> to vector<16xf32>
    %58 = vector.shape_cast %57 : vector<16xf32> to vector<16x1xf32>
    %59 = vector.broadcast %58 : vector<16x1xf32> to vector<16x16xf32>
    %60 = arith.cmpf oeq, %56, %59 : vector<16x16xf32>
    %cst_20 = arith.constant 1.600000e+01 : f32
    %61 = vector.broadcast %cst_20 : f32 to vector<16x16xf32>
    %62 = arith.select %60, %18, %61 : vector<16x16xi1>, vector<16x16xf32>
    %cst_21 = arith.constant dense<0x7F800000> : vector<16xf32>
    %63 = vector.multi_reduction <minimumf>, %62, %cst_21 [1] : vector<16x16xf32> to vector<16xf32>
    %64 = vector.shape_cast %63 : vector<16xf32> to vector<16x1xf32>
    %c2_i32 = arith.constant 2 : i32
    %65 = vector.broadcast %c2_i32 : i32 to vector<16x4xi32>
    %66 = arith.cmpi eq, %19, %65 : vector<16x4xi32>
    %67 = arith.fptosi %64 : vector<16x1xf32> to vector<16x1xi32>
    %68 = vector.shape_cast %67 : vector<16x1xi32> to vector<16x1xi32>
    %69 = vector.broadcast %68 : vector<16x1xi32> to vector<16x4xi32>
    %70 = arith.select %66, %69, %52 : vector<16x4xi1>, vector<16x4xi32>
    %71 = vector.broadcast %64 : vector<16x1xf32> to vector<16x16xf32>
    %72 = arith.cmpf oeq, %18, %71 : vector<16x16xf32>
    %cst_22 = arith.constant 0xFF800000 : f32
    %73 = vector.broadcast %cst_22 : f32 to vector<16x16xf32>
    %74 = arith.select %72, %73, %56 : vector<16x16xi1>, vector<16x16xf32>
    %cst_23 = arith.constant dense<0xFF800000> : vector<16xf32>
    %75 = vector.multi_reduction <maximumf>, %74, %cst_23 [1] : vector<16x16xf32> to vector<16xf32>
    %76 = vector.shape_cast %75 : vector<16xf32> to vector<16x1xf32>
    %77 = vector.broadcast %76 : vector<16x1xf32> to vector<16x16xf32>
    %78 = arith.cmpf oeq, %74, %77 : vector<16x16xf32>
    %cst_24 = arith.constant 1.600000e+01 : f32
    %79 = vector.broadcast %cst_24 : f32 to vector<16x16xf32>
    %80 = arith.select %78, %18, %79 : vector<16x16xi1>, vector<16x16xf32>
    %cst_25 = arith.constant dense<0x7F800000> : vector<16xf32>
    %81 = vector.multi_reduction <minimumf>, %80, %cst_25 [1] : vector<16x16xf32> to vector<16xf32>
    %82 = vector.shape_cast %81 : vector<16xf32> to vector<16x1xf32>
    %c3_i32 = arith.constant 3 : i32
    %83 = vector.broadcast %c3_i32 : i32 to vector<16x4xi32>
    %84 = arith.cmpi eq, %19, %83 : vector<16x4xi32>
    %85 = arith.fptosi %82 : vector<16x1xf32> to vector<16x1xi32>
    %86 = vector.shape_cast %85 : vector<16x1xi32> to vector<16x1xi32>
    %87 = vector.broadcast %86 : vector<16x1xi32> to vector<16x4xi32>
    %88 = arith.select %84, %87, %70 : vector<16x4xi1>, vector<16x4xi32>
    %c0_26 = arith.constant 0 : index
    %c0_27 = arith.constant 0 : index
    %c0_28 = arith.constant 0 : index
    %89 = vector.load %arg5[%c0_26, %c0_27, %c0_28] : memref<1x16x4xi32, #tpu.memory_space<vmem>>, vector<1x16x4xi32>
    %90 = vector.shape_cast %89 : vector<1x16x4xi32> to vector<16x4xi32>
    %91 = vector.shape_cast %88 : vector<16x4xi32> to vector<1x16x4xi32>
    tpu.vector_store %arg5[%c0_26, %c0_27, %c0_28], %91 {strides = array<i32>} : memref<1x16x4xi32, #tpu.memory_space<vmem>>, vector<1x16x4xi32>,
    return
  }
  func.func @transform_0(%arg0: i32, %arg1: i32) -> (i32, i32, i32) {
    %c0_i32 = arith.constant 0 : i32
    %c0_i32_0 = arith.constant 0 : i32
    return %arg0, %arg1, %c0_i32 : i32, i32, i32
  }
  func.func @transform_1(%arg0: i32, %arg1: i32) -> (i32, i32, i32) {
    %c0_i32 = arith.constant 0 : i32
    %c0_i32_0 = arith.constant 0 : i32
    %c0_i32_1 = arith.constant 0 : i32
    return %arg0, %c0_i32, %c0_i32_0 : i32, i32, i32
  }
  func.func @transform_2(%arg0: i32, %arg1: i32) -> (i32, i32, i32) {
    %c0_i32 = arith.constant 0 : i32
    %c0_i32_0 = arith.constant 0 : i32
    %c0_i32_1 = arith.constant 0 : i32
    return %arg0, %c0_i32, %c0_i32_0 : i32, i32, i32
  }
  func.func @transform_3(%arg0: i32, %arg1: i32) -> (i32, i32, i32) {
    %c0_i32 = arith.constant 0 : i32
    %c0_i32_0 = arith.constant 0 : i32
    return %arg0, %arg1, %c0_i32 : i32, i32, i32
  }
}

module attributes {stable_mosaic.version = 11 : i64} {
  func.func @_edge_conv_kernel(%arg0: i32, %arg1: i32, %arg2: memref<1x4x16x128xbf16, #tpu.memory_space<vmem>>, %arg3: memref<1x16x128xbf16, #tpu.memory_space<vmem>>, %arg4: memref<128x256xbf16, #tpu.memory_space<vmem>>, %arg5: memref<128x256xbf16, #tpu.memory_space<vmem>>, %arg6: memref<1x256xf32, #tpu.memory_space<vmem>>, %arg7: memref<1x16x256xbf16, #tpu.memory_space<vmem>>) attributes {dimension_semantics = [#tpu.dimension_semantics<parallel>, #tpu.dimension_semantics<parallel>], iteration_bounds = array<i64: 2, 1>, scalar_prefetch = 0 : i64, scratch_operands = 0 : i64, tpu.core_type = #tpu.core_type<tc>, window_params = [{transform_indices = @transform_0, window_bounds = array<i64: 1, 4, 16, 128>}, {transform_indices = @transform_1, window_bounds = array<i64: 1, 16, 128>}, {pipeline_mode = #tpu.pipeline_mode<synchronous>, transform_indices = @transform_2, window_bounds = array<i64: 128, 256>}, {pipeline_mode = #tpu.pipeline_mode<synchronous>, transform_indices = @transform_3, window_bounds = array<i64: 128, 256>}, {pipeline_mode = #tpu.pipeline_mode<synchronous>, transform_indices = @transform_4, window_bounds = array<i64: 1, 256>}, {transform_indices = @transform_5, window_bounds = array<i64: 1, 16, 256>}]} {
    %c0 = arith.constant 0 : index
    %c0_0 = arith.constant 0 : index
    %c0_1 = arith.constant 0 : index
    %0 = vector.load %arg3[%c0, %c0_0, %c0_1] : memref<1x16x128xbf16, #tpu.memory_space<vmem>>, vector<1x16x128xbf16>
    %1 = vector.shape_cast %0 : vector<1x16x128xbf16> to vector<16x128xbf16>
    %c0_2 = arith.constant 0 : index
    %c0_3 = arith.constant 0 : index
    %2 = vector.load %arg5[%c0_2, %c0_3] : memref<128x256xbf16, #tpu.memory_space<vmem>>, vector<128x256xbf16>
    %cst = arith.constant dense<0.000000e+00> : vector<16x256xf32>
    %3 = tpu.matmul %1, %2, %cst {dimension_numbers = #tpu.dot_dimension_numbers<[1], [0], [0], [1], [0, 0, 1, 1], [], []>} : vector<16x128xbf16>, vector<128x256xbf16>, vector<16x256xf32> -> vector<16x256xf32>
    %c0_4 = arith.constant 0 : index
    %c0_5 = arith.constant 0 : index
    %4 = vector.load %arg6[%c0_4, %c0_5] : memref<1x256xf32, #tpu.memory_space<vmem>>, vector<1x256xf32>
    %5 = vector.broadcast %4 : vector<1x256xf32> to vector<16x256xf32>
    %6 = arith.addf %3, %5 : vector<16x256xf32>
    %c0_6 = arith.constant 0 : index
    %c0_7 = arith.constant 0 : index
    %c0_8 = arith.constant 0 : index
    %c0_9 = arith.constant 0 : index
    %7 = vector.load %arg2[%c0_6, %c0_7, %c0_8, %c0_9] : memref<1x4x16x128xbf16, #tpu.memory_space<vmem>>, vector<1x4x16x128xbf16>
    %8 = vector.shape_cast %7 : vector<1x4x16x128xbf16> to vector<4x16x128xbf16>
    %9 = vector.shape_cast %8 : vector<4x16x128xbf16> to vector<64x128xbf16>
    %c0_10 = arith.constant 0 : index
    %c0_11 = arith.constant 0 : index
    %10 = vector.load %arg4[%c0_10, %c0_11] : memref<128x256xbf16, #tpu.memory_space<vmem>>, vector<128x256xbf16>
    %cst_12 = arith.constant dense<0.000000e+00> : vector<64x256xf32>
    %11 = tpu.matmul %9, %10, %cst_12 {dimension_numbers = #tpu.dot_dimension_numbers<[1], [0], [0], [1], [0, 0, 1, 1], [], []>} : vector<64x128xbf16>, vector<128x256xbf16>, vector<64x256xf32> -> vector<64x256xf32>
    %12 = vector.shape_cast %11 : vector<64x256xf32> to vector<4x16x256xf32>
    %13 = vector.shape_cast %6 : vector<16x256xf32> to vector<1x16x256xf32>
    %14 = vector.broadcast %13 : vector<1x16x256xf32> to vector<4x16x256xf32>
    %15 = arith.addf %12, %14 : vector<4x16x256xf32>
    %cst_13 = arith.constant 0.000000e+00 : f32
    %16 = vector.broadcast %cst_13 : f32 to vector<4x16x256xf32>
    %17 = arith.cmpf ogt, %15, %16 : vector<4x16x256xf32>
    %cst_14 = arith.constant 2.000000e-01 : f32
    %18 = vector.broadcast %cst_14 : f32 to vector<4x16x256xf32>
    %19 = arith.mulf %18, %15 : vector<4x16x256xf32>
    %20 = arith.select %17, %15, %19 : vector<4x16x256xi1>, vector<4x16x256xf32>
    %cst_15 = arith.constant dense<0xFF800000> : vector<16x256xf32>
    %21 = vector.multi_reduction <maximumf>, %20, %cst_15 [0] : vector<4x16x256xf32> to vector<16x256xf32>
    %22 = arith.truncf %21 : vector<16x256xf32> to vector<16x256xbf16>
    %c0_16 = arith.constant 0 : index
    %c0_17 = arith.constant 0 : index
    %c0_18 = arith.constant 0 : index
    %23 = vector.load %arg7[%c0_16, %c0_17, %c0_18] : memref<1x16x256xbf16, #tpu.memory_space<vmem>>, vector<1x16x256xbf16>
    %24 = vector.shape_cast %23 : vector<1x16x256xbf16> to vector<16x256xbf16>
    %25 = vector.shape_cast %22 : vector<16x256xbf16> to vector<1x16x256xbf16>
    tpu.vector_store %arg7[%c0_16, %c0_17, %c0_18], %25 {strides = array<i32>} : memref<1x16x256xbf16, #tpu.memory_space<vmem>>, vector<1x16x256xbf16>,
    return
  }
  func.func @transform_0(%arg0: i32, %arg1: i32) -> (i32, i32, i32, i32) {
    %c0_i32 = arith.constant 0 : i32
    %c0_i32_0 = arith.constant 0 : i32
    %c0_i32_1 = arith.constant 0 : i32
    return %arg0, %c0_i32, %arg1, %c0_i32_0 : i32, i32, i32, i32
  }
  func.func @transform_1(%arg0: i32, %arg1: i32) -> (i32, i32, i32) {
    %c0_i32 = arith.constant 0 : i32
    %c0_i32_0 = arith.constant 0 : i32
    return %arg0, %arg1, %c0_i32 : i32, i32, i32
  }
  func.func @transform_2(%arg0: i32, %arg1: i32) -> (i32, i32) {
    %c0_i32 = arith.constant 0 : i32
    %c0_i32_0 = arith.constant 0 : i32
    %c0_i32_1 = arith.constant 0 : i32
    return %c0_i32, %c0_i32_0 : i32, i32
  }
  func.func @transform_3(%arg0: i32, %arg1: i32) -> (i32, i32) {
    %c0_i32 = arith.constant 0 : i32
    %c0_i32_0 = arith.constant 0 : i32
    %c0_i32_1 = arith.constant 0 : i32
    return %c0_i32, %c0_i32_0 : i32, i32
  }
  func.func @transform_4(%arg0: i32, %arg1: i32) -> (i32, i32) {
    %c0_i32 = arith.constant 0 : i32
    %c0_i32_0 = arith.constant 0 : i32
    %c0_i32_1 = arith.constant 0 : i32
    return %c0_i32, %c0_i32_0 : i32, i32
  }
  func.func @transform_5(%arg0: i32, %arg1: i32) -> (i32, i32, i32) {
    %c0_i32 = arith.constant 0 : i32
    %c0_i32_0 = arith.constant 0 : i32
    return %arg0, %arg1, %c0_i32 : i32, i32, i32
  }
}

module attributes {stable_mosaic.version = 11 : i64} {
  func.func @_gmax_kernel(%arg0: i32, %arg1: i32, %arg2: memref<1x16x64xbf16, #tpu.memory_space<vmem>>, %arg3: memref<1x16x64xbf16, #tpu.memory_space<vmem>>, %arg4: memref<1x16x128xbf16, #tpu.memory_space<vmem>>, %arg5: memref<1x16x256xbf16, #tpu.memory_space<vmem>>, %arg6: memref<64x64xbf16, #tpu.memory_space<vmem>>, %arg7: memref<64x64xbf16, #tpu.memory_space<vmem>>, %arg8: memref<128x64xbf16, #tpu.memory_space<vmem>>, %arg9: memref<256x64xbf16, #tpu.memory_space<vmem>>, %arg10: memref<1x64xf32, #tpu.memory_space<vmem>>, %arg11: memref<1x1x64xf32, #tpu.memory_space<vmem>>) attributes {dimension_semantics = [#tpu.dimension_semantics<parallel>, #tpu.dimension_semantics<arbitrary>], iteration_bounds = array<i64: 2, 1>, scalar_prefetch = 0 : i64, scratch_operands = 0 : i64, tpu.core_type = #tpu.core_type<tc>, window_params = [{transform_indices = @transform_0, window_bounds = array<i64: 1, 16, 64>}, {transform_indices = @transform_1, window_bounds = array<i64: 1, 16, 64>}, {transform_indices = @transform_2, window_bounds = array<i64: 1, 16, 128>}, {transform_indices = @transform_3, window_bounds = array<i64: 1, 16, 256>}, {pipeline_mode = #tpu.pipeline_mode<synchronous>, transform_indices = @transform_4, window_bounds = array<i64: 64, 64>}, {pipeline_mode = #tpu.pipeline_mode<synchronous>, transform_indices = @transform_5, window_bounds = array<i64: 64, 64>}, {pipeline_mode = #tpu.pipeline_mode<synchronous>, transform_indices = @transform_6, window_bounds = array<i64: 128, 64>}, {pipeline_mode = #tpu.pipeline_mode<synchronous>, transform_indices = @transform_7, window_bounds = array<i64: 256, 64>}, {pipeline_mode = #tpu.pipeline_mode<synchronous>, transform_indices = @transform_8, window_bounds = array<i64: 1, 64>}, {transform_indices = @transform_9, window_bounds = array<i64: 1, 1, 64>}]} {
    %c0 = arith.constant 0 : index
    %c0_0 = arith.constant 0 : index
    %c0_1 = arith.constant 0 : index
    %0 = vector.load %arg2[%c0, %c0_0, %c0_1] : memref<1x16x64xbf16, #tpu.memory_space<vmem>>, vector<1x16x64xbf16>
    %1 = vector.shape_cast %0 : vector<1x16x64xbf16> to vector<16x64xbf16>
    %c0_2 = arith.constant 0 : index
    %c0_3 = arith.constant 0 : index
    %2 = vector.load %arg6[%c0_2, %c0_3] : memref<64x64xbf16, #tpu.memory_space<vmem>>, vector<64x64xbf16>
    %cst = arith.constant dense<0.000000e+00> : vector<16x64xf32>
    %3 = tpu.matmul %1, %2, %cst {dimension_numbers = #tpu.dot_dimension_numbers<[1], [0], [0], [1], [0, 0, 1, 1], [], []>} : vector<16x64xbf16>, vector<64x64xbf16>, vector<16x64xf32> -> vector<16x64xf32>
    %c0_4 = arith.constant 0 : index
    %c0_5 = arith.constant 0 : index
    %c0_6 = arith.constant 0 : index
    %4 = vector.load %arg3[%c0_4, %c0_5, %c0_6] : memref<1x16x64xbf16, #tpu.memory_space<vmem>>, vector<1x16x64xbf16>
    %5 = vector.shape_cast %4 : vector<1x16x64xbf16> to vector<16x64xbf16>
    %c0_7 = arith.constant 0 : index
    %c0_8 = arith.constant 0 : index
    %6 = vector.load %arg7[%c0_7, %c0_8] : memref<64x64xbf16, #tpu.memory_space<vmem>>, vector<64x64xbf16>
    %cst_9 = arith.constant dense<0.000000e+00> : vector<16x64xf32>
    %7 = tpu.matmul %5, %6, %cst_9 {dimension_numbers = #tpu.dot_dimension_numbers<[1], [0], [0], [1], [0, 0, 1, 1], [], []>} : vector<16x64xbf16>, vector<64x64xbf16>, vector<16x64xf32> -> vector<16x64xf32>
    %8 = arith.addf %3, %7 : vector<16x64xf32>
    %c0_10 = arith.constant 0 : index
    %c0_11 = arith.constant 0 : index
    %c0_12 = arith.constant 0 : index
    %9 = vector.load %arg4[%c0_10, %c0_11, %c0_12] : memref<1x16x128xbf16, #tpu.memory_space<vmem>>, vector<1x16x128xbf16>
    %10 = vector.shape_cast %9 : vector<1x16x128xbf16> to vector<16x128xbf16>
    %c0_13 = arith.constant 0 : index
    %c0_14 = arith.constant 0 : index
    %11 = vector.load %arg8[%c0_13, %c0_14] : memref<128x64xbf16, #tpu.memory_space<vmem>>, vector<128x64xbf16>
    %cst_15 = arith.constant dense<0.000000e+00> : vector<16x64xf32>
    %12 = tpu.matmul %10, %11, %cst_15 {dimension_numbers = #tpu.dot_dimension_numbers<[1], [0], [0], [1], [0, 0, 1, 1], [], []>} : vector<16x128xbf16>, vector<128x64xbf16>, vector<16x64xf32> -> vector<16x64xf32>
    %13 = arith.addf %8, %12 : vector<16x64xf32>
    %c0_16 = arith.constant 0 : index
    %c0_17 = arith.constant 0 : index
    %c0_18 = arith.constant 0 : index
    %14 = vector.load %arg5[%c0_16, %c0_17, %c0_18] : memref<1x16x256xbf16, #tpu.memory_space<vmem>>, vector<1x16x256xbf16>
    %15 = vector.shape_cast %14 : vector<1x16x256xbf16> to vector<16x256xbf16>
    %c0_19 = arith.constant 0 : index
    %c0_20 = arith.constant 0 : index
    %16 = vector.load %arg9[%c0_19, %c0_20] : memref<256x64xbf16, #tpu.memory_space<vmem>>, vector<256x64xbf16>
    %cst_21 = arith.constant dense<0.000000e+00> : vector<16x64xf32>
    %17 = tpu.matmul %15, %16, %cst_21 {dimension_numbers = #tpu.dot_dimension_numbers<[1], [0], [0], [1], [0, 0, 1, 1], [], []>} : vector<16x256xbf16>, vector<256x64xbf16>, vector<16x64xf32> -> vector<16x64xf32>
    %18 = arith.addf %13, %17 : vector<16x64xf32>
    %c0_22 = arith.constant 0 : index
    %c0_23 = arith.constant 0 : index
    %19 = vector.load %arg10[%c0_22, %c0_23] : memref<1x64xf32, #tpu.memory_space<vmem>>, vector<1x64xf32>
    %20 = vector.broadcast %19 : vector<1x64xf32> to vector<16x64xf32>
    %21 = arith.addf %18, %20 : vector<16x64xf32>
    %cst_24 = arith.constant 0.000000e+00 : f32
    %22 = vector.broadcast %cst_24 : f32 to vector<16x64xf32>
    %23 = arith.cmpf ogt, %21, %22 : vector<16x64xf32>
    %cst_25 = arith.constant 2.000000e-01 : f32
    %24 = vector.broadcast %cst_25 : f32 to vector<16x64xf32>
    %25 = arith.mulf %24, %21 : vector<16x64xf32>
    %26 = arith.select %23, %21, %25 : vector<16x64xi1>, vector<16x64xf32>
    %cst_26 = arith.constant dense<0xFF800000> : vector<64xf32>
    %27 = vector.multi_reduction <maximumf>, %26, %cst_26 [0] : vector<16x64xf32> to vector<64xf32>
    %28 = vector.shape_cast %27 : vector<64xf32> to vector<1x64xf32>
    %c0_i32 = arith.constant 0 : i32
    %29 = arith.cmpi eq, %arg1, %c0_i32 : i32
    %30 = arith.extui %29 : i1 to i32
    %c0_i32_27 = arith.constant 0 : i32
    %31 = arith.cmpi ne, %30, %c0_i32_27 : i32
    scf.if %31 {
      %c0_30 = arith.constant 0 : index
      %c0_31 = arith.constant 0 : index
      %c0_32 = arith.constant 0 : index
      %35 = vector.load %arg11[%c0_30, %c0_31, %c0_32] : memref<1x1x64xf32, #tpu.memory_space<vmem>>, vector<1x1x64xf32>
      %36 = vector.shape_cast %35 : vector<1x1x64xf32> to vector<1x64xf32>
      %37 = vector.shape_cast %28 : vector<1x64xf32> to vector<1x1x64xf32>
      tpu.vector_store %arg11[%c0_30, %c0_31, %c0_32], %37 {strides = array<i32>} : memref<1x1x64xf32, #tpu.memory_space<vmem>>, vector<1x1x64xf32>,
    } else {
    }
    %c0_i32_28 = arith.constant 0 : i32
    %32 = arith.cmpi sgt, %arg1, %c0_i32_28 : i32
    %33 = arith.extui %32 : i1 to i32
    %c0_i32_29 = arith.constant 0 : i32
    %34 = arith.cmpi ne, %33, %c0_i32_29 : i32
    scf.if %34 {
      %c0_30 = arith.constant 0 : index
      %c0_31 = arith.constant 0 : index
      %c0_32 = arith.constant 0 : index
      %35 = vector.load %arg11[%c0_30, %c0_31, %c0_32] : memref<1x1x64xf32, #tpu.memory_space<vmem>>, vector<1x1x64xf32>
      %36 = vector.shape_cast %35 : vector<1x1x64xf32> to vector<1x64xf32>
      %37 = arith.maximumf %36, %28 : vector<1x64xf32>
      %c0_33 = arith.constant 0 : index
      %c0_34 = arith.constant 0 : index
      %c0_35 = arith.constant 0 : index
      %38 = vector.load %arg11[%c0_33, %c0_34, %c0_35] : memref<1x1x64xf32, #tpu.memory_space<vmem>>, vector<1x1x64xf32>
      %39 = vector.shape_cast %38 : vector<1x1x64xf32> to vector<1x64xf32>
      %40 = vector.shape_cast %37 : vector<1x64xf32> to vector<1x1x64xf32>
      tpu.vector_store %arg11[%c0_33, %c0_34, %c0_35], %40 {strides = array<i32>} : memref<1x1x64xf32, #tpu.memory_space<vmem>>, vector<1x1x64xf32>,
    } else {
    }
    return
  }
  func.func @transform_0(%arg0: i32, %arg1: i32) -> (i32, i32, i32) {
    %c0_i32 = arith.constant 0 : i32
    %c0_i32_0 = arith.constant 0 : i32
    return %arg0, %arg1, %c0_i32 : i32, i32, i32
  }
  func.func @transform_1(%arg0: i32, %arg1: i32) -> (i32, i32, i32) {
    %c0_i32 = arith.constant 0 : i32
    %c0_i32_0 = arith.constant 0 : i32
    return %arg0, %arg1, %c0_i32 : i32, i32, i32
  }
  func.func @transform_2(%arg0: i32, %arg1: i32) -> (i32, i32, i32) {
    %c0_i32 = arith.constant 0 : i32
    %c0_i32_0 = arith.constant 0 : i32
    return %arg0, %arg1, %c0_i32 : i32, i32, i32
  }
  func.func @transform_3(%arg0: i32, %arg1: i32) -> (i32, i32, i32) {
    %c0_i32 = arith.constant 0 : i32
    %c0_i32_0 = arith.constant 0 : i32
    return %arg0, %arg1, %c0_i32 : i32, i32, i32
  }
  func.func @transform_4(%arg0: i32, %arg1: i32) -> (i32, i32) {
    %c0_i32 = arith.constant 0 : i32
    %c0_i32_0 = arith.constant 0 : i32
    %c0_i32_1 = arith.constant 0 : i32
    return %c0_i32, %c0_i32_0 : i32, i32
  }
  func.func @transform_5(%arg0: i32, %arg1: i32) -> (i32, i32) {
    %c0_i32 = arith.constant 0 : i32
    %c0_i32_0 = arith.constant 0 : i32
    %c0_i32_1 = arith.constant 0 : i32
    return %c0_i32, %c0_i32_0 : i32, i32
  }
  func.func @transform_6(%arg0: i32, %arg1: i32) -> (i32, i32) {
    %c0_i32 = arith.constant 0 : i32
    %c0_i32_0 = arith.constant 0 : i32
    %c0_i32_1 = arith.constant 0 : i32
    return %c0_i32, %c0_i32_0 : i32, i32
  }
  func.func @transform_7(%arg0: i32, %arg1: i32) -> (i32, i32) {
    %c0_i32 = arith.constant 0 : i32
    %c0_i32_0 = arith.constant 0 : i32
    %c0_i32_1 = arith.constant 0 : i32
    return %c0_i32, %c0_i32_0 : i32, i32
  }
  func.func @transform_8(%arg0: i32, %arg1: i32) -> (i32, i32) {
    %c0_i32 = arith.constant 0 : i32
    %c0_i32_0 = arith.constant 0 : i32
    %c0_i32_1 = arith.constant 0 : i32
    return %c0_i32, %c0_i32_0 : i32, i32
  }
  func.func @transform_9(%arg0: i32, %arg1: i32) -> (i32, i32, i32) {
    %c0_i32 = arith.constant 0 : i32
    %c0_i32_0 = arith.constant 0 : i32
    %c0_i32_1 = arith.constant 0 : i32
    return %arg0, %c0_i32, %c0_i32_0 : i32, i32, i32
  }
}

module attributes {stable_mosaic.version = 11 : i64} {
  func.func @_tail_kernel(%arg0: i32, %arg1: i32, %arg2: memref<1x16x64xbf16, #tpu.memory_space<vmem>>, %arg3: memref<1x16x64xbf16, #tpu.memory_space<vmem>>, %arg4: memref<1x16x128xbf16, #tpu.memory_space<vmem>>, %arg5: memref<1x16x256xbf16, #tpu.memory_space<vmem>>, %arg6: memref<1x1x512xf32, #tpu.memory_space<vmem>>, %arg7: memref<64x512xbf16, #tpu.memory_space<vmem>>, %arg8: memref<64x512xbf16, #tpu.memory_space<vmem>>, %arg9: memref<128x512xbf16, #tpu.memory_space<vmem>>, %arg10: memref<256x512xbf16, #tpu.memory_space<vmem>>, %arg11: memref<1x512xf32, #tpu.memory_space<vmem>>, %arg12: memref<512x32xbf16, #tpu.memory_space<vmem>>, %arg13: memref<1x32xf32, #tpu.memory_space<vmem>>, %arg14: memref<1x16x32xf32, #tpu.memory_space<vmem>>) attributes {dimension_semantics = [#tpu.dimension_semantics<parallel>, #tpu.dimension_semantics<parallel>], iteration_bounds = array<i64: 2, 1>, scalar_prefetch = 0 : i64, scratch_operands = 0 : i64, tpu.core_type = #tpu.core_type<tc>, window_params = [{transform_indices = @transform_0, window_bounds = array<i64: 1, 16, 64>}, {transform_indices = @transform_1, window_bounds = array<i64: 1, 16, 64>}, {transform_indices = @transform_2, window_bounds = array<i64: 1, 16, 128>}, {transform_indices = @transform_3, window_bounds = array<i64: 1, 16, 256>}, {transform_indices = @transform_4, window_bounds = array<i64: 1, 1, 512>}, {pipeline_mode = #tpu.pipeline_mode<synchronous>, transform_indices = @transform_5, window_bounds = array<i64: 64, 512>}, {pipeline_mode = #tpu.pipeline_mode<synchronous>, transform_indices = @transform_6, window_bounds = array<i64: 64, 512>}, {pipeline_mode = #tpu.pipeline_mode<synchronous>, transform_indices = @transform_7, window_bounds = array<i64: 128, 512>}, {pipeline_mode = #tpu.pipeline_mode<synchronous>, transform_indices = @transform_8, window_bounds = array<i64: 256, 512>}, {pipeline_mode = #tpu.pipeline_mode<synchronous>, transform_indices = @transform_9, window_bounds = array<i64: 1, 512>}, {pipeline_mode = #tpu.pipeline_mode<synchronous>, transform_indices = @transform_10, window_bounds = array<i64: 512, 32>}, {pipeline_mode = #tpu.pipeline_mode<synchronous>, transform_indices = @transform_11, window_bounds = array<i64: 1, 32>}, {transform_indices = @transform_12, window_bounds = array<i64: 1, 16, 32>}]} {
    %c0 = arith.constant 0 : index
    %c0_0 = arith.constant 0 : index
    %c0_1 = arith.constant 0 : index
    %0 = vector.load %arg2[%c0, %c0_0, %c0_1] : memref<1x16x64xbf16, #tpu.memory_space<vmem>>, vector<1x16x64xbf16>
    %1 = vector.shape_cast %0 : vector<1x16x64xbf16> to vector<16x64xbf16>
    %c0_2 = arith.constant 0 : index
    %c0_3 = arith.constant 0 : index
    %2 = vector.load %arg7[%c0_2, %c0_3] : memref<64x512xbf16, #tpu.memory_space<vmem>>, vector<64x512xbf16>
    %cst = arith.constant dense<0.000000e+00> : vector<16x512xf32>
    %3 = tpu.matmul %1, %2, %cst {dimension_numbers = #tpu.dot_dimension_numbers<[1], [0], [0], [1], [0, 0, 1, 1], [], []>} : vector<16x64xbf16>, vector<64x512xbf16>, vector<16x512xf32> -> vector<16x512xf32>
    %c0_4 = arith.constant 0 : index
    %c0_5 = arith.constant 0 : index
    %c0_6 = arith.constant 0 : index
    %4 = vector.load %arg3[%c0_4, %c0_5, %c0_6] : memref<1x16x64xbf16, #tpu.memory_space<vmem>>, vector<1x16x64xbf16>
    %5 = vector.shape_cast %4 : vector<1x16x64xbf16> to vector<16x64xbf16>
    %c0_7 = arith.constant 0 : index
    %c0_8 = arith.constant 0 : index
    %6 = vector.load %arg8[%c0_7, %c0_8] : memref<64x512xbf16, #tpu.memory_space<vmem>>, vector<64x512xbf16>
    %cst_9 = arith.constant dense<0.000000e+00> : vector<16x512xf32>
    %7 = tpu.matmul %5, %6, %cst_9 {dimension_numbers = #tpu.dot_dimension_numbers<[1], [0], [0], [1], [0, 0, 1, 1], [], []>} : vector<16x64xbf16>, vector<64x512xbf16>, vector<16x512xf32> -> vector<16x512xf32>
    %8 = arith.addf %3, %7 : vector<16x512xf32>
    %c0_10 = arith.constant 0 : index
    %c0_11 = arith.constant 0 : index
    %c0_12 = arith.constant 0 : index
    %9 = vector.load %arg4[%c0_10, %c0_11, %c0_12] : memref<1x16x128xbf16, #tpu.memory_space<vmem>>, vector<1x16x128xbf16>
    %10 = vector.shape_cast %9 : vector<1x16x128xbf16> to vector<16x128xbf16>
    %c0_13 = arith.constant 0 : index
    %c0_14 = arith.constant 0 : index
    %11 = vector.load %arg9[%c0_13, %c0_14] : memref<128x512xbf16, #tpu.memory_space<vmem>>, vector<128x512xbf16>
    %cst_15 = arith.constant dense<0.000000e+00> : vector<16x512xf32>
    %12 = tpu.matmul %10, %11, %cst_15 {dimension_numbers = #tpu.dot_dimension_numbers<[1], [0], [0], [1], [0, 0, 1, 1], [], []>} : vector<16x128xbf16>, vector<128x512xbf16>, vector<16x512xf32> -> vector<16x512xf32>
    %13 = arith.addf %8, %12 : vector<16x512xf32>
    %c0_16 = arith.constant 0 : index
    %c0_17 = arith.constant 0 : index
    %c0_18 = arith.constant 0 : index
    %14 = vector.load %arg5[%c0_16, %c0_17, %c0_18] : memref<1x16x256xbf16, #tpu.memory_space<vmem>>, vector<1x16x256xbf16>
    %15 = vector.shape_cast %14 : vector<1x16x256xbf16> to vector<16x256xbf16>
    %c0_19 = arith.constant 0 : index
    %c0_20 = arith.constant 0 : index
    %16 = vector.load %arg10[%c0_19, %c0_20] : memref<256x512xbf16, #tpu.memory_space<vmem>>, vector<256x512xbf16>
    %cst_21 = arith.constant dense<0.000000e+00> : vector<16x512xf32>
    %17 = tpu.matmul %15, %16, %cst_21 {dimension_numbers = #tpu.dot_dimension_numbers<[1], [0], [0], [1], [0, 0, 1, 1], [], []>} : vector<16x256xbf16>, vector<256x512xbf16>, vector<16x512xf32> -> vector<16x512xf32>
    %18 = arith.addf %13, %17 : vector<16x512xf32>
    %c0_22 = arith.constant 0 : index
    %c0_23 = arith.constant 0 : index
    %c0_24 = arith.constant 0 : index
    %19 = vector.load %arg6[%c0_22, %c0_23, %c0_24] : memref<1x1x512xf32, #tpu.memory_space<vmem>>, vector<1x1x512xf32>
    %20 = vector.shape_cast %19 : vector<1x1x512xf32> to vector<1x512xf32>
    %21 = vector.broadcast %20 : vector<1x512xf32> to vector<16x512xf32>
    %22 = arith.addf %18, %21 : vector<16x512xf32>
    %c0_25 = arith.constant 0 : index
    %c0_26 = arith.constant 0 : index
    %23 = vector.load %arg11[%c0_25, %c0_26] : memref<1x512xf32, #tpu.memory_space<vmem>>, vector<1x512xf32>
    %24 = vector.broadcast %23 : vector<1x512xf32> to vector<16x512xf32>
    %25 = arith.addf %22, %24 : vector<16x512xf32>
    %cst_27 = arith.constant 0.000000e+00 : f32
    %26 = vector.broadcast %cst_27 : f32 to vector<16x512xf32>
    %27 = arith.cmpf ogt, %25, %26 : vector<16x512xf32>
    %cst_28 = arith.constant 2.000000e-01 : f32
    %28 = vector.broadcast %cst_28 : f32 to vector<16x512xf32>
    %29 = arith.mulf %28, %25 : vector<16x512xf32>
    %30 = arith.select %27, %25, %29 : vector<16x512xi1>, vector<16x512xf32>
    %31 = arith.truncf %30 : vector<16x512xf32> to vector<16x512xbf16>
    %c0_29 = arith.constant 0 : index
    %c0_30 = arith.constant 0 : index
    %32 = vector.load %arg12[%c0_29, %c0_30] : memref<512x32xbf16, #tpu.memory_space<vmem>>, vector<512x32xbf16>
    %cst_31 = arith.constant dense<0.000000e+00> : vector<16x32xf32>
    %33 = tpu.matmul %31, %32, %cst_31 {dimension_numbers = #tpu.dot_dimension_numbers<[1], [0], [0], [1], [0, 0, 1, 1], [], []>} : vector<16x512xbf16>, vector<512x32xbf16>, vector<16x32xf32> -> vector<16x32xf32>
    %c0_32 = arith.constant 0 : index
    %c0_33 = arith.constant 0 : index
    %34 = vector.load %arg13[%c0_32, %c0_33] : memref<1x32xf32, #tpu.memory_space<vmem>>, vector<1x32xf32>
    %35 = vector.broadcast %34 : vector<1x32xf32> to vector<16x32xf32>
    %36 = arith.addf %33, %35 : vector<16x32xf32>
    %cst_34 = arith.constant 0.000000e+00 : f32
    %37 = vector.broadcast %cst_34 : f32 to vector<16x32xf32>
    %38 = arith.cmpf ogt, %36, %37 : vector<16x32xf32>
    %cst_35 = arith.constant 2.000000e-01 : f32
    %39 = vector.broadcast %cst_35 : f32 to vector<16x32xf32>
    %40 = arith.mulf %39, %36 : vector<16x32xf32>
    %41 = arith.select %38, %36, %40 : vector<16x32xi1>, vector<16x32xf32>
    %c0_36 = arith.constant 0 : index
    %c0_37 = arith.constant 0 : index
    %c0_38 = arith.constant 0 : index
    %42 = vector.load %arg14[%c0_36, %c0_37, %c0_38] : memref<1x16x32xf32, #tpu.memory_space<vmem>>, vector<1x16x32xf32>
    %43 = vector.shape_cast %42 : vector<1x16x32xf32> to vector<16x32xf32>
    %44 = vector.shape_cast %41 : vector<16x32xf32> to vector<1x16x32xf32>
    tpu.vector_store %arg14[%c0_36, %c0_37, %c0_38], %44 {strides = array<i32>} : memref<1x16x32xf32, #tpu.memory_space<vmem>>, vector<1x16x32xf32>,
    return
  }
  func.func @transform_0(%arg0: i32, %arg1: i32) -> (i32, i32, i32) {
    %c0_i32 = arith.constant 0 : i32
    %c0_i32_0 = arith.constant 0 : i32
    return %arg0, %arg1, %c0_i32 : i32, i32, i32
  }
  func.func @transform_1(%arg0: i32, %arg1: i32) -> (i32, i32, i32) {
    %c0_i32 = arith.constant 0 : i32
    %c0_i32_0 = arith.constant 0 : i32
    return %arg0, %arg1, %c0_i32 : i32, i32, i32
  }
  func.func @transform_2(%arg0: i32, %arg1: i32) -> (i32, i32, i32) {
    %c0_i32 = arith.constant 0 : i32
    %c0_i32_0 = arith.constant 0 : i32
    return %arg0, %arg1, %c0_i32 : i32, i32, i32
  }
  func.func @transform_3(%arg0: i32, %arg1: i32) -> (i32, i32, i32) {
    %c0_i32 = arith.constant 0 : i32
    %c0_i32_0 = arith.constant 0 : i32
    return %arg0, %arg1, %c0_i32 : i32, i32, i32
  }
  func.func @transform_4(%arg0: i32, %arg1: i32) -> (i32, i32, i32) {
    %c0_i32 = arith.constant 0 : i32
    %c0_i32_0 = arith.constant 0 : i32
    %c0_i32_1 = arith.constant 0 : i32
    return %arg0, %c0_i32, %c0_i32_0 : i32, i32, i32
  }
  func.func @transform_5(%arg0: i32, %arg1: i32) -> (i32, i32) {
    %c0_i32 = arith.constant 0 : i32
    %c0_i32_0 = arith.constant 0 : i32
    %c0_i32_1 = arith.constant 0 : i32
    return %c0_i32, %c0_i32_0 : i32, i32
  }
  func.func @transform_6(%arg0: i32, %arg1: i32) -> (i32, i32) {
    %c0_i32 = arith.constant 0 : i32
    %c0_i32_0 = arith.constant 0 : i32
    %c0_i32_1 = arith.constant 0 : i32
    return %c0_i32, %c0_i32_0 : i32, i32
  }
  func.func @transform_7(%arg0: i32, %arg1: i32) -> (i32, i32) {
    %c0_i32 = arith.constant 0 : i32
    %c0_i32_0 = arith.constant 0 : i32
    %c0_i32_1 = arith.constant 0 : i32
    return %c0_i32, %c0_i32_0 : i32, i32
  }
  func.func @transform_8(%arg0: i32, %arg1: i32) -> (i32, i32) {
    %c0_i32 = arith.constant 0 : i32
    %c0_i32_0 = arith.constant 0 : i32
    %c0_i32_1 = arith.constant 0 : i32
    return %c0_i32, %c0_i32_0 : i32, i32
  }
  func.func @transform_9(%arg0: i32, %arg1: i32) -> (i32, i32) {
    %c0_i32 = arith.constant 0 : i32
    %c0_i32_0 = arith.constant 0 : i32
    %c0_i32_1 = arith.constant 0 : i32
    return %c0_i32, %c0_i32_0 : i32, i32
  }
  func.func @transform_10(%arg0: i32, %arg1: i32) -> (i32, i32) {
    %c0_i32 = arith.constant 0 : i32
    %c0_i32_0 = arith.constant 0 : i32
    %c0_i32_1 = arith.constant 0 : i32
    return %c0_i32, %c0_i32_0 : i32, i32
  }
  func.func @transform_11(%arg0: i32, %arg1: i32) -> (i32, i32) {
    %c0_i32 = arith.constant 0 : i32
    %c0_i32_0 = arith.constant 0 : i32
    %c0_i32_1 = arith.constant 0 : i32
    return %c0_i32, %c0_i32_0 : i32, i32
  }
  func.func @transform_12(%arg0: i32, %arg1: i32) -> (i32, i32, i32) {
    %c0_i32 = arith.constant 0 : i32
    %c0_i32_0 = arith.constant 0 : i32
    return %arg0, %arg1, %c0_i32 : i32, i32, i32
  }
}

</mosaic_0001>

<bundles_post_ra>
// kernel: dgcnn_cls_encoder.11
= control target key start
LH: loop header
LB: loop body
LE: loop exit
PB: predicated region body
PF: predicated region fallthrough
CT: control target
= control target key end

     0   :  { %s676_s18 = smov 0   ;;  %s678_s19 = smov 0   ;;  %s749_s0 = inlined_call_operand.vmem [shape: f32[2,4,16,3], index: 0, kind: input, shape index: {}]   ;;  %s750_s1 = inlined_call_operand.vmem [shape: f32[2,16,3], index: 1, kind: input, shape index: {}]   ;;  %s751_s2 = inlined_call_operand.vmem [shape: bf16[3,64], index: 2, kind: input, shape index: {}]   ;;  %s752_s3 = inlined_call_operand.vmem [shape: bf16[3,64], index: 3, kind: input, shape index: {}]   ;;  %s753_s4 = inlined_call_operand.vmem [shape: f32[1,64], index: 4, kind: input, shape index: {}]   ;;  %s754_s5 = inlined_call_operand.vmem [shape: bf16[2,16,64], index: 5, kind: output, shape index: {}]  }
   0x1   :  { %s680_s20 = smov 0  }
   0x2 LB: > { %s27_s21 = sadd.s32 1, %s639_s19  ;;  %p576_p0 = scmp.ge.s32.totalorder %s643_s20, 1  ;;  %s643_s20 = sphi %s680_s20, %s15_s20   ;;  %s639_s19 = sphi %s678_s19, %s756_s19   ;;  %s635_s18 = sphi %s676_s18, %s755_s18  }
   0x3   : > { %p29_p1 = scmp.ge.s32.totalorder %s27_s21, 2  ;;  %p225_p2 = scmp.lt.s32.totalorder %s643_s20, 3 }
   0x5   : > { %s758_s21 = smov (%p29_p1, %s27_s21), 0  ;;  %p226_p3 = pnand %p576_p0, %p225_p2 }
   0x6   : > { %p271_p4 = scmp.lt.s32.totalorder (!%p226_p3), %s635_s18, 1 }
   0x7   : > { %229 = sbr.rel (%p226_p3) target bundleno = 191 (0xbf), region = 40 }
   0xc   : > { %vm313_vm0 = vcmask 1040384   ;;  %vm314_vm1 = vcmask 1041408   ;;  %v350_v0 = vld [vmem:[%s751_s2] sm:$0x3]  ;;  %v645_v1 = vmov 65535   ;;  %s760_s18 = smov (!%p271_p4, %s635_s18), 1 }
   0xd   : > { %v315_v2 = vsel %vm313_vm0, 4294967295, %v645_v1  ;;  %v304_v3 = vld [vmem:[%s752_s3] sm:$0x3]  ;;  %s590_s26 = sshll.u32 %s760_s18, 6  ;;  %s591_s27 = sshll.u32 %s760_s18, 4  ;;  %vm309_vm2 = vcmask 23552  }
   0xe   : > { %v316_v4 = vsel %vm314_vm1, %v315_v2, 0  ;;  %s707_s30 = scalar_lea.vmem %s749_s0, %s590_s26  ;;  %s288_s8 = scalar_lea.vmem %s750_s1, %s591_s27  ;;  %v620_v38 = vld [vmem:[%s753_s4] ss:$0 sm:$0xff]  ;;  %vm447_vm5 = vcmask 523264   ;;  %vm464_vm11 = vcmask 519168  }
   0xf   : > { %v384_v5 = vand.u32 %v350_v0, %v316_v4  ;;  %v318_v6 = vand.u32 %v316_v4, %v304_v3  ;;  %v336_v7 = vld [vmem:[%s707_s30 + $0x10] sm:$0xff]  ;;  %v337_v8 = vld [vmem:[%s707_s30 + $0x18] sm:$0xff]  ;;  %v301_v14 = vld [vmem:[%s288_s8] sm:$0xff]  ;;  %s592_s11 = sshll.u32 %s760_s18, 3 }
  0x10   : > { %v340_v9 = vld [vmem:[%s707_s30 + $0x30] sm:$0xff]  ;;  %v344_v10 = vpack.c.bf16 %v336_v7, %v336_v7  ;;  %v345_v11 = vpack.c.bf16 %v337_v8, %v337_v8  ;;  %v341_v12 = vld [vmem:[%s707_s30 + $0x38] sm:$0xff]  ;;  %v302_v15 = vld [vmem:[%s288_s8 + $0x8] sm:$0xff]  ;;  %s298_s14 = scalar_lea.vmem %s754_s5, %s592_s11 }
  0x11   : > { %593 = vmatpush.bf16.msra.mxu2 %v384_v5  ;;  %594 = vmatpush.bf16.msra.mxu3 %v384_v5  ;;  %v348_v13 = vpack.c.bf16 %v340_v9, %v340_v9  ;;  %v349_v16 = vpack.c.bf16 %v341_v12, %v341_v12  ;;  %v303_v17 = vpack.c.bf16 %v302_v15, %v301_v14  ;;  %v334_v18 = vld [vmem:[%s707_s30] sm:$0xff]  ;;  %v335_v19 = vld [vmem:[%s707_s30 + $0x8] sm:$0xff] }
  0x12   : > { %327 = vmatpush.bf16.msra.mxu0 %v318_v6  ;;  %393 = vmatpush.bf16.msra.mxu1 %v384_v5  ;;  %v361_v20 = vunpack.c.l.b16 %v344_v10  ;;  %v362_v21 = vunpack.c.l.b16 %v345_v11  ;;  %v342_v23 = vpack.c.bf16 %v334_v18, %v334_v18  ;;  %v343_v25 = vpack.c.bf16 %v335_v19, %v335_v19  ;;  %v338_v31 = vld [vmem:[%s707_s30 + $0x20] sm:$0xff]  ;;  %v339_v32 = vld [vmem:[%s707_s30 + $0x28] sm:$0xff] }
  0x13   : > { %v365_v22 = vunpack.c.l.b16 %v348_v13  ;;  %v366_v24 = vunpack.c.l.b16 %v349_v16  ;;  %v346_v33 = vpack.c.bf16 %v338_v31, %v338_v31  ;;  %v347_v34 = vpack.c.bf16 %v339_v32, %v339_v32 }
  0x14   : > { %v368_v26 = vpack.c.b16 %v362_v21, %v361_v20  ;;  %v359_v27 = vunpack.c.l.b16 %v342_v23  ;;  %v360_v29 = vunpack.c.l.b16 %v343_v25 }
  0x15   : > { %583 = vmatmul.msk.bf16.vlgmr.msra.gmra.mxu0 %vm309_vm2, %v303_v17  ;;  %v370_v28 = vpack.c.b16 %v366_v24, %v365_v22  ;;  %v363_v35 = vunpack.c.l.b16 %v346_v33  ;;  %v364_v36 = vunpack.c.l.b16 %v347_v34 }
  0x16   : > { %585 = vmatmul.msk.bf16.vlgmr.msra.gmra.mxu2 %vm309_vm2, %v368_v26  ;;  %v367_v30 = vpack.c.b16 %v360_v29, %v359_v27 }
  0x17   : > { %587 = vmatmul.msk.bf16.vlgmr.msra.gmra.mxu3 %vm309_vm2, %v370_v28  ;;  %v369_v37 = vpack.c.b16 %v364_v36, %v363_v35 }
  0x18   : > { %584 = vmatmul.msk.bf16.vlgmr.msra.gmra.mxu1 %vm309_vm2, %v367_v30 }
  0x26   : > { %586 = vmatmul.msk.bf16.gmra.mxu2 %vm309_vm2, %v369_v37 }
  0x92   : > { %v329_v39 = vpop.f32.mrf.mxu0 }
  0x93   : > { %v330_v41 = vadd.f32 %v620_v38, %v329_v39 }
  0x95   : > { %v395_v43 = vpop.f32.mrf.mxu1 }
  0x96   : > { %v415_v48 = vadd.f32 %v395_v43, %v330_v41 }
  0x98   : > { %v431_v53 = vmul.f32 0.2, %v415_v48  ;;  %vm423_vm6 = vcmp.gt.f32.partialorder %v415_v48, 0.0 }
  0x99   : > { %v400_v40 = vpop.f32.mrf.mxu2 }
  0x9a   : > { %v410_v42 = vpop.f32.mrf.mxu3  ;;  %v417_v44 = vadd.f32 %v400_v40, %v330_v41  ;;  %v331_v47 = vpop.f32.mrf.mxu0  ;;  %v439_v61 = vsel %vm423_vm6, %v415_v48, %v431_v53 }
  0x9b   : > { %v421_v46 = vadd.f32 %v410_v42, %v330_v41  ;;  %v332_v51 = vadd.f32 %v620_v38, %v331_v47  ;;  %v448_v5 = vsel %vm447_vm5, %v439_v61, -inf }
  0x9c   : > { %v433_v49 = vmul.f32 0.2, %v417_v44  ;;  %vm425_vm3 = vcmp.gt.f32.partialorder %v417_v44, 0.0 }
  0x9d   : > { %v437_v50 = vmul.f32 0.2, %v421_v46  ;;  %vm429_vm4 = vcmp.gt.f32.partialorder %v421_v46, 0.0  ;;  %v397_v55 = vpop.f32.mrf.mxu1 }
  0x9e   : > { %v441_v54 = vsel %vm425_vm3, %v417_v44, %v433_v49  ;;  %v416_v62 = vadd.f32 %v397_v55, %v332_v51 }
  0x9f   : > { %v445_v57 = vsel %vm429_vm4, %v421_v46, %v437_v50  ;;  %v449_v0 = vsel %vm447_vm5, %v441_v54, -inf }
  0xa0   : > { %v452_v1 = vsel %vm447_vm5, %v445_v57, -inf  ;;  %v432_v8 = vmul.f32 0.2, %v416_v62  ;;  %vm424_vm10 = vcmp.gt.f32.partialorder %v416_v62, 0.0 }
  0xa1   : > { %v402_v45 = vpop.f32.mrf.mxu2  ;;  %v453_v7 = vmax.f32 %v449_v0, %v452_v1 }
  0xa2   : > { %v412_v52 = vpop.f32.mrf.mxu3  ;;  %v418_v58 = vadd.f32 %v402_v45, %v332_v51  ;;  %v440_v15 = vsel %vm424_vm10, %v416_v62, %v432_v8 }
  0xa3   : > { %v422_v59 = vadd.f32 %v412_v52, %v332_v51  ;;  %v455_v21 = vsel %vm447_vm5, %v440_v15, -inf }
  0xa4   : > { %v434_v2 = vmul.f32 0.2, %v418_v58  ;;  %vm426_vm8 = vcmp.gt.f32.partialorder %v418_v58, 0.0 }
  0xa5   : > { %v438_v3 = vmul.f32 0.2, %v422_v59  ;;  %vm430_vm9 = vcmp.gt.f32.partialorder %v422_v59, 0.0 }
  0xa6   : > { %v442_v11 = vsel %vm426_vm8, %v418_v58, %v434_v2 }
  0xa7   : > { %v446_v12 = vsel %vm430_vm9, %v422_v59, %v438_v3  ;;  %v456_v18 = vsel %vm447_vm5, %v442_v11, -inf }
  0xa8   : > { %v459_v19 = vsel %vm447_vm5, %v446_v12, -inf }
  0xa9   : > { %v405_v56 = vpop.f32.mrf.mxu2  ;;  %v460_v23 = vmax.f32 %v456_v18, %v459_v19 }
  0xaa   : > { %v419_v60 = vadd.f32 %v405_v56, %v330_v41 }
  0xac   : > { %vm427_vm7 = vcmp.gt.f32.partialorder %v419_v60, 0.0  ;;  %v435_v63 = vmul.f32 0.2, %v419_v60 }
  0xae   : > { %v443_v4 = vsel %vm427_vm7, %v419_v60, %v435_v63 }
  0xaf   : > { %v450_v6 = vsel %vm447_vm5, %v443_v4, -inf }
  0xb0   : > { %v451_v9 = vmax.f32 %v448_v5, %v450_v6 }
  0xb1   : > { %v407_v10 = vpop.f32.mrf.mxu2 }
  0xb2   : > { %v454_v13 = vmax.f32 %v451_v9, %v453_v7  ;;  %v420_v14 = vadd.f32 %v407_v10, %v332_v51 }
  0xb4   : > { %v462_v16 = vpack.c.bf16 %v454_v13, %v454_v13  ;;  %vm428_vm12 = vcmp.gt.f32.partialorder %v420_v14, 0.0  ;;  %v436_v17 = vmul.f32 0.2, %v420_v14 }
  0xb6   : > { %465 = vst.msk [vmem:[%s298_s14] sm:$0xf] %vm464_vm11, %v462_v16  ;;  %v444_v20 = vsel %vm428_vm12, %v420_v14, %v436_v17 }
  0xb7   : > { %v457_v22 = vsel %vm447_vm5, %v444_v20, -inf }
  0xb8   : > { %v458_v24 = vmax.f32 %v455_v21, %v457_v22 }
  0xba   : > { %v461_v25 = vmax.f32 %v458_v24, %v460_v23 }
  0xbc   : > { %v463_v26 = vpack.c.bf16 %v461_v25, %v461_v25 }
  0xbe   : > { %466 = vst.msk [vmem:[%s298_s14 + $0x4] sm:$0xf] %vm464_vm11, %v463_v26 }
  0xbf PF: > { %s15_s20 = sadd.s32 1, %s643_s20   ;;  %s755_s18 = smov %s639_s19 }
  0xc0   : > { %p12_p5 = scmp.ge.s32.totalorder %s15_s20, 4   ;;  %s756_s19 = smov %s758_s21 }
  0xc2   :  { %14 = sbr.rel (!%p12_p5) target bundleno = 2 (0x2), region = 73 }

// kernel: dgcnn_cls_encoder.10
= control target key start
LH: loop header
LB: loop body
LE: loop exit
PB: predicated region body
PF: predicated region fallthrough
CT: control target
= control target key end

     0   :  { %s634_s12 = smov 0   ;;  %s636_s13 = smov 0   ;;  %s759_s0 = inlined_call_operand.vmem [shape: f32[2,16,3], index: 0, kind: input, shape index: {}]   ;;  %s760_s1 = inlined_call_operand.vmem [shape: f32[2,3,16], index: 1, kind: input, shape index: {}]   ;;  %s761_s2 = inlined_call_operand.vmem [shape: f32[2,1,16], index: 2, kind: input, shape index: {}]   ;;  %s762_s3 = inlined_call_operand.vmem [shape: s32[2,16,4], index: 3, kind: output, shape index: {}]  }
   0x1   :  { %s638_s14 = smov 0  }
   0x2 LB: > { %s25_s15 = sadd.s32 1, %s608_s13  ;;  %p511_p0 = scmp.ge.s32.totalorder %s612_s14, 1  ;;  %s612_s14 = sphi %s638_s14, %s13_s14   ;;  %s608_s13 = sphi %s636_s13, %s764_s13   ;;  %s604_s12 = sphi %s634_s12, %s763_s12  }
   0x3   : > { %p27_p1 = scmp.ge.s32.totalorder %s25_s15, 2  ;;  %p175_p2 = scmp.lt.s32.totalorder %s612_s14, 3 }
   0x5   : > { %s766_s15 = smov (%p27_p1, %s25_s15), 0  ;;  %p176_p3 = pnand %p511_p0, %p175_p2 }
   0x6   : > { %p215_p4 = scmp.lt.s32.totalorder (!%p176_p3), %s604_s12, 1 }
   0x7   : > { %179 = sbr.rel (%p176_p3) target bundleno = 1114 (0x45a), region = 32 }
   0xc   : > { %s768_s12 = smov (!%p215_p4, %s604_s12), 1  ;;  %vm251_vm0 = vcmask 1042432   ;;  %vm244_vm1 = vcmask 23552   ;;  %vm299_vm2 = vcmask 130048   ;;  %v296_v20 = vlaneseq }
   0xd   : > { %s514_s16 = sshll.u32 %s768_s12, 2  ;;  %s522_s17 = sshll.u32 %s768_s12, 4 }
   0xe   : > { %s227_s20 = scalar_lea.vmem %s760_s1, %s514_s16  ;;  %s222_s23 = scalar_lea.vmem %s759_s0, %s522_s17  ;;  %v670_v21 = vand.u32 127, %v296_v20 }
   0xf   : > { %v243_v0 = vld [vmem:[%s227_s20] sm:$0x7]  ;;  %v242_v2 = vld [vmem:[%s222_s23 + $0x8] sm:$0xff]  ;;  %s230_s26 = scalar_lea.vmem %s761_s2, %s768_s12  ;;  %s239_s29 = scalar_lea.vmem %s762_s3, %s522_s17 }
  0x10   : > { %v241_v1 = vld [vmem:[%s222_s23] sm:$0xff]  ;;  %517 = vmatpush.msk.msra.mxu0 %vm251_vm0, %v243_v0  ;;  %524 = vmatpush.msk.msra.mxu1 %vm251_vm0, %v243_v0  ;;  %v279_v5 = vmul.f32 %v242_v2, %v242_v2  ;;  %v673_v22 = vcvt.s32.f32 %v670_v21 }
  0x11   : > { %v278_v3 = vmul.f32 %v241_v1, %v241_v1  ;;  %518 = vmatmul.msk.f32.vlgmr.msra.gmra.mxu0 %vm244_vm1, %v241_v1  ;;  %519 = vmatmul.msk.f32.vlgmr.msra.gmra.mxu1 %vm244_vm1, %v242_v2  ;;  %v589_v11 = vld [vmem:[%s230_s26] ss:$0 sm:$0xff] }
  0x12   : > { %v283_v6 = vsel %vm244_vm1, %v279_v5, 0.0 }
  0x13   : > { %v280_v4 = vsel %vm244_vm1, %v278_v3, 0.0 }
  0x14   : > { %281 = vadd.xlane.f32.xlu0 %v280_v4 }
  0x1c   : > { %284 = vadd.xlane.f32.xlu0 %v283_v6 }
  0x87   : > { %v282_v7 = vpop.xlane.xlu0 %281 }
  0x8e   : > { %v272_v8 = vpop.f32.mrf.mxu0  ;;  %v275_v9 = vpop.f32.mrf.mxu1 }
  0x8f   : > { %v286_v10 = vmul.f32 2.0, %v272_v8  ;;  %v287_v12 = vmul.f32 2.0, %v275_v9  ;;  %v285_v13 = vpop.xlane.xlu0 %284 }
  0x91   : > { %v288_v14 = vsub.f32 %v286_v10, %v282_v7  ;;  %v289_v16 = vsub.f32 %v287_v12, %v285_v13 }
  0x93   : > { %v294_v15 = vsub.f32 %v288_v14, %v589_v11  ;;  %v295_v18 = vsub.f32 %v289_v16, %v589_v11 }
  0x95   : > { %v300_v17 = vsel %vm299_vm2, %v294_v15, -inf  ;;  %v303_v19 = vsel %vm299_vm2, %v295_v18, -inf }
  0x96   : > { %301 = vmax.xlane.f32.xlu1 %v300_v17 }
  0x9e   : > { %304 = vmax.xlane.f32.xlu1 %v303_v19 }
 0x109   : > { %v302_v23 = vpop.xlane.xlu1 %301 }
 0x10a   : > { %vm306_vm3 = vcmp.eq.f32.partialorder %v294_v15, %v302_v23 }
 0x10b   : > { %v308_v24 = vsel %vm306_vm3, %v673_v22, 16.0 }
 0x10c   : > { %v310_v25 = vsel %vm299_vm2, %v308_v24, inf }
 0x10d   : > { %311 = vmin.xlane.f32.xlu2 %v310_v25 }
 0x111   : > { %v305_v26 = vpop.xlane.xlu1 %304 }
 0x112   : > { %vm307_vm4 = vcmp.eq.f32.partialorder %v295_v18, %v305_v26 }
 0x113   : > { %v309_v27 = vsel %vm307_vm4, %v673_v22, 16.0 }
 0x114   : > { %v313_v28 = vsel %vm299_vm2, %v309_v27, inf }
 0x115   : > { %314 = vmin.xlane.f32.xlu2 %v313_v28 }
 0x180   : > { %v679_v29 = vpop.xlane.xlu2 %311 }
 0x181   : > { %vm321_vm5 = vcmp.eq.f32.partialorder %v673_v22, %v679_v29  ;;  %v526_v1 = vceil.f32 %v679_v29  ;;  %v527_v2 = vfloor.f32 %v679_v29  ;;  %vm525_vm1 = vcmp.lt.s32.totalorder %v679_v29, 0 }
 0x182   : > { %v323_v30 = vsel %vm321_vm5, -inf, %v294_v15  ;;  %vm316_vm5 = vcmp.eq.s32.totalorder %v670_v21, 0 }
 0x183   : > { %v325_v31 = vsel %vm299_vm2, %v323_v30, -inf  ;;  %v528_v7 = vsel %vm525_vm1, %v526_v1, %v527_v2 }
 0x184   : > { %326 = vmax.xlane.f32.xlu0 %v325_v31  ;;  %v529_v10 = vcvt.f32.s32 %v528_v7 }
 0x186   : > { %v319_v23 = vsel %vm316_vm5, %v529_v10, 0 }
 0x188   : > { %v684_v32 = vpop.xlane.xlu2 %314 }
 0x189   : > { %vm322_vm6 = vcmp.eq.f32.partialorder %v673_v22, %v684_v32  ;;  %v531_v11 = vceil.f32 %v684_v32  ;;  %v532_v12 = vfloor.f32 %v684_v32 }
 0x18a   : > { %v324_v33 = vsel %vm322_vm6, -inf, %v295_v18  ;;  %vm341_vm6 = vcmp.eq.s32.totalorder %v670_v21, 1 }
 0x18b   : > { %v328_v34 = vsel %vm299_vm2, %v324_v33, -inf }
 0x18c   : > { %329 = vmax.xlane.f32.xlu1 %v328_v34 }
 0x1f7   : > { %v327_v35 = vpop.xlane.xlu0 %326 }
 0x1f8   : > { %vm331_vm7 = vcmp.eq.f32.partialorder %v323_v30, %v327_v35 }
 0x1f9   : > { %v333_v36 = vsel %vm331_vm7, %v673_v22, 16.0 }
 0x1fa   : > { %v335_v37 = vsel %vm299_vm2, %v333_v36, inf }
 0x1fb   : > { %336 = vmin.xlane.f32.xlu2 %v335_v37 }
 0x1ff   : > { %v330_v38 = vpop.xlane.xlu1 %329 }
 0x200   : > { %vm332_vm8 = vcmp.eq.f32.partialorder %v324_v33, %v330_v38 }
 0x201   : > { %v334_v39 = vsel %vm332_vm8, %v673_v22, 16.0 }
 0x202   : > { %v338_v40 = vsel %vm299_vm2, %v334_v39, inf }
 0x203   : > { %339 = vmin.xlane.f32.xlu0 %v338_v40 }
 0x26e   : > { %v337_v41 = vpop.xlane.xlu2 %336 }
 0x26f   : > { %vm346_vm9 = vcmp.eq.f32.partialorder %v673_v22, %v337_v41  ;;  %v536_v3 = vceil.f32 %v337_v41  ;;  %v537_v4 = vfloor.f32 %v337_v41  ;;  %vm535_vm3 = vcmp.lt.s32.totalorder %v337_v41, 0 }
 0x270   : > { %v348_v42 = vsel %vm346_vm9, -inf, %v323_v30  ;;  %vm366_vm9 = vcmp.eq.s32.totalorder %v670_v21, 2 }
 0x271   : > { %v350_v43 = vsel %vm299_vm2, %v348_v42, -inf  ;;  %v538_v8 = vsel %vm535_vm3, %v536_v3, %v537_v4 }
 0x272   : > { %351 = vmax.xlane.f32.xlu1 %v350_v43  ;;  %v539_v13 = vcvt.f32.s32 %v538_v8 }
 0x274   : > { %v344_v26 = vsel %vm341_vm6, %v539_v13, %v319_v23 }
 0x276   : > { %v695_v44 = vpop.xlane.xlu0 %339 }
 0x277   : > { %vm347_vm10 = vcmp.eq.f32.partialorder %v673_v22, %v695_v44  ;;  %v541_v14 = vceil.f32 %v695_v44  ;;  %v542_v15 = vfloor.f32 %v695_v44  ;;  %vm540_vm8 = vcmp.lt.s32.totalorder %v695_v44, 0 }
 0x278   : > { %v349_v45 = vsel %vm347_vm10, -inf, %v324_v33 }
 0x279   : > { %v353_v46 = vsel %vm299_vm2, %v349_v45, -inf  ;;  %v543_v28 = vsel %vm540_vm8, %v541_v14, %v542_v15 }
 0x27a   : > { %354 = vmax.xlane.f32.xlu2 %v353_v46  ;;  %v544_v34 = vcvt.f32.s32 %v543_v28 }
 0x2e5   : > { %v352_v47 = vpop.xlane.xlu1 %351 }
 0x2e6   : > { %vm356_vm11 = vcmp.eq.f32.partialorder %v348_v42, %v352_v47 }
 0x2e7   : > { %v358_v48 = vsel %vm356_vm11, %v673_v22, 16.0  ;;  %vm391_vm11 = vcmp.eq.s32.totalorder %v670_v21, 3 }
 0x2e8   : > { %v360_v49 = vsel %vm299_vm2, %v358_v48, inf }
 0x2e9   : > { %361 = vmin.xlane.f32.xlu0 %v360_v49 }
 0x2ed   : > { %v355_v50 = vpop.xlane.xlu2 %354 }
 0x2ee   : > { %vm357_vm12 = vcmp.eq.f32.partialorder %v349_v45, %v355_v50 }
 0x2ef   : > { %v359_v51 = vsel %vm357_vm12, %v673_v22, 16.0  ;;  %vm396_vm12 = vcmask 31744  }
 0x2f0   : > { %v363_v52 = vsel %vm299_vm2, %v359_v51, inf }
 0x2f1   : > { %364 = vmin.xlane.f32.xlu1 %v363_v52 }
 0x35c   : > { %v362_v53 = vpop.xlane.xlu0 %361 }
 0x35d   : > { %vm371_vm13 = vcmp.eq.f32.partialorder %v673_v22, %v362_v53  ;;  %v546_v5 = vceil.f32 %v362_v53  ;;  %v547_v6 = vfloor.f32 %v362_v53  ;;  %vm545_vm4 = vcmp.lt.s32.totalorder %v362_v53, 0 }
 0x35e   : > { %v373_v54 = vsel %vm371_vm13, -inf, %v348_v42 }
 0x35f   : > { %v375_v55 = vsel %vm299_vm2, %v373_v54, -inf  ;;  %v548_v9 = vsel %vm545_vm4, %v546_v5, %v547_v6 }
 0x360   : > { %376 = vmax.xlane.f32.xlu2 %v375_v55  ;;  %v549_v17 = vcvt.f32.s32 %v548_v9 }
 0x362   : > { %v369_v29 = vsel %vm366_vm9, %v549_v17, %v344_v26 }
 0x364   : > { %v365_v56 = vpop.xlane.xlu1 %364 }
 0x365   : > { %vm372_vm14 = vcmp.eq.f32.partialorder %v673_v22, %v365_v56  ;;  %v551_v20 = vceil.f32 %v365_v56  ;;  %vm550_vm10 = vcmp.lt.s32.totalorder %v365_v56, 0 }
 0x366   : > { %v374_v57 = vsel %vm372_vm14, -inf, %v349_v45 }
 0x367   : > { %v378_v58 = vsel %vm299_vm2, %v374_v57, -inf }
 0x368   : > { %379 = vmax.xlane.f32.xlu0 %v378_v58 }
 0x3d3   : > { %v377_v59 = vpop.xlane.xlu2 %376 }
 0x3d4   : > { %vm381_vm15 = vcmp.eq.f32.partialorder %v373_v54, %v377_v59 }
 0x3d5   : > { %v383_v60 = vsel %vm381_vm15, %v673_v22, 16.0 }
 0x3d6   : > { %v385_v61 = vsel %vm299_vm2, %v383_v60, inf }
 0x3d7   : > { %386 = vmin.xlane.f32.xlu1 %v385_v61 }
 0x3db   : > { %v380_v62 = vpop.xlane.xlu0 %379 }
 0x3dc   : > { %vm382_vm0 = vcmp.eq.f32.partialorder %v374_v57, %v380_v62 }
 0x3dd   : > { %v384_v63 = vsel %vm382_vm0, %v673_v22, 16.0  ;;  %v552_v22 = vfloor.f32 %v365_v56 }
 0x3de   : > { %v388_v0 = vsel %vm299_vm2, %v384_v63, inf  ;;  %vm530_vm2 = vcmp.lt.s32.totalorder %v684_v32, 0 }
 0x3df   : > { %389 = vmin.xlane.f32.xlu2 %v388_v0  ;;  %v533_v25 = vsel %vm530_vm2, %v531_v11, %v532_v12  ;;  %v553_v30 = vsel %vm550_vm10, %v551_v20, %v552_v22 }
 0x3e0   : > { %v534_v33 = vcvt.f32.s32 %v533_v25  ;;  %v554_v32 = vcvt.f32.s32 %v553_v30 }
 0x3e2   : > { %v320_v38 = vsel %vm316_vm5, %v534_v33, 0 }
 0x3e3   : > { %v345_v40 = vsel %vm341_vm6, %v544_v34, %v320_v38 }
 0x3e4   : > { %v370_v42 = vsel %vm366_vm9, %v554_v32, %v345_v40 }
 0x44a   : > { %v387_v16 = vpop.xlane.xlu1 %386 }
 0x44b   : > { %vm555_vm7 = vcmp.lt.s32.totalorder %v387_v16, 0  ;;  %v556_v18 = vceil.f32 %v387_v16  ;;  %v557_v19 = vfloor.f32 %v387_v16 }
 0x44d   : > { %v558_v24 = vsel %vm555_vm7, %v556_v18, %v557_v19 }
 0x44e   : > { %v559_v27 = vcvt.f32.s32 %v558_v24 }
 0x450   : > { %v394_v31 = vsel %vm391_vm11, %v559_v27, %v369_v29 }
 0x451   : > { %397 = vst.msk [vmem:[%s239_s29] sm:$0xff] %vm396_vm12, %v394_v31 }
 0x452   : > { %v390_v35 = vpop.xlane.xlu2 %389 }
 0x453   : > { %vm560_vm13 = vcmp.lt.s32.totalorder %v390_v35, 0  ;;  %v561_v36 = vceil.f32 %v390_v35  ;;  %v562_v37 = vfloor.f32 %v390_v35 }
 0x455   : > { %v563_v39 = vsel %vm560_vm13, %v561_v36, %v562_v37 }
 0x456   : > { %v564_v41 = vcvt.f32.s32 %v563_v39 }
 0x458   : > { %v395_v43 = vsel %vm391_vm11, %v564_v41, %v370_v42 }
 0x459   : > { %398 = vst.msk [vmem:[%s239_s29 + $0x8] sm:$0xff] %vm396_vm12, %v395_v43 }
 0x45a PF: > { %s13_s14 = sadd.s32 1, %s612_s14   ;;  %s763_s12 = smov %s608_s13 }
 0x45b   : > { %p10_p5 = scmp.ge.s32.totalorder %s13_s14, 4   ;;  %s764_s13 = smov %s766_s15 }
 0x45d   :  { %12 = sbr.rel (!%p10_p5) target bundleno = 2 (0x2), region = 68 }

// kernel: dgcnn_cls_encoder.12
= control target key start
LH: loop header
LB: loop body
LE: loop exit
PB: predicated region body
PF: predicated region fallthrough
CT: control target
= control target key end

     0   :  { %s684_s12 = smov 0   ;;  %s686_s13 = smov 0   ;;  %s806_s0 = inlined_call_operand.vmem [shape: bf16[2,16,64], index: 0, kind: input, shape index: {}]   ;;  %s807_s1 = inlined_call_operand.vmem [shape: bf16[2,64,16], index: 1, kind: input, shape index: {}]   ;;  %s808_s2 = inlined_call_operand.vmem [shape: f32[2,1,16], index: 2, kind: input, shape index: {}]   ;;  %s809_s3 = inlined_call_operand.vmem [shape: s32[2,16,4], index: 3, kind: output, shape index: {}]  }
   0x1   :  { %s688_s14 = smov 0  }
   0x2 LB: > { %s25_s15 = sadd.s32 1, %s658_s13  ;;  %p537_p0 = scmp.ge.s32.totalorder %s662_s14, 1  ;;  %s662_s14 = sphi %s688_s14, %s13_s14   ;;  %s658_s13 = sphi %s686_s13, %s811_s13   ;;  %s654_s12 = sphi %s684_s12, %s810_s12  }
   0x3   : > { %p27_p1 = scmp.ge.s32.totalorder %s25_s15, 2  ;;  %p176_p2 = scmp.lt.s32.totalorder %s662_s14, 3 }
   0x5   : > { %s813_s15 = smov (%p27_p1, %s25_s15), 0  ;;  %p177_p3 = pnand %p537_p0, %p176_p2 }
   0x6   : > { %p217_p4 = scmp.lt.s32.totalorder (!%p177_p3), %s654_s12, 1 }
   0x7   : > { %180 = sbr.rel (%p177_p3) target bundleno = 1128 (0x468), region = 32 }
   0xc   : > { %s815_s12 = smov (!%p217_p4, %s654_s12), 1  ;;  %vm284_vm0 = vcmask 523264   ;;  %vm325_vm1 = vcmask 130048   ;;  %v322_v25 = vlaneseq }
   0xd   : > { %s568_s16 = sshll.u32 %s815_s12, 5  ;;  %s567_s17 = sshll.u32 %s815_s12, 3 }
   0xe   : > { %s230_s20 = scalar_lea.vmem %s807_s1, %s568_s16  ;;  %s224_s23 = scalar_lea.vmem %s806_s0, %s567_s17  ;;  %v718_v26 = vand.u32 127, %v322_v25 }
   0xf   : > { %v574_v0 = vld [vmem:[%s230_s20 + $0x18] sm:$0xff]  ;;  %v245_v1 = vld [vmem:[%s224_s23] sm:$0xff]   ;;  %v573_v2 = vld [vmem:[%s230_s20 + $0x10] sm:$0xff]  ;;  %s233_s26 = scalar_lea.vmem %s808_s2, %s815_s12  ;;  %s569_s27 = sshll.u32 %s815_s12, 4 }
  0x10   : > { %292 = vmatpush.bf16.msra.mxu0 %v574_v0  ;;  %v302_v3 = vunpack.c.l.bf16 %v245_v1  ;;  %v303_v5 = vunpack.c.h.bf16 %v245_v1  ;;  %v572_v6 = vld [vmem:[%s230_s20 + $0x8] sm:$0xff]  ;;  %v571_v9 = vld [vmem:[%s230_s20] sm:$0xff]  ;;  %v721_v27 = vcvt.s32.f32 %v718_v26  ;;  %s242_s30 = scalar_lea.vmem %s809_s3, %s569_s27 }
  0x11   : > { %v570_v11 = vld [vmem:[%s224_s23] sm:$0xff] }
  0x12   : > { %v304_v4 = vmul.f32 %v302_v3, %v302_v3  ;;  %v305_v8 = vmul.f32 %v303_v5, %v303_v5  ;;  %v639_v15 = vld [vmem:[%s233_s26] ss:$0 sm:$0xff] }
  0x14   : > { %293 = vmatpush.bf16.msra.mxu0 %v573_v2  ;;  %v306_v7 = vsel %vm284_vm0, %v304_v4, 0.0  ;;  %v309_v10 = vsel %vm284_vm0, %v305_v8, 0.0 }
  0x15   : > { %307 = vadd.xlane.f32.xlu0 %v306_v7 }
  0x18   : > { %294 = vmatpush.bf16.msra.mxu0 %v572_v6 }
  0x1c   : > { %295 = vmatpush.bf16.msra.mxu0 %v571_v9 }
  0x1d   : > { %310 = vadd.xlane.f32.xlu0 %v309_v10 }
  0x1f   : > { %564 = vmatmul.msk.bf16.vlgmr.msra.gmra.mxu0 %vm284_vm0, %v570_v11 }
  0x88   : > { %v308_v12 = vpop.xlane.xlu0 %307 }
  0x90   : > { %v311_v20 = vpop.xlane.xlu0 %310 }
  0x9c   : > { %v297_v13 = vpop.f32.mrf.mxu0 }
  0x9d   : > { %v312_v14 = vmul.f32 2.0, %v297_v13 }
  0x9f   : > { %v314_v16 = vsub.f32 %v312_v14, %v308_v12 }
  0xa1   : > { %v320_v17 = vsub.f32 %v314_v16, %v639_v15 }
  0xa3   : > { %v326_v18 = vsel %vm325_vm1, %v320_v17, -inf }
  0xa4   : > { %v299_v19 = vpop.f32.mrf.mxu0  ;;  %327 = vmax.xlane.f32.xlu1 %v326_v18 }
  0xa5   : > { %v313_v21 = vmul.f32 2.0, %v299_v19 }
  0xa7   : > { %v315_v22 = vsub.f32 %v313_v21, %v311_v20 }
  0xa9   : > { %v321_v23 = vsub.f32 %v315_v22, %v639_v15 }
  0xab   : > { %v329_v24 = vsel %vm325_vm1, %v321_v23, -inf }
  0xac   : > { %330 = vmax.xlane.f32.xlu1 %v329_v24 }
 0x117   : > { %v328_v28 = vpop.xlane.xlu1 %327 }
 0x118   : > { %vm332_vm2 = vcmp.eq.f32.partialorder %v320_v17, %v328_v28 }
 0x119   : > { %v334_v29 = vsel %vm332_vm2, %v721_v27, 16.0 }
 0x11a   : > { %v336_v30 = vsel %vm325_vm1, %v334_v29, inf }
 0x11b   : > { %337 = vmin.xlane.f32.xlu2 %v336_v30 }
 0x11f   : > { %v331_v31 = vpop.xlane.xlu1 %330 }
 0x120   : > { %vm333_vm3 = vcmp.eq.f32.partialorder %v321_v23, %v331_v31 }
 0x121   : > { %v335_v32 = vsel %vm333_vm3, %v721_v27, 16.0 }
 0x122   : > { %v339_v33 = vsel %vm325_vm1, %v335_v32, inf }
 0x123   : > { %340 = vmin.xlane.f32.xlu2 %v339_v33 }
 0x18e   : > { %v727_v34 = vpop.xlane.xlu2 %337 }
 0x18f   : > { %vm347_vm4 = vcmp.eq.f32.partialorder %v721_v27, %v727_v34  ;;  %v576_v6 = vceil.f32 %v727_v34  ;;  %v577_v7 = vfloor.f32 %v727_v34  ;;  %vm575_vm0 = vcmp.lt.s32.totalorder %v727_v34, 0 }
 0x190   : > { %v349_v35 = vsel %vm347_vm4, -inf, %v320_v17  ;;  %vm342_vm4 = vcmp.eq.s32.totalorder %v718_v26, 0 }
 0x191   : > { %v351_v36 = vsel %vm325_vm1, %v349_v35, -inf  ;;  %v578_v12 = vsel %vm575_vm0, %v576_v6, %v577_v7 }
 0x192   : > { %352 = vmax.xlane.f32.xlu0 %v351_v36  ;;  %v579_v15 = vcvt.f32.s32 %v578_v12 }
 0x194   : > { %v345_v28 = vsel %vm342_vm4, %v579_v15, 0 }
 0x196   : > { %v732_v37 = vpop.xlane.xlu2 %340 }
 0x197   : > { %vm348_vm5 = vcmp.eq.f32.partialorder %v721_v27, %v732_v37  ;;  %v581_v16 = vceil.f32 %v732_v37  ;;  %v582_v17 = vfloor.f32 %v732_v37 }
 0x198   : > { %v350_v38 = vsel %vm348_vm5, -inf, %v321_v23  ;;  %vm367_vm5 = vcmp.eq.s32.totalorder %v718_v26, 1 }
 0x199   : > { %v354_v39 = vsel %vm325_vm1, %v350_v38, -inf }
 0x19a   : > { %355 = vmax.xlane.f32.xlu1 %v354_v39 }
 0x205   : > { %v353_v40 = vpop.xlane.xlu0 %352 }
 0x206   : > { %vm357_vm6 = vcmp.eq.f32.partialorder %v349_v35, %v353_v40 }
 0x207   : > { %v359_v41 = vsel %vm357_vm6, %v721_v27, 16.0 }
 0x208   : > { %v361_v42 = vsel %vm325_vm1, %v359_v41, inf }
 0x209   : > { %362 = vmin.xlane.f32.xlu2 %v361_v42 }
 0x20d   : > { %v356_v43 = vpop.xlane.xlu1 %355 }
 0x20e   : > { %vm358_vm7 = vcmp.eq.f32.partialorder %v350_v38, %v356_v43 }
 0x20f   : > { %v360_v44 = vsel %vm358_vm7, %v721_v27, 16.0 }
 0x210   : > { %v364_v45 = vsel %vm325_vm1, %v360_v44, inf }
 0x211   : > { %365 = vmin.xlane.f32.xlu0 %v364_v45 }
 0x27c   : > { %v363_v46 = vpop.xlane.xlu2 %362 }
 0x27d   : > { %vm372_vm8 = vcmp.eq.f32.partialorder %v721_v27, %v363_v46  ;;  %v586_v8 = vceil.f32 %v363_v46  ;;  %v587_v9 = vfloor.f32 %v363_v46  ;;  %vm585_vm2 = vcmp.lt.s32.totalorder %v363_v46, 0 }
 0x27e   : > { %v374_v47 = vsel %vm372_vm8, -inf, %v349_v35  ;;  %vm392_vm8 = vcmp.eq.s32.totalorder %v718_v26, 2 }
 0x27f   : > { %v376_v48 = vsel %vm325_vm1, %v374_v47, -inf  ;;  %v588_v13 = vsel %vm585_vm2, %v586_v8, %v587_v9 }
 0x280   : > { %377 = vmax.xlane.f32.xlu1 %v376_v48  ;;  %v589_v18 = vcvt.f32.s32 %v588_v13 }
 0x282   : > { %v370_v31 = vsel %vm367_vm5, %v589_v18, %v345_v28 }
 0x284   : > { %v743_v49 = vpop.xlane.xlu0 %365 }
 0x285   : > { %vm373_vm9 = vcmp.eq.f32.partialorder %v721_v27, %v743_v49  ;;  %v591_v19 = vceil.f32 %v743_v49  ;;  %v592_v20 = vfloor.f32 %v743_v49  ;;  %vm590_vm7 = vcmp.lt.s32.totalorder %v743_v49, 0 }
 0x286   : > { %v375_v50 = vsel %vm373_vm9, -inf, %v350_v38 }
 0x287   : > { %v379_v51 = vsel %vm325_vm1, %v375_v50, -inf  ;;  %v593_v33 = vsel %vm590_vm7, %v591_v19, %v592_v20 }
 0x288   : > { %380 = vmax.xlane.f32.xlu2 %v379_v51 }
 0x2f3   : > { %v378_v52 = vpop.xlane.xlu1 %377 }
 0x2f4   : > { %vm382_vm10 = vcmp.eq.f32.partialorder %v374_v47, %v378_v52 }
 0x2f5   : > { %v384_v53 = vsel %vm382_vm10, %v721_v27, 16.0  ;;  %vm417_vm10 = vcmp.eq.s32.totalorder %v718_v26, 3 }
 0x2f6   : > { %v386_v54 = vsel %vm325_vm1, %v384_v53, inf }
 0x2f7   : > { %387 = vmin.xlane.f32.xlu0 %v386_v54 }
 0x2fb   : > { %v381_v55 = vpop.xlane.xlu2 %380 }
 0x2fc   : > { %vm383_vm11 = vcmp.eq.f32.partialorder %v375_v50, %v381_v55 }
 0x2fd   : > { %v385_v56 = vsel %vm383_vm11, %v721_v27, 16.0  ;;  %vm422_vm11 = vcmask 31744  }
 0x2fe   : > { %v389_v57 = vsel %vm325_vm1, %v385_v56, inf }
 0x2ff   : > { %390 = vmin.xlane.f32.xlu1 %v389_v57 }
 0x36a   : > { %v388_v58 = vpop.xlane.xlu0 %387 }
 0x36b   : > { %vm397_vm12 = vcmp.eq.f32.partialorder %v721_v27, %v388_v58  ;;  %v596_v10 = vceil.f32 %v388_v58  ;;  %v597_v11 = vfloor.f32 %v388_v58  ;;  %vm595_vm3 = vcmp.lt.s32.totalorder %v388_v58, 0 }
 0x36c   : > { %v399_v59 = vsel %vm397_vm12, -inf, %v374_v47 }
 0x36d   : > { %v401_v60 = vsel %vm325_vm1, %v399_v59, -inf  ;;  %v598_v14 = vsel %vm595_vm3, %v596_v10, %v597_v11 }
 0x36e   : > { %402 = vmax.xlane.f32.xlu2 %v401_v60  ;;  %v599_v22 = vcvt.f32.s32 %v598_v14 }
 0x370   : > { %v395_v34 = vsel %vm392_vm8, %v599_v22, %v370_v31 }
 0x372   : > { %v391_v61 = vpop.xlane.xlu1 %390 }
 0x373   : > { %vm398_vm13 = vcmp.eq.f32.partialorder %v721_v27, %v391_v61  ;;  %v601_v25 = vceil.f32 %v391_v61  ;;  %vm600_vm9 = vcmp.lt.s32.totalorder %v391_v61, 0 }
 0x374   : > { %v400_v62 = vsel %vm398_vm13, -inf, %v375_v50 }
 0x375   : > { %v404_v63 = vsel %vm325_vm1, %v400_v62, -inf }
 0x376   : > { %405 = vmax.xlane.f32.xlu0 %v404_v63 }
 0x3e1   : > { %v403_v0 = vpop.xlane.xlu2 %402 }
 0x3e2   : > { %vm407_vm14 = vcmp.eq.f32.partialorder %v399_v59, %v403_v0 }
 0x3e3   : > { %v409_v1 = vsel %vm407_vm14, %v721_v27, 16.0 }
 0x3e4   : > { %v411_v2 = vsel %vm325_vm1, %v409_v1, inf }
 0x3e5   : > { %412 = vmin.xlane.f32.xlu1 %v411_v2 }
 0x3e9   : > { %v406_v3 = vpop.xlane.xlu0 %405 }
 0x3ea   : > { %vm408_vm15 = vcmp.eq.f32.partialorder %v400_v62, %v406_v3 }
 0x3eb   : > { %v410_v4 = vsel %vm408_vm15, %v721_v27, 16.0  ;;  %v602_v27 = vfloor.f32 %v391_v61 }
 0x3ec   : > { %v414_v5 = vsel %vm325_vm1, %v410_v4, inf  ;;  %vm580_vm1 = vcmp.lt.s32.totalorder %v732_v37, 0  ;;  %v594_v37 = vcvt.f32.s32 %v593_v33 }
 0x3ed   : > { %415 = vmin.xlane.f32.xlu2 %v414_v5  ;;  %v583_v30 = vsel %vm580_vm1, %v581_v16, %v582_v17  ;;  %v603_v35 = vsel %vm600_vm9, %v601_v25, %v602_v27 }
 0x3ee   : > { %v584_v38 = vcvt.f32.s32 %v583_v30  ;;  %v604_v40 = vcvt.f32.s32 %v603_v35 }
 0x3f0   : > { %v346_v43 = vsel %vm342_vm4, %v584_v38, 0 }
 0x3f1   : > { %v371_v45 = vsel %vm367_vm5, %v594_v37, %v346_v43 }
 0x3f2   : > { %v396_v47 = vsel %vm392_vm8, %v604_v40, %v371_v45 }
 0x458   : > { %v413_v21 = vpop.xlane.xlu1 %412 }
 0x459   : > { %vm605_vm6 = vcmp.lt.s32.totalorder %v413_v21, 0  ;;  %v606_v23 = vceil.f32 %v413_v21  ;;  %v607_v24 = vfloor.f32 %v413_v21 }
 0x45b   : > { %v608_v29 = vsel %vm605_vm6, %v606_v23, %v607_v24 }
 0x45c   : > { %v609_v32 = vcvt.f32.s32 %v608_v29 }
 0x45e   : > { %v420_v36 = vsel %vm417_vm10, %v609_v32, %v395_v34 }
 0x45f   : > { %423 = vst.msk [vmem:[%s242_s30] sm:$0xff] %vm422_vm11, %v420_v36 }
 0x460   : > { %v416_v39 = vpop.xlane.xlu2 %415 }
 0x461   : > { %vm610_vm12 = vcmp.lt.s32.totalorder %v416_v39, 0  ;;  %v611_v41 = vceil.f32 %v416_v39  ;;  %v612_v42 = vfloor.f32 %v416_v39 }
 0x463   : > { %v613_v44 = vsel %vm610_vm12, %v611_v41, %v612_v42 }
 0x464   : > { %v614_v46 = vcvt.f32.s32 %v613_v44 }
 0x466   : > { %v421_v48 = vsel %vm417_vm10, %v614_v46, %v396_v47 }
 0x467   : > { %424 = vst.msk [vmem:[%s242_s30 + $0x8] sm:$0xff] %vm422_vm11, %v421_v48 }
 0x468 PF: > { %s13_s14 = sadd.s32 1, %s662_s14   ;;  %s810_s12 = smov %s658_s13 }
 0x469   : > { %p10_p5 = scmp.ge.s32.totalorder %s13_s14, 4   ;;  %s811_s13 = smov %s813_s15 }
 0x46b   :  { %12 = sbr.rel (!%p10_p5) target bundleno = 2 (0x2), region = 68 }

// kernel: dgcnn_cls_encoder.13
= control target key start
LH: loop header
LB: loop body
LE: loop exit
PB: predicated region body
PF: predicated region fallthrough
CT: control target
= control target key end

     0   :  { %s792_s18 = smov 0   ;;  %s794_s19 = smov 0   ;;  %s876_s0 = inlined_call_operand.vmem [shape: bf16[2,4,16,64], index: 0, kind: input, shape index: {}]   ;;  %s877_s1 = inlined_call_operand.vmem [shape: bf16[2,16,64], index: 1, kind: input, shape index: {}]   ;;  %s878_s2 = inlined_call_operand.vmem [shape: bf16[64,64], index: 2, kind: input, shape index: {}]   ;;  %s879_s3 = inlined_call_operand.vmem [shape: bf16[64,64], index: 3, kind: input, shape index: {}]   ;;  %s880_s4 = inlined_call_operand.vmem [shape: f32[1,64], index: 4, kind: input, shape index: {}]   ;;  %s881_s5 = inlined_call_operand.vmem [shape: bf16[2,16,64], index: 5, kind: output, shape index: {}]  }
   0x1   :  { %s796_s20 = smov 0  }
   0x2 LB: > { %s27_s21 = sadd.s32 1, %s756_s19  ;;  %p623_p0 = scmp.ge.s32.totalorder %s760_s20, 1  ;;  %s760_s20 = sphi %s796_s20, %s15_s20   ;;  %s756_s19 = sphi %s794_s19, %s883_s19   ;;  %s752_s18 = sphi %s792_s18, %s882_s18  }
   0x3   : > { %p29_p1 = scmp.ge.s32.totalorder %s27_s21, 2  ;;  %p225_p2 = scmp.lt.s32.totalorder %s760_s20, 3 }
   0x5   : > { %s885_s21 = smov (%p29_p1, %s27_s21), 0  ;;  %p226_p3 = pnand %p623_p0, %p225_p2 }
   0x6   : > { %p271_p4 = scmp.lt.s32.totalorder (!%p226_p3), %s752_s18, 1 }
   0x7   : > { %229 = sbr.rel (%p226_p3) target bundleno = 197 (0xc5), region = 40 }
   0xc   : > { %v704_v0 = vld [vmem:[%s878_s2 + $0x18] sm:$0xff]  ;;  %v703_v2 = vld [vmem:[%s878_s2 + $0x10] sm:$0xff]  ;;  %s887_s18 = smov (!%p271_p4, %s752_s18), 1  ;;  %v702_v4 = vld [vmem:[%s878_s2 + $0x8] sm:$0xff]  ;;  %vm344_vm0 = vcmask 523264   ;;  %vm511_vm8 = vcmask 519168  }
   0xd   : > { %v696_v1 = vld [vmem:[%s879_s3 + $0x18] sm:$0xff]  ;;  %706 = vmatpush.bf16.msra.mxu3 %v704_v0  ;;  %v695_v3 = vld [vmem:[%s879_s3 + $0x10] sm:$0xff]  ;;  %438 = vmatpush.bf16.msra.mxu1 %v704_v0  ;;  %v694_v5 = vld [vmem:[%s879_s3 + $0x8] sm:$0xff]  ;;  %s689_s9 = sshll.u32 %s887_s18, 5  ;;  %s690_s10 = sshll.u32 %s887_s18, 3 }
   0xe   : > { %352 = vmatpush.bf16.msra.mxu0 %v696_v1  ;;  %705 = vmatpush.bf16.msra.mxu2 %v704_v0  ;;  %v701_v6 = vld [vmem:[%s878_s2] sm:$0xff]  ;;  %s278_s15 = scalar_lea.vmem %s876_s0, %s689_s9  ;;  %s288_s24 = scalar_lea.vmem %s877_s1, %s690_s10 }
   0xf   : > { %v693_v7 = vld [vmem:[%s879_s3] sm:$0xff]  ;;  %v699_v8 = vld [vmem:[%s278_s15 + $0x10] sm:$0xff]  ;;  %v698_v11 = vld [vmem:[%s278_s15 + $0x8] sm:$0xff]  ;;  %s298_s29 = scalar_lea.vmem %s881_s5, %s690_s10 }
  0x10   : > { %v692_v9 = vld [vmem:[%s288_s24] sm:$0xff]  ;;  %v700_v12 = vld [vmem:[%s278_s15 + $0x18] sm:$0xff] }
  0x11   : > { %708 = vmatpush.bf16.msra.mxu3 %v703_v2  ;;  %439 = vmatpush.bf16.msra.mxu1 %v703_v2  ;;  %v697_v10 = vld [vmem:[%s278_s15] sm:$0xff] }
  0x12   : > { %353 = vmatpush.bf16.msra.mxu0 %v695_v3  ;;  %707 = vmatpush.bf16.msra.mxu2 %v703_v2  ;;  %v737_v13 = vld [vmem:[%s880_s4] ss:$0 sm:$0xff] }
  0x15   : > { %710 = vmatpush.bf16.msra.mxu3 %v702_v4  ;;  %440 = vmatpush.bf16.msra.mxu1 %v702_v4 }
  0x16   : > { %354 = vmatpush.bf16.msra.mxu0 %v694_v5  ;;  %709 = vmatpush.bf16.msra.mxu2 %v702_v4 }
  0x19   : > { %712 = vmatpush.bf16.msra.mxu3 %v701_v6  ;;  %441 = vmatpush.bf16.msra.mxu1 %v701_v6 }
  0x1a   : > { %355 = vmatpush.bf16.msra.mxu0 %v693_v7  ;;  %711 = vmatpush.bf16.msra.mxu2 %v701_v6 }
  0x1c   : > { %685 = vmatmul.msk.bf16.vlgmr.msra.gmra.mxu3 %vm344_vm0, %v699_v8  ;;  %683 = vmatmul.msk.bf16.vlgmr.msra.gmra.mxu1 %vm344_vm0, %v697_v10 }
  0x1d   : > { %650 = vmatmul.msk.bf16.vlgmr.msra.gmra.mxu0 %vm344_vm0, %v692_v9  ;;  %684 = vmatmul.msk.bf16.vlgmr.msra.gmra.mxu2 %vm344_vm0, %v698_v11 }
  0x2c   : > { %686 = vmatmul.msk.bf16.gmra.mxu3 %vm344_vm0, %v700_v12 }
  0x99   : > { %v443_v17 = vpop.f32.mrf.mxu1 }
  0x9a   : > { %v357_v14 = vpop.f32.mrf.mxu0 }
  0x9b   : > { %v358_v16 = vadd.f32 %v737_v13, %v357_v14 }
  0x9d   : > { %v463_v19 = vadd.f32 %v443_v17, %v358_v16 }
  0x9f   : > { %v453_v15 = vpop.f32.mrf.mxu3  ;;  %v479_v24 = vmul.f32 0.2, %v463_v19  ;;  %vm471_vm1 = vcmp.gt.f32.partialorder %v463_v19, 0.0 }
  0xa0   : > { %v448_v18 = vpop.f32.mrf.mxu2  ;;  %v467_v21 = vadd.f32 %v453_v15, %v358_v16 }
  0xa1   : > { %v465_v23 = vadd.f32 %v448_v18, %v358_v16  ;;  %v445_v27 = vpop.f32.mrf.mxu1  ;;  %v487_v29 = vsel %vm471_vm1, %v463_v19, %v479_v24 }
  0xa2   : > { %v359_v22 = vpop.f32.mrf.mxu0  ;;  %v483_v25 = vmul.f32 0.2, %v467_v21  ;;  %vm475_vm2 = vcmp.gt.f32.partialorder %v467_v21, 0.0  ;;  %v495_v39 = vsel %vm344_vm0, %v487_v29, -inf }
  0xa3   : > { %v360_v26 = vadd.f32 %v737_v13, %v359_v22  ;;  %v481_v28 = vmul.f32 0.2, %v465_v23  ;;  %vm473_vm3 = vcmp.gt.f32.partialorder %v465_v23, 0.0 }
  0xa4   : > { %v491_v32 = vsel %vm475_vm2, %v467_v21, %v483_v25 }
  0xa5   : > { %v464_v33 = vadd.f32 %v445_v27, %v360_v26  ;;  %v489_v36 = vsel %vm473_vm3, %v465_v23, %v481_v28  ;;  %v497_v40 = vsel %vm344_vm0, %v491_v32, -inf }
  0xa6   : > { %v496_v44 = vsel %vm344_vm0, %v489_v36, -inf  ;;  %v498_v46 = vmax.f32 %v495_v39, %v497_v40 }
  0xa7   : > { %v455_v20 = vpop.f32.mrf.mxu3  ;;  %v480_v41 = vmul.f32 0.2, %v464_v33  ;;  %vm472_vm5 = vcmp.gt.f32.partialorder %v464_v33, 0.0 }
  0xa8   : > { %v450_v30 = vpop.f32.mrf.mxu2  ;;  %v468_v34 = vadd.f32 %v455_v20, %v360_v26 }
  0xa9   : > { %v466_v37 = vadd.f32 %v450_v30, %v360_v26  ;;  %v488_v50 = vsel %vm472_vm5, %v464_v33, %v480_v41 }
  0xaa   : > { %v484_v42 = vmul.f32 0.2, %v468_v34  ;;  %vm476_vm6 = vcmp.gt.f32.partialorder %v468_v34, 0.0  ;;  %v502_v57 = vsel %vm344_vm0, %v488_v50, -inf }
  0xab   : > { %v482_v47 = vmul.f32 0.2, %v466_v37  ;;  %vm474_vm7 = vcmp.gt.f32.partialorder %v466_v37, 0.0 }
  0xac   : > { %v492_v51 = vsel %vm476_vm6, %v468_v34, %v484_v42 }
  0xad   : > { %v490_v54 = vsel %vm474_vm7, %v466_v37, %v482_v47  ;;  %v504_v58 = vsel %vm344_vm0, %v492_v51, -inf }
  0xae   : > { %v503_v60 = vsel %vm344_vm0, %v490_v54, -inf  ;;  %v505_v62 = vmax.f32 %v502_v57, %v504_v58 }
  0xaf   : > { %v458_v31 = vpop.f32.mrf.mxu3 }
  0xb0   : > { %v469_v35 = vadd.f32 %v458_v31, %v358_v16 }
  0xb2   : > { %vm477_vm4 = vcmp.gt.f32.partialorder %v469_v35, 0.0  ;;  %v485_v38 = vmul.f32 0.2, %v469_v35 }
  0xb4   : > { %v493_v43 = vsel %vm477_vm4, %v469_v35, %v485_v38 }
  0xb5   : > { %v499_v45 = vsel %vm344_vm0, %v493_v43, -inf }
  0xb6   : > { %v500_v48 = vmax.f32 %v496_v44, %v499_v45 }
  0xb7   : > { %v460_v49 = vpop.f32.mrf.mxu3 }
  0xb8   : > { %v501_v52 = vmax.f32 %v498_v46, %v500_v48  ;;  %v470_v53 = vadd.f32 %v460_v49, %v360_v26 }
  0xba   : > { %v509_v55 = vpack.c.bf16 %v501_v52, %v501_v52  ;;  %vm478_vm9 = vcmp.gt.f32.partialorder %v470_v53, 0.0  ;;  %v486_v56 = vmul.f32 0.2, %v470_v53 }
  0xbc   : > { %512 = vst.msk [vmem:[%s298_s29] sm:$0xf] %vm511_vm8, %v509_v55  ;;  %v494_v59 = vsel %vm478_vm9, %v470_v53, %v486_v56 }
  0xbd   : > { %v506_v61 = vsel %vm344_vm0, %v494_v59, -inf }
  0xbe   : > { %v507_v63 = vmax.f32 %v503_v60, %v506_v61 }
  0xc0   : > { %v508_v0 = vmax.f32 %v505_v62, %v507_v63 }
  0xc2   : > { %v510_v1 = vpack.c.bf16 %v508_v0, %v508_v0 }
  0xc4   : > { %513 = vst.msk [vmem:[%s298_s29 + $0x4] sm:$0xf] %vm511_vm8, %v510_v1 }
  0xc5 PF: > { %s15_s20 = sadd.s32 1, %s760_s20   ;;  %s882_s18 = smov %s756_s19 }
  0xc6   : > { %p12_p5 = scmp.ge.s32.totalorder %s15_s20, 4   ;;  %s883_s19 = smov %s885_s21 }
  0xc8   :  { %14 = sbr.rel (!%p12_p5) target bundleno = 2 (0x2), region = 73 }

// kernel: dgcnn_cls_encoder.15
= control target key start
LH: loop header
LB: loop body
LE: loop exit
PB: predicated region body
PF: predicated region fallthrough
CT: control target
= control target key end

     0   :  { %s788_s18 = smov 0   ;;  %s790_s19 = smov 0   ;;  %s859_s0 = inlined_call_operand.vmem [shape: bf16[2,4,16,64], index: 0, kind: input, shape index: {}]   ;;  %s860_s1 = inlined_call_operand.vmem [shape: bf16[2,16,64], index: 1, kind: input, shape index: {}]   ;;  %s861_s2 = inlined_call_operand.vmem [shape: bf16[64,128], index: 2, kind: input, shape index: {}]   ;;  %s862_s3 = inlined_call_operand.vmem [shape: bf16[64,128], index: 3, kind: input, shape index: {}]   ;;  %s863_s4 = inlined_call_operand.vmem [shape: f32[1,128], index: 4, kind: input, shape index: {}]   ;;  %s864_s5 = inlined_call_operand.vmem [shape: bf16[2,16,128], index: 5, kind: output, shape index: {}]  }
   0x1   :  { %s792_s20 = smov 0  }
   0x2 LB: > { %s27_s21 = sadd.s32 1, %s752_s19  ;;  %p614_p0 = scmp.ge.s32.totalorder %s756_s20, 1  ;;  %s756_s20 = sphi %s792_s20, %s15_s20   ;;  %s752_s19 = sphi %s790_s19, %s866_s19   ;;  %s748_s18 = sphi %s788_s18, %s865_s18  }
   0x3   : > { %p29_p1 = scmp.ge.s32.totalorder %s27_s21, 2  ;;  %p225_p2 = scmp.lt.s32.totalorder %s756_s20, 3 }
   0x5   : > { %s868_s21 = smov (%p29_p1, %s27_s21), 0  ;;  %p226_p3 = pnand %p614_p0, %p225_p2 }
   0x6   : > { %p271_p4 = scmp.lt.s32.totalorder (!%p226_p3), %s748_s18, 1 }
   0x7   : > { %229 = sbr.rel (%p226_p3) target bundleno = 196 (0xc4), region = 40 }
   0xc   : > { %v695_v0 = vld [vmem:[%s861_s2 + $0x18] sm:$0xff]  ;;  %v694_v2 = vld [vmem:[%s861_s2 + $0x10] sm:$0xff]  ;;  %s870_s18 = smov (!%p271_p4, %s748_s18), 1  ;;  %v693_v4 = vld [vmem:[%s861_s2 + $0x8] sm:$0xff]  ;;  %vm344_vm0 = vcmask 523264  }
   0xd   : > { %v687_v1 = vld [vmem:[%s862_s3 + $0x18] sm:$0xff]  ;;  %702 = vmatpush.bf16.msra.mxu3 %v695_v0  ;;  %v686_v3 = vld [vmem:[%s862_s3 + $0x10] sm:$0xff]  ;;  %438 = vmatpush.bf16.msra.mxu1 %v695_v0  ;;  %v685_v5 = vld [vmem:[%s862_s3 + $0x8] sm:$0xff]  ;;  %s680_s9 = sshll.u32 %s870_s18, 5  ;;  %s681_s10 = sshll.u32 %s870_s18, 3 }
   0xe   : > { %352 = vmatpush.bf16.msra.mxu0 %v687_v1  ;;  %701 = vmatpush.bf16.msra.mxu2 %v695_v0  ;;  %v692_v6 = vld [vmem:[%s861_s2] sm:$0xff]  ;;  %s278_s15 = scalar_lea.vmem %s859_s0, %s680_s9  ;;  %s288_s24 = scalar_lea.vmem %s860_s1, %s681_s10 }
   0xf   : > { %v684_v7 = vld [vmem:[%s862_s3] sm:$0xff]  ;;  %v690_v8 = vld [vmem:[%s278_s15 + $0x10] sm:$0xff]  ;;  %v689_v11 = vld [vmem:[%s278_s15 + $0x8] sm:$0xff]  ;;  %s298_s29 = scalar_lea.vmem %s864_s5, %s681_s10 }
  0x10   : > { %v683_v9 = vld [vmem:[%s288_s24] sm:$0xff]  ;;  %v691_v12 = vld [vmem:[%s278_s15 + $0x18] sm:$0xff] }
  0x11   : > { %704 = vmatpush.bf16.msra.mxu3 %v694_v2  ;;  %439 = vmatpush.bf16.msra.mxu1 %v694_v2  ;;  %v688_v10 = vld [vmem:[%s278_s15] sm:$0xff] }
  0x12   : > { %353 = vmatpush.bf16.msra.mxu0 %v686_v3  ;;  %703 = vmatpush.bf16.msra.mxu2 %v694_v2  ;;  %v733_v18 = vld [vmem:[%s863_s4] ss:$0 sm:$0xff] }
  0x15   : > { %706 = vmatpush.bf16.msra.mxu3 %v693_v4  ;;  %440 = vmatpush.bf16.msra.mxu1 %v693_v4 }
  0x16   : > { %354 = vmatpush.bf16.msra.mxu0 %v685_v5  ;;  %705 = vmatpush.bf16.msra.mxu2 %v693_v4 }
  0x19   : > { %708 = vmatpush.bf16.msra.mxu3 %v692_v6  ;;  %441 = vmatpush.bf16.msra.mxu1 %v692_v6 }
  0x1a   : > { %355 = vmatpush.bf16.msra.mxu0 %v684_v7  ;;  %707 = vmatpush.bf16.msra.mxu2 %v692_v6 }
  0x1c   : > { %676 = vmatmul.msk.bf16.vlgmr.msra.gmra.mxu3 %vm344_vm0, %v690_v8  ;;  %674 = vmatmul.msk.bf16.vlgmr.msra.gmra.mxu1 %vm344_vm0, %v688_v10 }
  0x1d   : > { %641 = vmatmul.msk.bf16.vlgmr.msra.gmra.mxu0 %vm344_vm0, %v683_v9  ;;  %675 = vmatmul.msk.bf16.vlgmr.msra.gmra.mxu2 %vm344_vm0, %v689_v11 }
  0x2c   : > { %677 = vmatmul.msk.bf16.gmra.mxu3 %vm344_vm0, %v691_v12 }
  0x99   : > { %v443_v15 = vpop.f32.mrf.mxu1 }
  0x9a   : > { %v357_v14 = vpop.f32.mrf.mxu0 }
  0x9b   : > { %v358_v20 = vadd.f32 %v733_v18, %v357_v14 }
  0x9d   : > { %v463_v24 = vadd.f32 %v443_v15, %v358_v20 }
  0x9f   : > { %v453_v13 = vpop.f32.mrf.mxu3  ;;  %v479_v31 = vmul.f32 0.2, %v463_v24  ;;  %vm471_vm1 = vcmp.gt.f32.partialorder %v463_v24, 0.0 }
  0xa0   : > { %v448_v16 = vpop.f32.mrf.mxu2  ;;  %v467_v26 = vadd.f32 %v453_v13, %v358_v20 }
  0xa1   : > { %v445_v22 = vpop.f32.mrf.mxu1  ;;  %v465_v27 = vadd.f32 %v448_v16, %v358_v20  ;;  %v487_v42 = vsel %vm471_vm1, %v463_v24, %v479_v31 }
  0xa2   : > { %v359_v19 = vpop.f32.mrf.mxu0  ;;  %v483_v34 = vmul.f32 0.2, %v467_v26  ;;  %vm475_vm3 = vcmp.gt.f32.partialorder %v467_v26, 0.0 }
  0xa3   : > { %v360_v21 = vadd.f32 %v733_v18, %v359_v19  ;;  %v481_v35 = vmul.f32 0.2, %v465_v27  ;;  %vm473_vm4 = vcmp.gt.f32.partialorder %v465_v27, 0.0 }
  0xa4   : > { %v491_v43 = vsel %vm475_vm3, %v467_v26, %v483_v34 }
  0xa5   : > { %v464_v29 = vadd.f32 %v445_v22, %v360_v21  ;;  %v489_v44 = vsel %vm473_vm4, %v465_v27, %v481_v35  ;;  %v495_v51 = vmax.f32 %v487_v42, %v491_v43 }
  0xa7   : > { %v455_v17 = vpop.f32.mrf.mxu3  ;;  %v480_v36 = vmul.f32 0.2, %v464_v29  ;;  %vm472_vm5 = vcmp.gt.f32.partialorder %v464_v29, 0.0 }
  0xa8   : > { %v450_v28 = vpop.f32.mrf.mxu2  ;;  %v468_v30 = vadd.f32 %v455_v17, %v360_v21 }
  0xa9   : > { %v466_v32 = vadd.f32 %v450_v28, %v360_v21  ;;  %v488_v45 = vsel %vm472_vm5, %v464_v29, %v480_v36 }
  0xaa   : > { %v484_v37 = vmul.f32 0.2, %v468_v30  ;;  %vm476_vm6 = vcmp.gt.f32.partialorder %v468_v30, 0.0 }
  0xab   : > { %v482_v39 = vmul.f32 0.2, %v466_v32  ;;  %vm474_vm7 = vcmp.gt.f32.partialorder %v466_v32, 0.0 }
  0xac   : > { %v492_v46 = vsel %vm476_vm6, %v468_v30, %v484_v37 }
  0xad   : > { %v490_v49 = vsel %vm474_vm7, %v466_v32, %v482_v39  ;;  %v498_v52 = vmax.f32 %v488_v45, %v492_v46 }
  0xaf   : > { %v458_v23 = vpop.f32.mrf.mxu3 }
  0xb0   : > { %v469_v25 = vadd.f32 %v458_v23, %v358_v20 }
  0xb2   : > { %v485_v33 = vmul.f32 0.2, %v469_v25  ;;  %vm477_vm2 = vcmp.gt.f32.partialorder %v469_v25, 0.0 }
  0xb4   : > { %v493_v40 = vsel %vm477_vm2, %v469_v25, %v485_v33 }
  0xb5   : > { %v496_v48 = vmax.f32 %v489_v44, %v493_v40 }
  0xb7   : > { %v460_v38 = vpop.f32.mrf.mxu3  ;;  %v497_v54 = vmax.f32 %v495_v51, %v496_v48 }
  0xb8   : > { %v470_v41 = vadd.f32 %v460_v38, %v360_v21 }
  0xba   : > { %vm478_vm8 = vcmp.gt.f32.partialorder %v470_v41, 0.0  ;;  %v486_v47 = vmul.f32 0.2, %v470_v41 }
  0xbc   : > { %v494_v50 = vsel %vm478_vm8, %v470_v41, %v486_v47 }
  0xbd   : > { %v499_v53 = vmax.f32 %v490_v49, %v494_v50 }
  0xbf   : > { %v500_v55 = vmax.f32 %v498_v52, %v499_v53 }
  0xc1   : > { %v699_v56 = vpack.c.bf16 %v500_v55, %v497_v54 }
  0xc3   : > { %700 = vst [vmem:[%s298_s29] sm:$0xff] %v699_v56  }
  0xc4 PF: > { %s15_s20 = sadd.s32 1, %s756_s20   ;;  %s865_s18 = smov %s752_s19 }
  0xc5   : > { %p12_p5 = scmp.ge.s32.totalorder %s15_s20, 4   ;;  %s866_s19 = smov %s868_s21 }
  0xc7   :  { %14 = sbr.rel (!%p12_p5) target bundleno = 2 (0x2), region = 73 }

// kernel: dgcnn_cls_encoder.16
= control target key start
LH: loop header
LB: loop body
LE: loop exit
PB: predicated region body
PF: predicated region fallthrough
CT: control target
= control target key end

     0   :  { %s729_s12 = smov 0   ;;  %s731_s13 = smov 0   ;;  %s851_s0 = inlined_call_operand.vmem [shape: bf16[2,16,128], index: 0, kind: input, shape index: {}]   ;;  %s852_s1 = inlined_call_operand.vmem [shape: bf16[2,128,16], index: 1, kind: input, shape index: {}]   ;;  %s853_s2 = inlined_call_operand.vmem [shape: f32[2,1,16], index: 2, kind: input, shape index: {}]   ;;  %s854_s3 = inlined_call_operand.vmem [shape: s32[2,16,4], index: 3, kind: output, shape index: {}]  }
   0x1   :  { %s733_s14 = smov 0  }
   0x2 LB: > { %s25_s15 = sadd.s32 1, %s703_s13  ;;  %p563_p0 = scmp.ge.s32.totalorder %s707_s14, 1  ;;  %s707_s14 = sphi %s733_s14, %s13_s14   ;;  %s703_s13 = sphi %s731_s13, %s856_s13   ;;  %s699_s12 = sphi %s729_s12, %s855_s12  }
   0x3   : > { %p27_p1 = scmp.ge.s32.totalorder %s25_s15, 2  ;;  %p176_p2 = scmp.lt.s32.totalorder %s707_s14, 3 }
   0x5   : > { %s858_s15 = smov (%p27_p1, %s25_s15), 0  ;;  %p177_p3 = pnand %p563_p0, %p176_p2 }
   0x6   : > { %p217_p4 = scmp.lt.s32.totalorder (!%p177_p3), %s699_s12, 1 }
   0x7   : > { %180 = sbr.rel (%p177_p3) target bundleno = 1144 (0x478), region = 32 }
   0xc   : > { %s860_s12 = smov (!%p217_p4, %s699_s12), 1  ;;  %vm351_vm0 = vcmask 130048   ;;  %v348_v27 = vlaneseq }
   0xd   : > { %s609_s16 = sshll.u32 %s860_s12, 6  ;;  %s608_s20 = sshll.u32 %s860_s12, 3 }
   0xe   : > { %s230_s19 = scalar_lea.vmem %s852_s1, %s609_s16  ;;  %s224_s23 = scalar_lea.vmem %s851_s0, %s608_s20  ;;  %v763_v28 = vand.u32 127, %v348_v27 }
   0xf   : > { %v619_v0 = vld [vmem:[%s230_s19 + $0x38] sm:$0xff]  ;;  %v618_v1 = vld [vmem:[%s230_s19 + $0x30] sm:$0xff]  ;;  %v244_v2 = vld [vmem:[%s224_s23] sm:$0xff]   ;;  %s233_s26 = scalar_lea.vmem %s853_s2, %s860_s12  ;;  %s610_s27 = sshll.u32 %s860_s12, 4 }
  0x10   : > { %316 = vmatpush.bf16.msra.mxu0 %v619_v0  ;;  %v330_v3 = vunpack.c.l.bf16 %v244_v2  ;;  %v617_v4 = vld [vmem:[%s230_s19 + $0x28] sm:$0xff]  ;;  %v331_v6 = vunpack.c.h.bf16 %v244_v2  ;;  %v616_v7 = vld [vmem:[%s230_s19 + $0x20] sm:$0xff]  ;;  %v615_v9 = vld [vmem:[%s230_s19 + $0x18] sm:$0xff]  ;;  %v766_v29 = vcvt.s32.f32 %v763_v28  ;;  %s242_s30 = scalar_lea.vmem %s854_s3, %s610_s27 }
  0x11   : > { %v614_v10 = vld [vmem:[%s230_s19 + $0x10] sm:$0xff]  ;;  %v613_v11 = vld [vmem:[%s230_s19 + $0x8] sm:$0xff]  ;;  %v612_v12 = vld [vmem:[%s230_s19] sm:$0xff] }
  0x12   : > { %v332_v5 = vmul.f32 %v330_v3, %v330_v3  ;;  %v333_v8 = vmul.f32 %v331_v6, %v331_v6  ;;  %v611_v13 = vld [vmem:[%s224_s23] sm:$0xff] }
  0x13   : > { %v684_v17 = vld [vmem:[%s233_s26] ss:$0 sm:$0xff] }
  0x14   : > { %317 = vmatpush.bf16.msra.mxu0 %v618_v1  ;;  %334 = vadd.xlane.f32.xlu0 %v332_v5 }
  0x18   : > { %318 = vmatpush.bf16.msra.mxu0 %v617_v4 }
  0x1c   : > { %319 = vmatpush.bf16.msra.mxu0 %v616_v7  ;;  %336 = vadd.xlane.f32.xlu0 %v333_v8 }
  0x20   : > { %320 = vmatpush.bf16.msra.mxu0 %v615_v9 }
  0x24   : > { %321 = vmatpush.bf16.msra.mxu0 %v614_v10 }
  0x28   : > { %322 = vmatpush.bf16.msra.mxu0 %v613_v11 }
  0x2c   : > { %323 = vmatpush.bf16.msra.mxu0 %v612_v12 }
  0x2f   : > { %324 = vmatmul.bf16.vlgmr.msra.gmra.mxu0 %v611_v13 }
  0x87   : > { %v335_v14 = vpop.xlane.xlu0 %334 }
  0x8f   : > { %v337_v22 = vpop.xlane.xlu0 %336 }
  0xac   : > { %v325_v15 = vpop.f32.mrf.mxu0 }
  0xad   : > { %v338_v16 = vmul.f32 2.0, %v325_v15 }
  0xaf   : > { %v340_v18 = vsub.f32 %v338_v16, %v335_v14 }
  0xb1   : > { %v346_v19 = vsub.f32 %v340_v18, %v684_v17 }
  0xb3   : > { %v352_v20 = vsel %vm351_vm0, %v346_v19, -inf }
  0xb4   : > { %v327_v21 = vpop.f32.mrf.mxu0  ;;  %353 = vmax.xlane.f32.xlu1 %v352_v20 }
  0xb5   : > { %v339_v23 = vmul.f32 2.0, %v327_v21 }
  0xb7   : > { %v341_v24 = vsub.f32 %v339_v23, %v337_v22 }
  0xb9   : > { %v347_v25 = vsub.f32 %v341_v24, %v684_v17 }
  0xbb   : > { %v355_v26 = vsel %vm351_vm0, %v347_v25, -inf }
  0xbc   : > { %356 = vmax.xlane.f32.xlu1 %v355_v26 }
 0x127   : > { %v354_v30 = vpop.xlane.xlu1 %353 }
 0x128   : > { %vm358_vm1 = vcmp.eq.f32.partialorder %v346_v19, %v354_v30 }
 0x129   : > { %v360_v31 = vsel %vm358_vm1, %v766_v29, 16.0 }
 0x12a   : > { %v362_v32 = vsel %vm351_vm0, %v360_v31, inf }
 0x12b   : > { %363 = vmin.xlane.f32.xlu2 %v362_v32 }
 0x12f   : > { %v357_v33 = vpop.xlane.xlu1 %356 }
 0x130   : > { %vm359_vm2 = vcmp.eq.f32.partialorder %v347_v25, %v357_v33 }
 0x131   : > { %v361_v34 = vsel %vm359_vm2, %v766_v29, 16.0 }
 0x132   : > { %v365_v35 = vsel %vm351_vm0, %v361_v34, inf }
 0x133   : > { %366 = vmin.xlane.f32.xlu2 %v365_v35 }
 0x19e   : > { %v772_v36 = vpop.xlane.xlu2 %363 }
 0x19f   : > { %vm373_vm3 = vcmp.eq.f32.partialorder %v766_v29, %v772_v36  ;;  %v621_v8 = vceil.f32 %v772_v36  ;;  %v622_v9 = vfloor.f32 %v772_v36  ;;  %vm620_vm15 = vcmp.lt.s32.totalorder %v772_v36, 0 }
 0x1a0   : > { %v375_v37 = vsel %vm373_vm3, -inf, %v346_v19  ;;  %vm368_vm3 = vcmp.eq.s32.totalorder %v763_v28, 0 }
 0x1a1   : > { %v377_v38 = vsel %vm351_vm0, %v375_v37, -inf  ;;  %v623_v14 = vsel %vm620_vm15, %v621_v8, %v622_v9 }
 0x1a2   : > { %378 = vmax.xlane.f32.xlu0 %v377_v38  ;;  %v624_v17 = vcvt.f32.s32 %v623_v14 }
 0x1a4   : > { %v371_v30 = vsel %vm368_vm3, %v624_v17, 0 }
 0x1a6   : > { %v777_v39 = vpop.xlane.xlu2 %366 }
 0x1a7   : > { %vm374_vm4 = vcmp.eq.f32.partialorder %v766_v29, %v777_v39  ;;  %v626_v18 = vceil.f32 %v777_v39  ;;  %v627_v19 = vfloor.f32 %v777_v39 }
 0x1a8   : > { %v376_v40 = vsel %vm374_vm4, -inf, %v347_v25  ;;  %vm393_vm4 = vcmp.eq.s32.totalorder %v763_v28, 1 }
 0x1a9   : > { %v380_v41 = vsel %vm351_vm0, %v376_v40, -inf }
 0x1aa   : > { %381 = vmax.xlane.f32.xlu1 %v380_v41 }
 0x215   : > { %v379_v42 = vpop.xlane.xlu0 %378 }
 0x216   : > { %vm383_vm5 = vcmp.eq.f32.partialorder %v375_v37, %v379_v42 }
 0x217   : > { %v385_v43 = vsel %vm383_vm5, %v766_v29, 16.0 }
 0x218   : > { %v387_v44 = vsel %vm351_vm0, %v385_v43, inf }
 0x219   : > { %388 = vmin.xlane.f32.xlu2 %v387_v44 }
 0x21d   : > { %v382_v45 = vpop.xlane.xlu1 %381 }
 0x21e   : > { %vm384_vm6 = vcmp.eq.f32.partialorder %v376_v40, %v382_v45 }
 0x21f   : > { %v386_v46 = vsel %vm384_vm6, %v766_v29, 16.0 }
 0x220   : > { %v390_v47 = vsel %vm351_vm0, %v386_v46, inf }
 0x221   : > { %391 = vmin.xlane.f32.xlu0 %v390_v47 }
 0x28c   : > { %v389_v48 = vpop.xlane.xlu2 %388 }
 0x28d   : > { %vm398_vm7 = vcmp.eq.f32.partialorder %v766_v29, %v389_v48  ;;  %v631_v10 = vceil.f32 %v389_v48  ;;  %v632_v11 = vfloor.f32 %v389_v48  ;;  %vm630_vm1 = vcmp.lt.s32.totalorder %v389_v48, 0 }
 0x28e   : > { %v400_v49 = vsel %vm398_vm7, -inf, %v375_v37  ;;  %vm418_vm7 = vcmp.eq.s32.totalorder %v763_v28, 2 }
 0x28f   : > { %v402_v50 = vsel %vm351_vm0, %v400_v49, -inf  ;;  %v633_v15 = vsel %vm630_vm1, %v631_v10, %v632_v11 }
 0x290   : > { %403 = vmax.xlane.f32.xlu1 %v402_v50  ;;  %v634_v20 = vcvt.f32.s32 %v633_v15 }
 0x292   : > { %v396_v33 = vsel %vm393_vm4, %v634_v20, %v371_v30 }
 0x294   : > { %v788_v51 = vpop.xlane.xlu0 %391 }
 0x295   : > { %vm399_vm8 = vcmp.eq.f32.partialorder %v766_v29, %v788_v51  ;;  %v636_v21 = vceil.f32 %v788_v51  ;;  %v637_v22 = vfloor.f32 %v788_v51  ;;  %vm635_vm6 = vcmp.lt.s32.totalorder %v788_v51, 0 }
 0x296   : > { %v401_v52 = vsel %vm399_vm8, -inf, %v376_v40 }
 0x297   : > { %v405_v53 = vsel %vm351_vm0, %v401_v52, -inf  ;;  %v638_v35 = vsel %vm635_vm6, %v636_v21, %v637_v22 }
 0x298   : > { %406 = vmax.xlane.f32.xlu2 %v405_v53 }
 0x303   : > { %v404_v54 = vpop.xlane.xlu1 %403 }
 0x304   : > { %vm408_vm9 = vcmp.eq.f32.partialorder %v400_v49, %v404_v54 }
 0x305   : > { %v410_v55 = vsel %vm408_vm9, %v766_v29, 16.0  ;;  %vm443_vm9 = vcmp.eq.s32.totalorder %v763_v28, 3 }
 0x306   : > { %v412_v56 = vsel %vm351_vm0, %v410_v55, inf }
 0x307   : > { %413 = vmin.xlane.f32.xlu0 %v412_v56 }
 0x30b   : > { %v407_v57 = vpop.xlane.xlu2 %406 }
 0x30c   : > { %vm409_vm10 = vcmp.eq.f32.partialorder %v401_v52, %v407_v57 }
 0x30d   : > { %v411_v58 = vsel %vm409_vm10, %v766_v29, 16.0  ;;  %vm448_vm10 = vcmask 31744  }
 0x30e   : > { %v415_v59 = vsel %vm351_vm0, %v411_v58, inf }
 0x30f   : > { %416 = vmin.xlane.f32.xlu1 %v415_v59 }
 0x37a   : > { %v414_v60 = vpop.xlane.xlu0 %413 }
 0x37b   : > { %vm423_vm11 = vcmp.eq.f32.partialorder %v766_v29, %v414_v60  ;;  %v641_v12 = vceil.f32 %v414_v60  ;;  %v642_v13 = vfloor.f32 %v414_v60  ;;  %vm640_vm2 = vcmp.lt.s32.totalorder %v414_v60, 0 }
 0x37c   : > { %v425_v61 = vsel %vm423_vm11, -inf, %v400_v49 }
 0x37d   : > { %v427_v62 = vsel %vm351_vm0, %v425_v61, -inf  ;;  %v643_v16 = vsel %vm640_vm2, %v641_v12, %v642_v13 }
 0x37e   : > { %428 = vmax.xlane.f32.xlu2 %v427_v62  ;;  %v644_v24 = vcvt.f32.s32 %v643_v16 }
 0x380   : > { %v421_v36 = vsel %vm418_vm7, %v644_v24, %v396_v33 }
 0x382   : > { %v417_v63 = vpop.xlane.xlu1 %416 }
 0x383   : > { %vm424_vm12 = vcmp.eq.f32.partialorder %v766_v29, %v417_v63  ;;  %v646_v27 = vceil.f32 %v417_v63  ;;  %vm645_vm8 = vcmp.lt.s32.totalorder %v417_v63, 0 }
 0x384   : > { %v426_v0 = vsel %vm424_vm12, -inf, %v401_v52 }
 0x385   : > { %v430_v1 = vsel %vm351_vm0, %v426_v0, -inf }
 0x386   : > { %431 = vmax.xlane.f32.xlu0 %v430_v1 }
 0x3f1   : > { %v429_v2 = vpop.xlane.xlu2 %428 }
 0x3f2   : > { %vm433_vm13 = vcmp.eq.f32.partialorder %v425_v61, %v429_v2 }
 0x3f3   : > { %v435_v3 = vsel %vm433_vm13, %v766_v29, 16.0 }
 0x3f4   : > { %v437_v4 = vsel %vm351_vm0, %v435_v3, inf }
 0x3f5   : > { %438 = vmin.xlane.f32.xlu1 %v437_v4 }
 0x3f9   : > { %v432_v5 = vpop.xlane.xlu0 %431 }
 0x3fa   : > { %vm434_vm14 = vcmp.eq.f32.partialorder %v426_v0, %v432_v5 }
 0x3fb   : > { %v436_v6 = vsel %vm434_vm14, %v766_v29, 16.0  ;;  %v647_v29 = vfloor.f32 %v417_v63 }
 0x3fc   : > { %v440_v7 = vsel %vm351_vm0, %v436_v6, inf  ;;  %vm625_vm0 = vcmp.lt.s32.totalorder %v777_v39, 0  ;;  %v639_v39 = vcvt.f32.s32 %v638_v35 }
 0x3fd   : > { %441 = vmin.xlane.f32.xlu2 %v440_v7  ;;  %v628_v32 = vsel %vm625_vm0, %v626_v18, %v627_v19  ;;  %v648_v37 = vsel %vm645_vm8, %v646_v27, %v647_v29 }
 0x3fe   : > { %v629_v40 = vcvt.f32.s32 %v628_v32  ;;  %v649_v42 = vcvt.f32.s32 %v648_v37 }
 0x400   : > { %v372_v45 = vsel %vm368_vm3, %v629_v40, 0 }
 0x401   : > { %v397_v47 = vsel %vm393_vm4, %v639_v39, %v372_v45 }
 0x402   : > { %v422_v49 = vsel %vm418_vm7, %v649_v42, %v397_v47 }
 0x468   : > { %v439_v23 = vpop.xlane.xlu1 %438 }
 0x469   : > { %vm650_vm5 = vcmp.lt.s32.totalorder %v439_v23, 0  ;;  %v651_v25 = vceil.f32 %v439_v23  ;;  %v652_v26 = vfloor.f32 %v439_v23 }
 0x46b   : > { %v653_v31 = vsel %vm650_vm5, %v651_v25, %v652_v26 }
 0x46c   : > { %v654_v34 = vcvt.f32.s32 %v653_v31 }
 0x46e   : > { %v446_v38 = vsel %vm443_vm9, %v654_v34, %v421_v36 }
 0x46f   : > { %449 = vst.msk [vmem:[%s242_s30] sm:$0xff] %vm448_vm10, %v446_v38 }
 0x470   : > { %v442_v41 = vpop.xlane.xlu2 %441 }
 0x471   : > { %vm655_vm11 = vcmp.lt.s32.totalorder %v442_v41, 0  ;;  %v656_v43 = vceil.f32 %v442_v41  ;;  %v657_v44 = vfloor.f32 %v442_v41 }
 0x473   : > { %v658_v46 = vsel %vm655_vm11, %v656_v43, %v657_v44 }
 0x474   : > { %v659_v48 = vcvt.f32.s32 %v658_v46 }
 0x476   : > { %v447_v50 = vsel %vm443_vm9, %v659_v48, %v422_v49 }
 0x477   : > { %450 = vst.msk [vmem:[%s242_s30 + $0x8] sm:$0xff] %vm448_vm10, %v447_v50 }
 0x478 PF: > { %s13_s14 = sadd.s32 1, %s707_s14   ;;  %s855_s12 = smov %s703_s13 }
 0x479   : > { %p10_p5 = scmp.ge.s32.totalorder %s13_s14, 4   ;;  %s856_s13 = smov %s858_s15 }
 0x47b   :  { %12 = sbr.rel (!%p10_p5) target bundleno = 2 (0x2), region = 68 }

// kernel: dgcnn_cls_encoder.17
= control target key start
LH: loop header
LB: loop body
LE: loop exit
PB: predicated region body
PF: predicated region fallthrough
CT: control target
= control target key end

     0   :  { %s1112_s18 = smov 0   ;;  %s1114_s19 = smov 0   ;;  %s1411_s0 = inlined_call_operand.vmem [shape: bf16[2,4,16,128], index: 0, kind: input, shape index: {}]   ;;  %s1412_s1 = inlined_call_operand.vmem [shape: bf16[2,16,128], index: 1, kind: input, shape index: {}]   ;;  %s1413_s2 = inlined_call_operand.vmem [shape: bf16[128,256], index: 2, kind: input, shape index: {}]   ;;  %s1414_s3 = inlined_call_operand.vmem [shape: bf16[128,256], index: 3, kind: input, shape index: {}]   ;;  %s1415_s4 = inlined_call_operand.vmem [shape: f32[1,256], index: 4, kind: input, shape index: {}]   ;;  %s1416_s5 = inlined_call_operand.vmem [shape: bf16[2,16,256], index: 5, kind: output, shape index: {}]  }
   0x1   :  { %s1116_s20 = smov 0  }
   0x2 LB: > { %s27_s21 = sadd.s32 1, %s1076_s19  ;;  %p821_p0 = scmp.ge.s32.totalorder %s1080_s20, 1  ;;  %s1080_s20 = sphi %s1116_s20, %s15_s20   ;;  %s1076_s19 = sphi %s1114_s19, %s1418_s19   ;;  %s1072_s18 = sphi %s1112_s18, %s1417_s18  }
   0x3   : > { %p29_p1 = scmp.ge.s32.totalorder %s27_s21, 2  ;;  %p225_p2 = scmp.lt.s32.totalorder %s1080_s20, 3 }
   0x5   : > { %s1420_s21 = smov (%p29_p1, %s27_s21), 0  ;;  %p226_p3 = pnand %p821_p0, %p225_p2 }
   0x6   : > { %p272_p4 = scmp.lt.s32.totalorder (!%p226_p3), %s1072_s18, 1 }
   0x7   : > { %229 = sbr.rel (%p226_p3) target bundleno = 230 (0xe6), region = 40 }
   0xc   : > { %v890_v0 = vld [vmem:[%s1414_s3 + $0x70] sm:$0xf]  ;;  %v997_v1 = vld [vmem:[%s1414_s3 + $0x74] sm:$0xf0]  ;;  %v996_v2 = vld [vmem:[%s1414_s3 + $0x74] sm:$0xf] }
   0xd   : > { %v891_v3 = vor.u32 %v997_v1, %v890_v0  ;;  %v892_v4 = vld [vmem:[%s1414_s3 + $0x78] sm:$0xf0]  ;;  %v970_v5 = vld [vmem:[%s1413_s2 + $0x70] sm:$0xf]  ;;  %v1017_v6 = vld [vmem:[%s1413_s2 + $0x74] sm:$0xf0] }
   0xe   : > { %v895_v7 = vor.u32 %v996_v2, %v892_v4  ;;  %v1150_v8 = vor.u32 %v1017_v6, %v970_v5  ;;  %v1016_v9 = vld [vmem:[%s1413_s2 + $0x74] sm:$0xf]  ;;  %v972_v10 = vld [vmem:[%s1413_s2 + $0x78] sm:$0xf0]  ;;  %v882_v11 = vld [vmem:[%s1414_s3 + $0x60] sm:$0xf] }
   0xf   : > { %412 = vmatpush.bf16.msra.mxu0 %v891_v3  ;;  %v1161_v12 = vor.u32 %v1016_v9, %v972_v10  ;;  %v995_v13 = vld [vmem:[%s1414_s3 + $0x64] sm:$0xf0]  ;;  %v994_v14 = vld [vmem:[%s1414_s3 + $0x64] sm:$0xf]  ;;  %v884_v15 = vld [vmem:[%s1414_s3 + $0x68] sm:$0xf0] }
  0x10   : > { %426 = vmatpush.bf16.msra.mxu1 %v895_v7  ;;  %1018 = vmatpush.bf16.msra.mxu2 %v1150_v8  ;;  %v883_v16 = vor.u32 %v995_v13, %v882_v11  ;;  %v887_v17 = vor.u32 %v994_v14, %v884_v15  ;;  %v962_v18 = vld [vmem:[%s1413_s2 + $0x60] sm:$0xf]  ;;  %v1015_v19 = vld [vmem:[%s1413_s2 + $0x64] sm:$0xf0]  ;;  %v1014_v20 = vld [vmem:[%s1413_s2 + $0x64] sm:$0xf] }
  0x11   : > { %1026 = vmatpush.bf16.msra.mxu3 %v1161_v12  ;;  %v1183_v21 = vor.u32 %v1015_v19, %v962_v18  ;;  %v964_v22 = vld [vmem:[%s1413_s2 + $0x68] sm:$0xf0]  ;;  %v874_v23 = vld [vmem:[%s1414_s3 + $0x50] sm:$0xf]  ;;  %v993_v24 = vld [vmem:[%s1414_s3 + $0x54] sm:$0xf0] }
  0x12   : > { %v1194_v25 = vor.u32 %v1014_v20, %v964_v22  ;;  %v992_v26 = vld [vmem:[%s1414_s3 + $0x54] sm:$0xf]  ;;  %v876_v27 = vld [vmem:[%s1414_s3 + $0x58] sm:$0xf0]  ;;  %v954_v28 = vld [vmem:[%s1413_s2 + $0x50] sm:$0xf]  ;;  %v875_v29 = vor.u32 %v993_v24, %v874_v23 }
  0x13   : > { %413 = vmatpush.bf16.msra.mxu0 %v883_v16  ;;  %v1013_v30 = vld [vmem:[%s1413_s2 + $0x54] sm:$0xf0]  ;;  %v1012_v31 = vld [vmem:[%s1413_s2 + $0x54] sm:$0xf]  ;;  %v956_v32 = vld [vmem:[%s1413_s2 + $0x58] sm:$0xf0]  ;;  %v879_v33 = vor.u32 %v992_v26, %v876_v27 }
  0x14   : > { %427 = vmatpush.bf16.msra.mxu1 %v887_v17  ;;  %1019 = vmatpush.bf16.msra.mxu2 %v1183_v21  ;;  %v1215_v34 = vor.u32 %v1013_v30, %v954_v28  ;;  %v866_v35 = vld [vmem:[%s1414_s3 + $0x40] sm:$0xf]  ;;  %v991_v36 = vld [vmem:[%s1414_s3 + $0x44] sm:$0xf0]  ;;  %v990_v37 = vld [vmem:[%s1414_s3 + $0x44] sm:$0xf]  ;;  %v1227_v38 = vor.u32 %v1012_v31, %v956_v32 }
  0x15   : > { %1027 = vmatpush.bf16.msra.mxu3 %v1194_v25  ;;  %v868_v39 = vld [vmem:[%s1414_s3 + $0x48] sm:$0xf0]  ;;  %v946_v40 = vld [vmem:[%s1413_s2 + $0x40] sm:$0xf]  ;;  %v1011_v41 = vld [vmem:[%s1413_s2 + $0x44] sm:$0xf0]  ;;  %v867_v44 = vor.u32 %v991_v36, %v866_v35 }
  0x16   : > { %v1010_v42 = vld [vmem:[%s1413_s2 + $0x44] sm:$0xf]  ;;  %v948_v43 = vld [vmem:[%s1413_s2 + $0x48] sm:$0xf0]  ;;  %v871_v45 = vor.u32 %v990_v37, %v868_v39  ;;  %v1245_v46 = vor.u32 %v1011_v41, %v946_v40  ;;  %v858_v47 = vld [vmem:[%s1414_s3 + $0x30] sm:$0xf] }
  0x17   : > { %414 = vmatpush.bf16.msra.mxu0 %v875_v29  ;;  %v989_v48 = vld [vmem:[%s1414_s3 + $0x34] sm:$0xf0]  ;;  %v988_v49 = vld [vmem:[%s1414_s3 + $0x34] sm:$0xf]  ;;  %v1257_v50 = vor.u32 %v1010_v42, %v948_v43  ;;  %v860_v51 = vld [vmem:[%s1414_s3 + $0x38] sm:$0xf0] }
  0x18   : > { %428 = vmatpush.bf16.msra.mxu1 %v879_v33  ;;  %1020 = vmatpush.bf16.msra.mxu2 %v1215_v34  ;;  %v938_v52 = vld [vmem:[%s1413_s2 + $0x30] sm:$0xf]  ;;  %v1009_v53 = vld [vmem:[%s1413_s2 + $0x34] sm:$0xf0]  ;;  %v1008_v54 = vld [vmem:[%s1413_s2 + $0x34] sm:$0xf]  ;;  %v859_v56 = vor.u32 %v989_v48, %v858_v47  ;;  %v863_v57 = vor.u32 %v988_v49, %v860_v51 }
  0x19   : > { %1028 = vmatpush.bf16.msra.mxu3 %v1227_v38  ;;  %v940_v55 = vld [vmem:[%s1413_s2 + $0x38] sm:$0xf0]  ;;  %v1275_v58 = vor.u32 %v1009_v53, %v938_v52  ;;  %v850_v59 = vld [vmem:[%s1414_s3 + $0x20] sm:$0xf]  ;;  %v987_v60 = vld [vmem:[%s1414_s3 + $0x24] sm:$0xf0] }
  0x1a   : > { %v986_v61 = vld [vmem:[%s1414_s3 + $0x24] sm:$0xf]  ;;  %v1287_v62 = vor.u32 %v1008_v54, %v940_v55  ;;  %v852_v63 = vld [vmem:[%s1414_s3 + $0x28] sm:$0xf0]  ;;  %v930_v0 = vld [vmem:[%s1413_s2 + $0x20] sm:$0xf]  ;;  %v851_v4 = vor.u32 %v987_v60, %v850_v59 }
  0x1b   : > { %415 = vmatpush.bf16.msra.mxu0 %v867_v44  ;;  %v1007_v1 = vld [vmem:[%s1413_s2 + $0x24] sm:$0xf0]  ;;  %v1006_v2 = vld [vmem:[%s1413_s2 + $0x24] sm:$0xf]  ;;  %v932_v3 = vld [vmem:[%s1413_s2 + $0x28] sm:$0xf0]  ;;  %v855_v6 = vor.u32 %v986_v61, %v852_v63 }
  0x1c   : > { %429 = vmatpush.bf16.msra.mxu1 %v871_v45  ;;  %1021 = vmatpush.bf16.msra.mxu2 %v1245_v46  ;;  %v842_v5 = vld [vmem:[%s1414_s3 + $0x10] sm:$0xf]  ;;  %v931_v7 = vor.u32 %v1007_v1, %v930_v0  ;;  %v985_v9 = vld [vmem:[%s1414_s3 + $0x14] sm:$0xf0]  ;;  %v984_v10 = vld [vmem:[%s1414_s3 + $0x14] sm:$0xf]  ;;  %v935_v13 = vor.u32 %v1006_v2, %v932_v3 }
  0x1d   : > { %1029 = vmatpush.bf16.msra.mxu3 %v1257_v50  ;;  %v844_v11 = vld [vmem:[%s1414_s3 + $0x18] sm:$0xf0]  ;;  %v922_v14 = vld [vmem:[%s1413_s2 + $0x10] sm:$0xf]  ;;  %v1005_v15 = vld [vmem:[%s1413_s2 + $0x14] sm:$0xf0]  ;;  %v843_v18 = vor.u32 %v985_v9, %v842_v5 }
  0x1e   : > { %v1004_v16 = vld [vmem:[%s1413_s2 + $0x14] sm:$0xf]  ;;  %v924_v17 = vld [vmem:[%s1413_s2 + $0x18] sm:$0xf0]  ;;  %v834_v19 = vld [vmem:[%s1414_s3] sm:$0xf]  ;;  %v847_v20 = vor.u32 %v984_v10, %v844_v11  ;;  %v923_v22 = vor.u32 %v1005_v15, %v922_v14 }
  0x1f   : > { %416 = vmatpush.bf16.msra.mxu0 %v859_v56  ;;  %s1422_s18 = smov (!%p272_p4, %s1072_s18), 1  ;;  %v983_v23 = vld [vmem:[%s1414_s3 + $0x4] sm:$0xf0]  ;;  %v982_v24 = vld [vmem:[%s1414_s3 + $0x4] sm:$0xf]  ;;  %v927_v27 = vor.u32 %v1004_v16, %v924_v17 }
  0x20   : > { %430 = vmatpush.bf16.msra.mxu1 %v863_v57  ;;  %1022 = vmatpush.bf16.msra.mxu2 %v1275_v58  ;;  %v836_v26 = vld [vmem:[%s1414_s3 + $0x8] sm:$0xf0]  ;;  %v914_v28 = vld [vmem:[%s1413_s2] sm:$0xf]  ;;  %v1003_v29 = vld [vmem:[%s1413_s2 + $0x4] sm:$0xf0]  ;;  %v835_v32 = vor.u32 %v983_v23, %v834_v19 }
  0x21   : > { %1030 = vmatpush.bf16.msra.mxu3 %v1287_v62  ;;  %s978_s16 = sshll.u32 %s1422_s18, 5  ;;  %s979_s17 = sshll.u32 %s1422_s18, 3  ;;  %v1002_v30 = vld [vmem:[%s1413_s2 + $0x4] sm:$0xf]  ;;  %v916_v31 = vld [vmem:[%s1413_s2 + $0x8] sm:$0xf0]  ;;  %v839_v33 = vor.u32 %v982_v24, %v836_v26  ;;  %v915_v35 = vor.u32 %v1003_v29, %v914_v28 }
  0x22   : > { %s289_s28 = scalar_lea.vmem %s1412_s1, %s979_s17  ;;  %s1366_s6 = scalar_lea.vmem %s1411_s0, %s978_s16  ;;  %v919_v36 = vor.u32 %v1002_v30, %v916_v31  ;;  %v320_v43 = vld [vmem:[%s1415_s4] sm:$0x3] }
  0x23   : > { %417 = vmatpush.bf16.msra.mxu0 %v851_v4  ;;  %v981_v37 = vld [vmem:[%s289_s28] sm:$0xff]  ;;  %v999_v39 = vld [vmem:[%s1366_s6 + $0x8] sm:$0xff]  ;;  %v322_v44 = vperm.slane %v320_v43, 0  ;;  %v323_v45 = vperm.slane %v320_v43, 1  ;;  %s980_s9 = sshll.u32 %s1422_s18, 4 }
  0x24   : > { %431 = vmatpush.bf16.msra.mxu1 %v855_v6  ;;  %1023 = vmatpush.bf16.msra.mxu2 %v931_v7  ;;  %s300_s12 = scalar_lea.vmem %s1416_s5, %s980_s9 }
  0x25   : > { %1031 = vmatpush.bf16.msra.mxu3 %v935_v13 }
  0x27   : > { %418 = vmatpush.bf16.msra.mxu0 %v843_v18 }
  0x28   : > { %432 = vmatpush.bf16.msra.mxu1 %v847_v20  ;;  %1024 = vmatpush.bf16.msra.mxu2 %v923_v22 }
  0x29   : > { %1032 = vmatpush.bf16.msra.mxu3 %v927_v27 }
  0x2b   : > { %419 = vmatpush.bf16.msra.mxu0 %v835_v32 }
  0x2c   : > { %433 = vmatpush.bf16.msra.mxu1 %v839_v33  ;;  %1025 = vmatpush.bf16.msra.mxu2 %v915_v35 }
  0x2d   : > { %1033 = vmatpush.bf16.msra.mxu3 %v919_v36 }
  0x2e   : > { %420 = vmatmul.bf16.vlgmr.msra.gmra.mxu0 %v981_v37 }
  0x2f   : > { %568 = vmatpush.bf16.msrb.mxu0 %v1150_v8  ;;  %581 = vmatmul.bf16.vlgmr.msra.gmra.mxu2 %v999_v39  ;;  %v1000_v8 = vld [vmem:[%s1366_s6 + $0x10] sm:$0xff] }
  0x30   : > { %597 = vmatpush.bf16.msrb.mxu1 %v1161_v12  ;;  %610 = vmatmul.bf16.vlgmr.msra.gmra.mxu3 %v999_v39  ;;  %v998_v12 = vld [vmem:[%s1366_s6] sm:$0xff] }
  0x31   : > { %434 = vmatmul.bf16.vlgmr.msra.gmra.mxu1 %v981_v37 }
  0x33   : > { %569 = vmatpush.bf16.msrb.mxu0 %v1183_v21  ;;  %v1001_v21 = vld [vmem:[%s1366_s6 + $0x18] sm:$0xff] }
  0x34   : > { %598 = vmatpush.bf16.msrb.mxu1 %v1194_v25 }
  0x37   : > { %570 = vmatpush.bf16.msrb.mxu0 %v1215_v34 }
  0x38   : > { %599 = vmatpush.bf16.msrb.mxu1 %v1227_v38 }
  0x3b   : > { %571 = vmatpush.bf16.msrb.mxu0 %v1245_v46 }
  0x3c   : > { %600 = vmatpush.bf16.msrb.mxu1 %v1257_v50 }
  0x3f   : > { %572 = vmatpush.bf16.msrb.mxu0 %v1275_v58  ;;  %586 = vmatmul.bf16.gmra.mxu2 %v1000_v8 }
  0x40   : > { %601 = vmatpush.bf16.msrb.mxu1 %v1287_v62  ;;  %615 = vmatmul.bf16.gmra.mxu3 %v1000_v8 }
  0x43   : > { %573 = vmatpush.bf16.msrb.mxu0 %v931_v7 }
  0x44   : > { %602 = vmatpush.bf16.msrb.mxu1 %v935_v13 }
  0x47   : > { %574 = vmatpush.bf16.msrb.mxu0 %v923_v22 }
  0x48   : > { %603 = vmatpush.bf16.msrb.mxu1 %v927_v27 }
  0x4b   : > { %575 = vmatpush.bf16.msrb.mxu0 %v915_v35 }
  0x4c   : > { %604 = vmatpush.bf16.msrb.mxu1 %v919_v36 }
  0x4e   : > { %576 = vmatmul.bf16.vlgmr.msrb.gmra.mxu0 %v998_v12 }
  0x4f   : > { %605 = vmatmul.bf16.vlgmr.msrb.gmra.mxu1 %v998_v12  ;;  %591 = vmatmul.bf16.gmra.mxu2 %v1001_v21 }
  0x50   : > { %620 = vmatmul.bf16.gmra.mxu3 %v1001_v21 }
  0xab   : > { %v421_v38 = vpop.f32.mrf.mxu0 }
  0xac   : > { %v422_v50 = vadd.f32 %v421_v38, %v322_v44 }
  0xae   : > { %v435_v40 = vpop.f32.mrf.mxu1 }
  0xaf   : > { %v436_v51 = vadd.f32 %v435_v40, %v323_v45 }
  0xb2   : > { %v582_v25 = vpop.f32.mrf.mxu2 }
  0xb3   : > { %v611_v34 = vpop.f32.mrf.mxu3  ;;  %v423_v46 = vpop.f32.mrf.mxu0  ;;  %v630_v52 = vadd.f32 %v582_v25, %v422_v50 }
  0xb4   : > { %v631_v53 = vadd.f32 %v611_v34, %v436_v51  ;;  %v1385_v54 = vadd.f32 %v423_v46, %v322_v44 }
  0xb5   : > { %v662_v0 = vmul.f32 0.2, %v630_v52  ;;  %vm646_vm2 = vcmp.gt.f32.partialorder %v630_v52, 0.0 }
  0xb6   : > { %v437_v47 = vpop.f32.mrf.mxu1  ;;  %v663_v2 = vmul.f32 0.2, %v631_v53  ;;  %vm647_vm3 = vcmp.gt.f32.partialorder %v631_v53, 0.0 }
  0xb7   : > { %v1387_v56 = vadd.f32 %v437_v47, %v323_v45  ;;  %v678_v11 = vsel %vm646_vm2, %v630_v52, %v662_v0 }
  0xb8   : > { %v679_v13 = vsel %vm647_vm3, %v631_v53, %v663_v2 }
  0xba   : > { %v584_v41 = vpop.f32.mrf.mxu2 }
  0xbb   : > { %v613_v42 = vpop.f32.mrf.mxu3  ;;  %v632_v3 = vadd.f32 %v584_v41, %v1385_v54 }
  0xbc   : > { %v633_v5 = vadd.f32 %v613_v42, %v1387_v56 }
  0xbd   : > { %vm648_vm6 = vcmp.gt.f32.partialorder %v632_v3, 0.0  ;;  %v664_v14 = vmul.f32 0.2, %v632_v3 }
  0xbe   : > { %v665_v16 = vmul.f32 0.2, %v633_v5  ;;  %vm649_vm11 = vcmp.gt.f32.partialorder %v633_v5, 0.0 }
  0xbf   : > { %v680_v38 = vsel %vm648_vm6, %v632_v3, %v664_v14 }
  0xc0   : > { %v681_v42 = vsel %vm649_vm11, %v633_v5, %v665_v16 }
  0xc2   : > { %v587_v48 = vpop.f32.mrf.mxu2 }
  0xc3   : > { %v616_v49 = vpop.f32.mrf.mxu3  ;;  %v634_v57 = vadd.f32 %v587_v48, %v422_v50 }
  0xc4   : > { %v635_v61 = vadd.f32 %v616_v49, %v436_v51 }
  0xc5   : > { %v666_v6 = vmul.f32 0.2, %v634_v57  ;;  %vm650_vm4 = vcmp.gt.f32.partialorder %v634_v57, 0.0 }
  0xc6   : > { %v667_v7 = vmul.f32 0.2, %v635_v61  ;;  %vm651_vm5 = vcmp.gt.f32.partialorder %v635_v61, 0.0 }
  0xc7   : > { %v682_v17 = vsel %vm650_vm4, %v634_v57, %v666_v6 }
  0xc8   : > { %v683_v23 = vsel %vm651_vm5, %v635_v61, %v667_v7 }
  0xca   : > { %v589_v60 = vpop.f32.mrf.mxu2 }
  0xcb   : > { %v577_v55 = vpop.f32.mrf.mxu0  ;;  %v618_v63 = vpop.f32.mrf.mxu3  ;;  %v636_v29 = vadd.f32 %v589_v60, %v1385_v54 }
  0xcc   : > { %v626_v58 = vadd.f32 %v577_v55, %v422_v50  ;;  %v606_v59 = vpop.f32.mrf.mxu1  ;;  %v637_v35 = vadd.f32 %v618_v63, %v1387_v56 }
  0xcd   : > { %v627_v62 = vadd.f32 %v606_v59, %v436_v51  ;;  %v668_v40 = vmul.f32 0.2, %v636_v29  ;;  %vm652_vm12 = vcmp.gt.f32.partialorder %v636_v29, 0.0 }
  0xce   : > { %vm642_vm0 = vcmp.gt.f32.partialorder %v626_v58, 0.0  ;;  %v658_v1 = vmul.f32 0.2, %v626_v58  ;;  %v669_v43 = vmul.f32 0.2, %v637_v35  ;;  %vm653_vm13 = vcmp.gt.f32.partialorder %v637_v35, 0.0 }
  0xcf   : > { %vm643_vm1 = vcmp.gt.f32.partialorder %v627_v62, 0.0  ;;  %v659_v4 = vmul.f32 0.2, %v627_v62 }
  0xd0   : > { %v674_v9 = vsel %vm642_vm0, %v626_v58, %v658_v1  ;;  %v685_v53 = vsel %vm653_vm13, %v637_v35, %v669_v43 }
  0xd1   : > { %v675_v10 = vsel %vm643_vm1, %v627_v62, %v659_v4  ;;  %v690_v18 = vmax.f32 %v674_v9, %v678_v11 }
  0xd2   : > { %v592_v22 = vpop.f32.mrf.mxu2  ;;  %v693_v24 = vmax.f32 %v675_v10, %v679_v13 }
  0xd3   : > { %v579_v15 = vpop.f32.mrf.mxu0  ;;  %v638_v27 = vadd.f32 %v592_v22, %v422_v50  ;;  %v621_v28 = vpop.f32.mrf.mxu3  ;;  %v691_v36 = vmax.f32 %v690_v18, %v682_v17 }
  0xd4   : > { %v628_v19 = vadd.f32 %v579_v15, %v1385_v54  ;;  %v608_v20 = vpop.f32.mrf.mxu1  ;;  %v639_v31 = vadd.f32 %v621_v28, %v436_v51  ;;  %v694_v12 = vmax.f32 %v693_v24, %v683_v23  ;;  %v684_v51 = vsel %vm652_vm12, %v636_v29, %v668_v40 }
  0xd5   : > { %v629_v26 = vadd.f32 %v608_v20, %v1387_v56  ;;  %vm654_vm9 = vcmp.gt.f32.partialorder %v638_v27, 0.0  ;;  %v670_v33 = vmul.f32 0.2, %v638_v27 }
  0xd6   : > { %vm644_vm7 = vcmp.gt.f32.partialorder %v628_v19, 0.0  ;;  %v660_v30 = vmul.f32 0.2, %v628_v19  ;;  %vm655_vm10 = vcmp.gt.f32.partialorder %v639_v31, 0.0  ;;  %v671_v37 = vmul.f32 0.2, %v639_v31 }
  0xd7   : > { %vm645_vm8 = vcmp.gt.f32.partialorder %v629_v26, 0.0  ;;  %v661_v32 = vmul.f32 0.2, %v629_v26  ;;  %v686_v8 = vsel %vm654_vm9, %v638_v27, %v670_v33 }
  0xd8   : > { %v676_v39 = vsel %vm644_vm7, %v628_v19, %v660_v30  ;;  %v692_v25 = vmax.f32 %v691_v36, %v686_v8  ;;  %v687_v34 = vsel %vm655_vm10, %v639_v31, %v671_v37 }
  0xd9   : > { %v677_v21 = vsel %vm645_vm8, %v629_v26, %v661_v32  ;;  %v695_v41 = vmax.f32 %v694_v12, %v687_v34  ;;  %v696_v44 = vmax.f32 %v676_v39, %v680_v38 }
  0xda   : > { %v594_v45 = vpop.f32.mrf.mxu2  ;;  %v699_v46 = vmax.f32 %v677_v21, %v681_v42 }
  0xdb   : > { %v702_v47 = vpack.c.bf16 %v695_v41, %v692_v25  ;;  %v640_v48 = vadd.f32 %v594_v45, %v1385_v54  ;;  %v623_v49 = vpop.f32.mrf.mxu3  ;;  %v697_v55 = vmax.f32 %v696_v44, %v684_v51 }
  0xdc   : > { %v641_v50 = vadd.f32 %v623_v49, %v1387_v56  ;;  %v700_v59 = vmax.f32 %v699_v46, %v685_v53 }
  0xdd   : > { %704 = vst [vmem:[%s300_s12] sm:$0xff] %v702_v47  ;;  %vm656_vm14 = vcmp.gt.f32.partialorder %v640_v48, 0.0  ;;  %v672_v52 = vmul.f32 0.2, %v640_v48 }
  0xde   : > { %vm657_vm15 = vcmp.gt.f32.partialorder %v641_v50, 0.0  ;;  %v673_v57 = vmul.f32 0.2, %v641_v50 }
  0xdf   : > { %v688_v58 = vsel %vm656_vm14, %v640_v48, %v672_v52 }
  0xe0   : > { %v698_v60 = vmax.f32 %v697_v55, %v688_v58  ;;  %v689_v61 = vsel %vm657_vm15, %v641_v50, %v673_v57 }
  0xe1   : > { %v701_v62 = vmax.f32 %v700_v59, %v689_v61 }
  0xe3   : > { %v703_v63 = vpack.c.bf16 %v701_v62, %v698_v60 }
  0xe5   : > { %705 = vst [vmem:[%s300_s12 + $0x8] sm:$0xff] %v703_v63 }
  0xe6 PF: > { %s15_s20 = sadd.s32 1, %s1080_s20   ;;  %s1417_s18 = smov %s1076_s19 }
  0xe7   : > { %p12_p5 = scmp.ge.s32.totalorder %s15_s20, 4   ;;  %s1418_s19 = smov %s1420_s21 }
  0xe9   :  { %14 = sbr.rel (!%p12_p5) target bundleno = 2 (0x2), region = 73 }

// kernel: dgcnn_cls_encoder.18
= control target key start
LH: loop header
LB: loop body
LE: loop exit
PB: predicated region body
PF: predicated region fallthrough
CT: control target
= control target key end

     0   :  { %s1298_s30 = smov 0   ;;  %s1300_s10 = smov 0   ;;  %s1453_s0 = inlined_call_operand.vmem [shape: bf16[2,16,64], index: 0, kind: input, shape index: {}]   ;;  %s1454_s1 = inlined_call_operand.vmem [shape: bf16[2,16,64], index: 1, kind: input, shape index: {}]   ;;  %s1455_s2 = inlined_call_operand.vmem [shape: bf16[2,16,128], index: 2, kind: input, shape index: {}]   ;;  %s1456_s3 = inlined_call_operand.vmem [shape: bf16[2,16,256], index: 3, kind: input, shape index: {}]   ;;  %s1457_s4 = inlined_call_operand.vmem [shape: bf16[64,64], index: 4, kind: input, shape index: {}]   ;;  %s1458_s5 = inlined_call_operand.vmem [shape: bf16[64,64], index: 5, kind: input, shape index: {}]   ;;  %s1459_s6 = inlined_call_operand.vmem [shape: bf16[128,64], index: 6, kind: input, shape index: {}]   ;;  %s1460_s7 = inlined_call_operand.vmem [shape: bf16[256,64], index: 7, kind: input, shape index: {}]   ;;  %s1461_s8 = inlined_call_operand.vmem [shape: f32[1,64], index: 8, kind: input, shape index: {}]   ;;  %s1462_s9 = inlined_call_operand.vmem [shape: f32[2,1,64], index: 9, kind: output, shape index: {}]  }
   0x1   :  { %s1302_s11 = smov 0  }
   0x2 LB: > { %s31_s12 = sadd.s32 1, %s1242_s10  ;;  %p997_p0 = scmp.ge.s32.totalorder %s1246_s11, 1  ;;  %s1246_s11 = sphi %s1302_s11, %s19_s11   ;;  %s1242_s10 = sphi %s1300_s10, %s1464_s10   ;;  %s1238_s30 = sphi %s1298_s30, %s1463_s30  }
   0x3   : > { %p33_p1 = scmp.ge.s32.totalorder %s31_s12, 2  ;;  %p358_p2 = scmp.lt.s32.totalorder %s1246_s11, 3 }
   0x5   : > { %s1466_s12 = smov (%p33_p1, %s31_s12), 0  ;;  %p359_p3 = pnand %p997_p0, %p358_p2 }
   0x6   : > { %p425_p4 = scmp.lt.s32.totalorder (!%p359_p3), %s1238_s30, 1 }
   0x7   : > { %362 = sbr.rel (%p359_p3) target bundleno = 211 (0xd3), region = 56 }
   0xc   : > { %v1171_v0 = vld [vmem:[%s1458_s5 + $0x18] sm:$0xff]  ;;  %v1170_v4 = vld [vmem:[%s1458_s5 + $0x10] sm:$0xff]  ;;  %s1468_s30 = smov (!%p425_p4, %s1238_s30), 1  ;;  %v1169_v8 = vld [vmem:[%s1458_s5 + $0x8] sm:$0xff]  ;;  %vm518_vm0 = vcmask 523264   ;;  %vm865_vm3 = vcmask 516096  }
   0xd   : > { %v1180_v1 = vld [vmem:[%s1459_s6 + $0x38] sm:$0xff]  ;;  %526 = vmatpush.bf16.msra.mxu1 %v1171_v0  ;;  %v1179_v5 = vld [vmem:[%s1459_s6 + $0x30] sm:$0xff]  ;;  %v1178_v9 = vld [vmem:[%s1459_s6 + $0x28] sm:$0xff]  ;;  %s1355_s20 = sshll.u32 %s1468_s30, 3  ;;  %s1161_s17 = sshll.u32 %s1468_s30, 4 }
   0xe   : > { %v1190_v2 = vld [vmem:[%s1460_s7 + $0x38] sm:$0xff]  ;;  %654 = vmatpush.bf16.msra.mxu2 %v1180_v1  ;;  %v1189_v6 = vld [vmem:[%s1460_s7 + $0x30] sm:$0xff]  ;;  %v1188_v10 = vld [vmem:[%s1460_s7 + $0x28] sm:$0xff]  ;;  %s442_s27 = scalar_lea.vmem %s1454_s1, %s1355_s20  ;;  %s432_s22 = scalar_lea.vmem %s1453_s0, %s1355_s20 }
   0xf   : > { %v1198_v3 = vld [vmem:[%s1460_s7 + $0x78] sm:$0xff]  ;;  %810 = vmatpush.bf16.msra.mxu3 %v1190_v2  ;;  %v1197_v7 = vld [vmem:[%s1460_s7 + $0x70] sm:$0xff]  ;;  %v1196_v11 = vld [vmem:[%s1460_s7 + $0x68] sm:$0xff]  ;;  %s452_s25 = scalar_lea.vmem %s1455_s2, %s1355_s20  ;;  %s467_s29 = scalar_lea.vmem %s1462_s9, %s1468_s30 }
  0x10   : > { %824 = vmatpush.bf16.msra.mxu0 %v1198_v3  ;;  %v1168_v12 = vld [vmem:[%s1458_s5] sm:$0xff]  ;;  %v1166_v16 = vld [vmem:[%s1457_s4 + $0x18] sm:$0xff]  ;;  %v1165_v21 = vld [vmem:[%s1457_s4 + $0x10] sm:$0xff] }
  0x11   : > { %527 = vmatpush.bf16.msra.mxu1 %v1170_v4  ;;  %v1177_v13 = vld [vmem:[%s1459_s6 + $0x20] sm:$0xff]  ;;  %v1176_v18 = vld [vmem:[%s1459_s6 + $0x18] sm:$0xff]  ;;  %v1175_v22 = vld [vmem:[%s1459_s6 + $0x10] sm:$0xff] }
  0x12   : > { %655 = vmatpush.bf16.msra.mxu2 %v1179_v5  ;;  %v1187_v14 = vld [vmem:[%s1460_s7 + $0x20] sm:$0xff]  ;;  %v1186_v19 = vld [vmem:[%s1460_s7 + $0x18] sm:$0xff]  ;;  %v1185_v23 = vld [vmem:[%s1460_s7 + $0x10] sm:$0xff] }
  0x13   : > { %811 = vmatpush.bf16.msra.mxu3 %v1189_v6  ;;  %v1195_v15 = vld [vmem:[%s1460_s7 + $0x60] sm:$0xff]  ;;  %v1194_v20 = vld [vmem:[%s1460_s7 + $0x58] sm:$0xff]  ;;  %v1193_v24 = vld [vmem:[%s1460_s7 + $0x50] sm:$0xff] }
  0x14   : > { %825 = vmatpush.bf16.msra.mxu0 %v1197_v7  ;;  %v1167_v17 = vld [vmem:[%s442_s27] sm:$0xff]  ;;  %v1164_v25 = vld [vmem:[%s1457_s4 + $0x8] sm:$0xff]  ;;  %s463_s27 = scalar_lea.vmem %s1456_s3, %s1161_s17 }
  0x15   : > { %528 = vmatpush.bf16.msra.mxu1 %v1169_v8  ;;  %v1174_v26 = vld [vmem:[%s1459_s6 + $0x8] sm:$0xff]  ;;  %v1163_v29 = vld [vmem:[%s1457_s4] sm:$0xff] }
  0x16   : > { %656 = vmatpush.bf16.msra.mxu2 %v1178_v9  ;;  %v1184_v27 = vld [vmem:[%s1460_s7 + $0x8] sm:$0xff]  ;;  %v1173_v30 = vld [vmem:[%s1459_s6] sm:$0xff] }
  0x17   : > { %812 = vmatpush.bf16.msra.mxu3 %v1188_v10  ;;  %v1192_v28 = vld [vmem:[%s1460_s7 + $0x48] sm:$0xff]  ;;  %v1183_v31 = vld [vmem:[%s1460_s7] sm:$0xff] }
  0x18   : > { %826 = vmatpush.bf16.msra.mxu0 %v1196_v11  ;;  %v1191_v32 = vld [vmem:[%s1460_s7 + $0x40] sm:$0xff]  ;;  %v1182_v34 = vld [vmem:[%s463_s27 + $0x4] sm:$0xf0]  ;;  %v1088_v36 = vld [vmem:[%s463_s27 + $0x8] sm:$0xf0] }
  0x19   : > { %529 = vmatpush.bf16.msra.mxu1 %v1168_v12  ;;  %v1086_v33 = vld [vmem:[%s463_s27] sm:$0xf]  ;;  %v1181_v35 = vld [vmem:[%s463_s27 + $0x4] sm:$0xf] }
  0x1a   : > { %657 = vmatpush.bf16.msra.mxu2 %v1177_v13  ;;  %v1162_v37 = vld [vmem:[%s432_s22] sm:$0xff]  ;;  %v1087_v39 = vor.u32 %v1182_v34, %v1086_v33  ;;  %v1091_v40 = vor.u32 %v1181_v35, %v1088_v36 }
  0x1b   : > { %813 = vmatpush.bf16.msra.mxu3 %v1187_v14  ;;  %v1172_v38 = vld [vmem:[%s452_s25] sm:$0xff] }
  0x1c   : > { %827 = vmatpush.bf16.msra.mxu0 %v1195_v15  ;;  %1026 = vmatmul.msk.bf16.vlgmr.msra.gmra.mxu1 %vm518_vm0, %v1167_v17  ;;  %v1223_v51 = vld [vmem:[%s1461_s8] ss:$0 sm:$0xff] }
  0x1d   : > { %572 = vmatpush.bf16.msrb.mxu1 %v1166_v16 }
  0x1e   : > { %658 = vmatpush.bf16.msra.mxu2 %v1176_v18 }
  0x1f   : > { %814 = vmatpush.bf16.msra.mxu3 %v1186_v19 }
  0x20   : > { %828 = vmatpush.bf16.msra.mxu0 %v1194_v20 }
  0x21   : > { %573 = vmatpush.bf16.msrb.mxu1 %v1165_v21 }
  0x22   : > { %659 = vmatpush.bf16.msra.mxu2 %v1175_v22 }
  0x23   : > { %815 = vmatpush.bf16.msra.mxu3 %v1185_v23 }
  0x24   : > { %829 = vmatpush.bf16.msra.mxu0 %v1193_v24 }
  0x25   : > { %574 = vmatpush.bf16.msrb.mxu1 %v1164_v25 }
  0x26   : > { %660 = vmatpush.bf16.msra.mxu2 %v1174_v26 }
  0x27   : > { %816 = vmatpush.bf16.msra.mxu3 %v1184_v27 }
  0x28   : > { %830 = vmatpush.bf16.msra.mxu0 %v1192_v28 }
  0x29   : > { %575 = vmatpush.bf16.msrb.mxu1 %v1163_v29 }
  0x2a   : > { %661 = vmatpush.bf16.msra.mxu2 %v1173_v30 }
  0x2b   : > { %817 = vmatpush.bf16.msra.mxu3 %v1183_v31 }
  0x2c   : > { %831 = vmatpush.bf16.msra.mxu0 %v1191_v32  ;;  %1047 = vmatmul.msk.bf16.vlgmr.msrb.gmra.mxu1 %vm518_vm0, %v1162_v37 }
  0x2d   : > { %662 = vmatmul.bf16.vlgmr.msra.gmra.mxu2 %v1172_v38 }
  0x2e   : > { %818 = vmatmul.bf16.vlgmr.msra.gmra.mxu3 %v1087_v39 }
  0x2f   : > { %832 = vmatmul.bf16.vlgmr.msra.gmra.mxu0 %v1091_v40 }
  0x99   : > { %v531_v41 = vpop.f32.mrf.mxu1 }
  0xa1   : > { %v533_v42 = vpop.f32.mrf.mxu1 }
  0xa9   : > { %v577_v43 = vpop.f32.mrf.mxu1 }
  0xaa   : > { %v578_v44 = vadd.f32 %v577_v43, %v531_v41 }
  0xac   : > { %v833_v45 = vpop.f32.mrf.mxu0 }
  0xb0   : > { %v663_v46 = vpop.f32.mrf.mxu2 }
  0xb1   : > { %v668_v47 = vadd.f32 %v663_v46, %v578_v44  ;;  %v819_v48 = vpop.f32.mrf.mxu3  ;;  %v579_v52 = vpop.f32.mrf.mxu1 }
  0xb2   : > { %v834_v49 = vadd.f32 %v833_v45, %v819_v48  ;;  %v580_v53 = vadd.f32 %v579_v52, %v533_v42 }
  0xb4   : > { %v838_v50 = vadd.f32 %v834_v49, %v668_v47  ;;  %v835_v56 = vpop.f32.mrf.mxu0 }
  0xb6   : > { %v844_v54 = vadd.f32 %v1223_v51, %v838_v50 }
  0xb8   : > { %v665_v55 = vpop.f32.mrf.mxu2  ;;  %v848_v60 = vmul.f32 0.2, %v844_v54  ;;  %vm846_vm1 = vcmp.gt.f32.partialorder %v844_v54, 0.0 }
  0xb9   : > { %v669_v57 = vadd.f32 %v665_v55, %v580_v53  ;;  %v821_v58 = vpop.f32.mrf.mxu3 }
  0xba   : > { %v836_v59 = vadd.f32 %v835_v56, %v821_v58  ;;  %v850_v63 = vsel %vm846_vm1, %v844_v54, %v848_v60 }
  0xbb   : > { %v852_v2 = vsel %vm518_vm0, %v850_v63, -inf }
  0xbc   : > { %v839_v61 = vadd.f32 %v836_v59, %v669_v57 }
  0xbe   : > { %v845_v62 = vadd.f32 %v1223_v51, %v839_v61 }
  0xc0   : > { %vm847_vm2 = vcmp.gt.f32.partialorder %v845_v62, 0.0  ;;  %v849_v0 = vmul.f32 0.2, %v845_v62 }
  0xc2   : > { %v851_v1 = vsel %vm847_vm2, %v845_v62, %v849_v0 }
  0xc3   : > { %v853_v3 = vsel %vm518_vm0, %v851_v1, -inf }
  0xc4   : > { %v854_v4 = vmax.f32 %v852_v2, %v853_v3 }
  0xc6   : > { %v855_v5 = vrot.slane %v854_v4, 4 }
  0xc8   : > { %v856_v6 = vmax.f32 %v854_v4, %v855_v5 }
  0xca   : > { %v857_v7 = vrot.slane %v856_v6, 2 }
  0xcc   : > { %v858_v8 = vmax.f32 %v856_v6, %v857_v7 }
  0xce   : > { %v859_v9 = vrot.slane %v858_v8, 1 }
  0xd0   : > { %v860_v10 = vmax.f32 %v858_v8, %v859_v9 }
  0xd2   : > { %866 = vst.msk [vmem:[%s467_s29] sm:$0x1] %vm865_vm3, %v860_v10 }
  0xd3 PF: > { %s19_s11 = sadd.s32 1, %s1246_s11   ;;  %s1463_s30 = smov %s1242_s10 }
  0xd4   : > { %p16_p5 = scmp.ge.s32.totalorder %s19_s11, 4   ;;  %s1464_s10 = smov %s1466_s12 }
  0xd6   :  { %18 = sbr.rel (!%p16_p5) target bundleno = 2 (0x2), region = 103 }

// kernel: dgcnn_cls_encoder.19
= control target key start
LH: loop header
LB: loop body
LE: loop exit
PB: predicated region body
PF: predicated region fallthrough
CT: control target
= control target key end

     0   :  { %s4372_s0 = inlined_call_operand.vmem [shape: bf16[2,16,64], index: 0, kind: input, shape index: {}]   ;;  %s4373_s1 = inlined_call_operand.vmem [shape: bf16[2,16,64], index: 1, kind: input, shape index: {}]   ;;  %s4374_s2 = inlined_call_operand.vmem [shape: bf16[2,16,128], index: 2, kind: input, shape index: {}]   ;;  %s4375_s3 = inlined_call_operand.vmem [shape: bf16[2,16,256], index: 3, kind: input, shape index: {}]   ;;  %s4376_s4 = inlined_call_operand.vmem [shape: f32[2,1,512], index: 4, kind: input, shape index: {}]   ;;  %s4377_s5 = inlined_call_operand.vmem [shape: bf16[64,512], index: 5, kind: input, shape index: {}]   ;;  %s4378_s6 = inlined_call_operand.vmem [shape: bf16[64,512], index: 6, kind: input, shape index: {}]   ;;  %s4379_s7 = inlined_call_operand.vmem [shape: bf16[128,512], index: 7, kind: input, shape index: {}]   ;;  %s4380_s8 = inlined_call_operand.vmem [shape: bf16[256,512], index: 8, kind: input, shape index: {}]   ;;  %s4381_s9 = inlined_call_operand.vmem [shape: f32[1,512], index: 9, kind: input, shape index: {}]   ;;  %s4382_s10 = inlined_call_operand.vmem [shape: bf16[512,32], index: 10, kind: input, shape index: {}]   ;;  %s4383_s11 = inlined_call_operand.vmem [shape: f32[1,32], index: 11, kind: input, shape index: {}]   ;;  %s4384_s12 = inlined_call_operand.hbm [shape: f32[2,16,32], index: 12, kind: output, shape index: {}]  }
   0x1   :  { %4388 = sst [smem:[#allocation9_spill]] %s4372_s0 }
   0x2   :  { %4389 = sst [smem:[#allocation10_spill]] %s4373_s1 }
   0x3   :  { %4390 = sst [smem:[#allocation11_spill]] %s4378_s6 }
   0x4   :  { %17 = vsyncpa [#allocation3], 0 }
   0x5   :  { %19 = vsyncpa [#allocation3 + $0x1], 0  ;;  %s3295_s21 = smov 0   ;;  %s3297_s22 = smov 0  }
   0x6   :  { %s3299_s23 = smov 0   ;;  %s3301_s24 = smov 0  }
   0x7   :  { %s3303_s25 = smov 0   ;;  %s3305_s26 = smov 0  }
   0x8 LB: > { %4391 = sst [smem:[#allocation5_spill]] %s3214_s23  ;;  %s2232_s27 = sadd.s32 4294967295, %s3226_s26   ;;  %s3226_s26 = sphi %s3305_s26, %s25_s26   ;;  %s3222_s25 = sphi %s3303_s25, %s4403_s25   ;;  %s3218_s24 = sphi %s3301_s24, %s4402_s24   ;;  %s3214_s23 = sphi %s3299_s23, %s4401_s23   ;;  %s3210_s22 = sphi %s3297_s22, %s4405_s22   ;;  %s3206_s21 = sphi %s3295_s21, %s4404_s21  }
   0x9   : > { %4392 = sst [smem:[#allocation6_spill]] %s3222_s25  ;;  %s2233_s28 = sadd.s32 4294967294, %s3226_s26  }
   0xa   : > { %s37_s29 = sadd.s32 1, %s3222_s25  ;;  %s331_s30 = sadd.s32 1, %s3214_s23 }
   0xb   : > { %p39_p0 = scmp.ge.s32.totalorder %s37_s29, 2  ;;  %p341_p1 = scmp.ne.s32.totalorder %s3214_s23, %s3210_s22 }
   0xc   : > { %p342_p2 = scmp.eq.s32.totalorder %s2232_s27, 1  ;;  %p347_p3 = scmp.ne.s32.totalorder %s3210_s22, %s3206_s21 }
   0xd   : > { %s4407_s29 = smov (%p39_p0, %s37_s29), 0  ;;  %p348_p5 = scmp.eq.s32.totalorder %s2233_s28, 1 }
   0xe   : > { %4393 = sst [smem:[#allocation7_spill]] %s4407_s29  ;;  %p3335_p4 = por %p342_p2, %p341_p1 }
   0xf   : > { %s326_s14 = ssub.s32 %s3222_s25, %s4407_s29  ;;  %p2236_p6 = scmp.ge.s32.totalorder %s3226_s26, 1 }
  0x10   : > { %p329_p7 = scmp.eq.s32.totalorder %s326_s14, 0  ;;  %p3342_p8 = por %p348_p5, %p347_p3 }
  0x11   : > { %p447_p9 = scmp.lt.s32.totalorder %s3226_s26, 3 }
  0x12   : > { %s3348_s16 = scalar_select %p329_p7, %s3214_s23, %s331_s30  }
  0x13   : > { %p448_p10 = pnand %p2236_p6, %p447_p9 }
  0x14   : > { %4396 = sst [smem:[#allocation8_spill]] %s3348_s16  ;;  %p526_p11 = scmp.lt.s32.totalorder (!%p448_p10), %s3218_s24, 1 }
  0x15   : > { %451 = sbr.rel (%p448_p10) target bundleno = 461 (0x1cd), region = 68  ;;  %s4397_s6 = sld [smem:[#allocation11_spill]] (!%p448_p10) }
  0x16   : > { %s4398_s1 = sld [smem:[#allocation10_spill]] (!%p448_p10)  ;;  %s522_s14 = sand.u32 (!%p448_p10), 1, %s3210_s22  }
  0x17   : > { %s4399_s0 = sld [smem:[#allocation9_spill]] (!%p448_p10)  ;;  %s3089_s30 = sshll.u32 (!%p448_p10), %s3218_s24, 4 }
  0x18   : > { %s2080_s18 = scalar_lea.hbm (!%p448_p10), %s4384_s12, %s3089_s30 }
  0x19   : > { %s2083_s29 = sshll.u32 (!%p448_p10), %s2080_s18, 4  ;;  %s2084_s29 = int_to_ptr.hbm [resolvable:$true] %s2083_s29 }
  0x1a   : > { %v2373_v44 = vld [vmem:[%s4377_s5 + $0x60] sm:$0xf]  ;;  %v2939_v46 = vld [vmem:[%s4377_s5 + $0x6c] sm:$0xf0]  ;;  %v2937_v47 = vld [vmem:[%s4377_s5 + $0x64] sm:$0xf] }
  0x1b   : > { %v2301_v0 = vld [vmem:[%s4397_s6 + $0x60] sm:$0xf]  ;;  %v2956_v1 = vld [vmem:[%s4397_s6 + $0x6c] sm:$0xf0]  ;;  %v2954_v2 = vld [vmem:[%s4397_s6 + $0x64] sm:$0xf]  ;;  %v2374_v55 = vor.u32 %v2939_v46, %v2373_v44 }
  0x1c   : > { %v2302_v3 = vor.u32 %v2956_v1, %v2301_v0  ;;  %v2303_v4 = vld [vmem:[%s4397_s6 + $0x70] sm:$0xf0]  ;;  %v2309_v5 = vld [vmem:[%s4397_s6 + $0x68] sm:$0xf]  ;;  %v2957_v6 = vld [vmem:[%s4397_s6 + $0x74] sm:$0xf0] }
  0x1d   : > { %v2306_v7 = vor.u32 %v2954_v2, %v2303_v4  ;;  %v2310_v8 = vor.u32 %v2957_v6, %v2309_v5  ;;  %v2955_v9 = vld [vmem:[%s4397_s6 + $0x6c] sm:$0xf]  ;;  %v2311_v10 = vld [vmem:[%s4397_s6 + $0x78] sm:$0xf0]  ;;  %v2285_v11 = vld [vmem:[%s4397_s6 + $0x40] sm:$0xf] }
  0x1e   : > { %701 = vmatpush.bf16.msra.mxu0 %v2302_v3  ;;  %v2314_v12 = vor.u32 %v2955_v9, %v2311_v10  ;;  %v2952_v13 = vld [vmem:[%s4397_s6 + $0x4c] sm:$0xf0]  ;;  %v2950_v14 = vld [vmem:[%s4397_s6 + $0x44] sm:$0xf]  ;;  %v2287_v15 = vld [vmem:[%s4397_s6 + $0x50] sm:$0xf0] }
  0x1f   : > { %715 = vmatpush.bf16.msra.mxu1 %v2306_v7  ;;  %729 = vmatpush.bf16.msra.mxu2 %v2310_v8  ;;  %v2286_v16 = vor.u32 %v2952_v13, %v2285_v11  ;;  %v2290_v17 = vor.u32 %v2950_v14, %v2287_v15  ;;  %v2293_v18 = vld [vmem:[%s4397_s6 + $0x48] sm:$0xf]  ;;  %v2953_v19 = vld [vmem:[%s4397_s6 + $0x54] sm:$0xf0]  ;;  %v2951_v20 = vld [vmem:[%s4397_s6 + $0x4c] sm:$0xf] }
  0x20   : > { %743 = vmatpush.bf16.msra.mxu3 %v2314_v12  ;;  %v2294_v21 = vor.u32 %v2953_v19, %v2293_v18  ;;  %v2295_v22 = vld [vmem:[%s4397_s6 + $0x58] sm:$0xf0]  ;;  %v2269_v23 = vld [vmem:[%s4397_s6 + $0x20] sm:$0xf]  ;;  %v2948_v24 = vld [vmem:[%s4397_s6 + $0x2c] sm:$0xf0] }
  0x21   : > { %v2298_v25 = vor.u32 %v2951_v20, %v2295_v22  ;;  %v2946_v26 = vld [vmem:[%s4397_s6 + $0x24] sm:$0xf]  ;;  %v2271_v27 = vld [vmem:[%s4397_s6 + $0x30] sm:$0xf0]  ;;  %v2277_v28 = vld [vmem:[%s4397_s6 + $0x28] sm:$0xf]  ;;  %v2270_v29 = vor.u32 %v2948_v24, %v2269_v23 }
  0x22   : > { %702 = vmatpush.bf16.msra.mxu0 %v2286_v16  ;;  %v2949_v30 = vld [vmem:[%s4397_s6 + $0x34] sm:$0xf0]  ;;  %v2947_v31 = vld [vmem:[%s4397_s6 + $0x2c] sm:$0xf]  ;;  %v2279_v32 = vld [vmem:[%s4397_s6 + $0x38] sm:$0xf0]  ;;  %v2274_v33 = vor.u32 %v2946_v26, %v2271_v27 }
  0x23   : > { %716 = vmatpush.bf16.msra.mxu1 %v2290_v17  ;;  %730 = vmatpush.bf16.msra.mxu2 %v2294_v21  ;;  %v2278_v34 = vor.u32 %v2949_v30, %v2277_v28  ;;  %v2253_v35 = vld [vmem:[%s4397_s6] sm:$0xf]  ;;  %v2944_v36 = vld [vmem:[%s4397_s6 + $0xc] sm:$0xf0]  ;;  %v2942_v37 = vld [vmem:[%s4397_s6 + $0x4] sm:$0xf]  ;;  %v2282_v38 = vor.u32 %v2947_v31, %v2279_v32 }
  0x24   : > { %744 = vmatpush.bf16.msra.mxu3 %v2298_v25  ;;  %v2255_v39 = vld [vmem:[%s4397_s6 + $0x10] sm:$0xf0]  ;;  %v2261_v40 = vld [vmem:[%s4397_s6 + $0x8] sm:$0xf]  ;;  %v2945_v41 = vld [vmem:[%s4397_s6 + $0x14] sm:$0xf0]  ;;  %v2254_v45 = vor.u32 %v2944_v36, %v2253_v35 }
  0x25   : > { %v2943_v42 = vld [vmem:[%s4397_s6 + $0xc] sm:$0xf]  ;;  %v2263_v43 = vld [vmem:[%s4397_s6 + $0x18] sm:$0xf0]  ;;  %v2375_v48 = vld [vmem:[%s4377_s5 + $0x70] sm:$0xf0]  ;;  %v2258_v49 = vor.u32 %v2942_v37, %v2255_v39  ;;  %v2262_v50 = vor.u32 %v2945_v41, %v2261_v40 }
  0x26   : > { %703 = vmatpush.bf16.msra.mxu0 %v2270_v29  ;;  %v2381_v51 = vld [vmem:[%s4377_s5 + $0x68] sm:$0xf]  ;;  %v2940_v52 = vld [vmem:[%s4377_s5 + $0x74] sm:$0xf0]  ;;  %v2938_v53 = vld [vmem:[%s4377_s5 + $0x6c] sm:$0xf]  ;;  %v2266_v54 = vor.u32 %v2943_v42, %v2263_v43  ;;  %v2378_v57 = vor.u32 %v2937_v47, %v2375_v48 }
  0x27   : > { %717 = vmatpush.bf16.msra.mxu1 %v2274_v33  ;;  %731 = vmatpush.bf16.msra.mxu2 %v2278_v34  ;;  %v2383_v56 = vld [vmem:[%s4377_s5 + $0x78] sm:$0xf0]  ;;  %v2382_v58 = vor.u32 %v2940_v52, %v2381_v51  ;;  %v2357_v59 = vld [vmem:[%s4377_s5 + $0x40] sm:$0xf]  ;;  %s3475_s20 = scalar_select %p526_p11, %s3218_s24, 1  ;;  %vm693_vm0 = vcmask 523264  }
  0x28   : > { %745 = vmatpush.bf16.msra.mxu3 %v2282_v38  ;;  %v2386_v60 = vor.u32 %v2938_v53, %v2383_v56  ;;  %v2935_v61 = vld [vmem:[%s4377_s5 + $0x4c] sm:$0xf0]  ;;  %v2933_v62 = vld [vmem:[%s4377_s5 + $0x44] sm:$0xf]  ;;  %v2359_v63 = vld [vmem:[%s4377_s5 + $0x50] sm:$0xf0] }
  0x29   : > { %v2365_v0 = vld [vmem:[%s4377_s5 + $0x48] sm:$0xf]  ;;  %v2936_v1 = vld [vmem:[%s4377_s5 + $0x54] sm:$0xf0]  ;;  %s3493_s19 = sshll.u32 %s3475_s20, 3  ;;  %v2358_v5 = vor.u32 %v2935_v61, %v2357_v59  ;;  %v2362_v6 = vor.u32 %v2933_v62, %v2359_v63  ;;  %vm2063_vm10 = vcmask 261120  }
  0x2a   : > { %704 = vmatpush.bf16.msra.mxu0 %v2254_v45  ;;  %v2934_v2 = vld [vmem:[%s4377_s5 + $0x4c] sm:$0xf]  ;;  %v2367_v3 = vld [vmem:[%s4377_s5 + $0x58] sm:$0xf0]  ;;  %s543_s16 = scalar_lea.vmem %s4398_s1, %s3493_s19  ;;  %v2341_v7 = vld [vmem:[%s4377_s5 + $0x20] sm:$0xf]  ;;  %v2366_v9 = vor.u32 %v2936_v1, %v2365_v0  ;;  %s533_s23 = scalar_lea.vmem %s4399_s0, %s3493_s19 }
  0x2b   : > { %718 = vmatpush.bf16.msra.mxu1 %v2258_v49  ;;  %732 = vmatpush.bf16.msra.mxu2 %v2262_v50  ;;  %v2941_v4 = vld [vmem:[%s543_s16] sm:$0xff]  ;;  %v2931_v8 = vld [vmem:[%s4377_s5 + $0x2c] sm:$0xf0]  ;;  %v2370_v10 = vor.u32 %v2934_v2, %v2367_v3  ;;  %v2343_v12 = vld [vmem:[%s4377_s5 + $0x30] sm:$0xf0]  ;;  %s553_s17 = scalar_lea.vmem %s4374_s2, %s3493_s19  ;;  %s2923_s1 = sshll.u32 %s3475_s20, 4 }
  0x2c   : > { %746 = vmatpush.bf16.msra.mxu3 %v2266_v54  ;;  %v2929_v11 = vld [vmem:[%s4377_s5 + $0x24] sm:$0xf]  ;;  %v2349_v13 = vld [vmem:[%s4377_s5 + $0x28] sm:$0xf]  ;;  %v2932_v14 = vld [vmem:[%s4377_s5 + $0x34] sm:$0xf0]  ;;  %v2342_v18 = vor.u32 %v2931_v8, %v2341_v7 }
  0x2d   : > { %2315 = vmatmul.msk.bf16.vlgmr.msra.gmra.mxu0 %vm693_vm0, %v2941_v4  ;;  %v2930_v15 = vld [vmem:[%s4377_s5 + $0x2c] sm:$0xf]  ;;  %v2351_v16 = vld [vmem:[%s4377_s5 + $0x38] sm:$0xf0]  ;;  %v2325_v17 = vld [vmem:[%s4377_s5] sm:$0xf]  ;;  %v2346_v19 = vor.u32 %v2929_v11, %v2343_v12  ;;  %v2350_v23 = vor.u32 %v2932_v14, %v2349_v13 }
  0x2e   : > { %845 = vmatpush.bf16.msrb.mxu0 %v2374_v55  ;;  %2316 = vmatmul.msk.bf16.vlgmr.msra.gmra.mxu1 %vm693_vm0, %v2941_v4  ;;  %v2927_v20 = vld [vmem:[%s4377_s5 + $0xc] sm:$0xf0]  ;;  %v2925_v21 = vld [vmem:[%s4377_s5 + $0x4] sm:$0xf]  ;;  %v2327_v22 = vld [vmem:[%s4377_s5 + $0x10] sm:$0xf0]  ;;  %v2354_v24 = vor.u32 %v2930_v15, %v2351_v16 }
  0x2f   : > { %859 = vmatpush.bf16.msrb.mxu1 %v2378_v57  ;;  %873 = vmatpush.bf16.msrb.mxu2 %v2382_v58  ;;  %v2333_v25 = vld [vmem:[%s4377_s5 + $0x8] sm:$0xf]  ;;  %v2928_v26 = vld [vmem:[%s4377_s5 + $0x14] sm:$0xf0]  ;;  %v2926_v27 = vld [vmem:[%s4377_s5 + $0xc] sm:$0xf]  ;;  %v2326_v34 = vor.u32 %v2927_v20, %v2325_v17  ;;  %v2330_v35 = vor.u32 %v2925_v21, %v2327_v22 }
  0x30   : > { %887 = vmatpush.bf16.msrb.mxu3 %v2386_v60  ;;  %2317 = vmatmul.msk.bf16.vlgmr.msra.gmra.mxu2 %vm693_vm0, %v2941_v4  ;;  %v2335_v28 = vld [vmem:[%s4377_s5 + $0x18] sm:$0xf0]  ;;  %v2509_v29 = vld [vmem:[%s4379_s7 + $0xe0] sm:$0xf]  ;;  %v2989_v30 = vld [vmem:[%s4379_s7 + $0xec] sm:$0xf0]  ;;  %v2334_v39 = vor.u32 %v2928_v26, %v2333_v25 }
  0x31   : > { %2318 = vmatmul.msk.bf16.vlgmr.msra.gmra.mxu3 %vm693_vm0, %v2941_v4  ;;  %v2987_v31 = vld [vmem:[%s4379_s7 + $0xe4] sm:$0xf]  ;;  %v2511_v32 = vld [vmem:[%s4379_s7 + $0xf0] sm:$0xf0]  ;;  %v2517_v33 = vld [vmem:[%s4379_s7 + $0xe8] sm:$0xf]  ;;  %v2338_v40 = vor.u32 %v2926_v27, %v2335_v28  ;;  %v2510_v41 = vor.u32 %v2989_v30, %v2509_v29 }
  0x32   : > { %846 = vmatpush.bf16.msrb.mxu0 %v2358_v5  ;;  %v2990_v36 = vld [vmem:[%s4379_s7 + $0xf4] sm:$0xf0]  ;;  %v2988_v37 = vld [vmem:[%s4379_s7 + $0xec] sm:$0xf]  ;;  %v2519_v38 = vld [vmem:[%s4379_s7 + $0xf8] sm:$0xf0]  ;;  %v2514_v42 = vor.u32 %v2987_v31, %v2511_v32 }
  0x33   : > { %860 = vmatpush.bf16.msrb.mxu1 %v2362_v6  ;;  %874 = vmatpush.bf16.msrb.mxu2 %v2366_v9  ;;  %v2493_v43 = vld [vmem:[%s4379_s7 + $0xc0] sm:$0xf]  ;;  %v2985_v44 = vld [vmem:[%s4379_s7 + $0xcc] sm:$0xf0]  ;;  %v2518_v45 = vor.u32 %v2990_v36, %v2517_v33  ;;  %v2522_v46 = vor.u32 %v2988_v37, %v2519_v38  ;;  %v2983_v47 = vld [vmem:[%s4379_s7 + $0xc4] sm:$0xf] }
  0x34   : > { %888 = vmatpush.bf16.msrb.mxu3 %v2370_v10  ;;  %v2495_v48 = vld [vmem:[%s4379_s7 + $0xd0] sm:$0xf0]  ;;  %v2501_v49 = vld [vmem:[%s4379_s7 + $0xc8] sm:$0xf]  ;;  %v2986_v50 = vld [vmem:[%s4379_s7 + $0xd4] sm:$0xf0]  ;;  %v2494_v53 = vor.u32 %v2985_v44, %v2493_v43 }
  0x35   : > { %v2984_v51 = vld [vmem:[%s4379_s7 + $0xcc] sm:$0xf]  ;;  %v2503_v52 = vld [vmem:[%s4379_s7 + $0xd8] sm:$0xf0]  ;;  %v2498_v54 = vor.u32 %v2983_v47, %v2495_v48  ;;  %v2924_v55 = vld [vmem:[%s533_s23] sm:$0xff]  ;;  %v2502_v58 = vor.u32 %v2986_v50, %v2501_v49  ;;  %s564_s23 = scalar_lea.vmem %s4375_s3, %s2923_s1  ;;  %s2246_s1 = sshll.u32 %s3475_s20, 2 }
  0x36   : > { %847 = vmatpush.bf16.msrb.mxu0 %v2342_v18  ;;  %v2477_v56 = vld [vmem:[%s4379_s7 + $0xa0] sm:$0xf]  ;;  %v2981_v57 = vld [vmem:[%s4379_s7 + $0xac] sm:$0xf0]  ;;  %v2506_v59 = vor.u32 %v2984_v51, %v2503_v52  ;;  %v2979_v60 = vld [vmem:[%s4379_s7 + $0xa4] sm:$0xf]  ;;  %s569_s16 = scalar_lea.vmem %s4376_s4, %s2246_s1 }
  0x37   : > { %861 = vmatpush.bf16.msrb.mxu1 %v2346_v19  ;;  %875 = vmatpush.bf16.msrb.mxu2 %v2350_v23  ;;  %v2479_v61 = vld [vmem:[%s4379_s7 + $0xb0] sm:$0xf0]  ;;  %v2485_v62 = vld [vmem:[%s4379_s7 + $0xa8] sm:$0xf]  ;;  %v2982_v63 = vld [vmem:[%s4379_s7 + $0xb4] sm:$0xf0]  ;;  %v2478_v2 = vor.u32 %v2981_v57, %v2477_v56 }
  0x38   : > { %889 = vmatpush.bf16.msrb.mxu3 %v2354_v24  ;;  %v2980_v0 = vld [vmem:[%s4379_s7 + $0xac] sm:$0xf]  ;;  %v2487_v1 = vld [vmem:[%s4379_s7 + $0xb8] sm:$0xf0]  ;;  %v2482_v3 = vor.u32 %v2979_v60, %v2479_v61  ;;  %v2461_v4 = vld [vmem:[%s4379_s7 + $0x80] sm:$0xf]  ;;  %v2486_v6 = vor.u32 %v2982_v63, %v2485_v62 }
  0x39   : > { %v2977_v5 = vld [vmem:[%s4379_s7 + $0x8c] sm:$0xf0]  ;;  %v2490_v7 = vor.u32 %v2980_v0, %v2487_v1  ;;  %v2975_v8 = vld [vmem:[%s4379_s7 + $0x84] sm:$0xf]  ;;  %v2463_v9 = vld [vmem:[%s4379_s7 + $0x90] sm:$0xf0] }
  0x3a   : > { %848 = vmatpush.bf16.msrb.mxu0 %v2326_v34  ;;  %v2469_v10 = vld [vmem:[%s4379_s7 + $0x88] sm:$0xf]  ;;  %v2978_v11 = vld [vmem:[%s4379_s7 + $0x94] sm:$0xf0]  ;;  %v2976_v12 = vld [vmem:[%s4379_s7 + $0x8c] sm:$0xf]  ;;  %v2462_v14 = vor.u32 %v2977_v5, %v2461_v4  ;;  %v2466_v15 = vor.u32 %v2975_v8, %v2463_v9 }
  0x3b   : > { %862 = vmatpush.bf16.msrb.mxu1 %v2330_v35  ;;  %876 = vmatpush.bf16.msrb.mxu2 %v2334_v39  ;;  %v2471_v13 = vld [vmem:[%s4379_s7 + $0x98] sm:$0xf0]  ;;  %v2445_v16 = vld [vmem:[%s4379_s7 + $0x60] sm:$0xf]  ;;  %v2973_v17 = vld [vmem:[%s4379_s7 + $0x6c] sm:$0xf0]  ;;  %v2470_v18 = vor.u32 %v2978_v11, %v2469_v10 }
  0x3c   : > { %890 = vmatpush.bf16.msrb.mxu3 %v2338_v40  ;;  %v2474_v19 = vor.u32 %v2976_v12, %v2471_v13  ;;  %v2971_v20 = vld [vmem:[%s4379_s7 + $0x64] sm:$0xf]  ;;  %v2447_v21 = vld [vmem:[%s4379_s7 + $0x70] sm:$0xf0]  ;;  %v2453_v22 = vld [vmem:[%s4379_s7 + $0x68] sm:$0xf]  ;;  %v2446_v26 = vor.u32 %v2973_v17, %v2445_v16 }
  0x3d   : > { %2387 = vmatmul.msk.bf16.vlgmr.msrb.gmra.mxu0 %vm693_vm0, %v2924_v55  ;;  %v2974_v23 = vld [vmem:[%s4379_s7 + $0x74] sm:$0xf0]  ;;  %v2972_v24 = vld [vmem:[%s4379_s7 + $0x6c] sm:$0xf]  ;;  %v2455_v25 = vld [vmem:[%s4379_s7 + $0x78] sm:$0xf0]  ;;  %v2450_v27 = vor.u32 %v2971_v20, %v2447_v21 }
  0x3e   : > { %1097 = vmatpush.bf16.msra.mxu0 %v2510_v41  ;;  %2388 = vmatmul.msk.bf16.vlgmr.msrb.gmra.mxu1 %vm693_vm0, %v2924_v55  ;;  %v2429_v28 = vld [vmem:[%s4379_s7 + $0x40] sm:$0xf]  ;;  %v2969_v29 = vld [vmem:[%s4379_s7 + $0x4c] sm:$0xf0]  ;;  %v2454_v30 = vor.u32 %v2974_v23, %v2453_v22  ;;  %v2458_v31 = vor.u32 %v2972_v24, %v2455_v25  ;;  %v2967_v32 = vld [vmem:[%s4379_s7 + $0x44] sm:$0xf] }
  0x3f   : > { %1111 = vmatpush.bf16.msra.mxu1 %v2514_v42  ;;  %1125 = vmatpush.bf16.msra.mxu2 %v2518_v45  ;;  %v2431_v33 = vld [vmem:[%s4379_s7 + $0x50] sm:$0xf0]  ;;  %v2437_v34 = vld [vmem:[%s4379_s7 + $0x48] sm:$0xf]  ;;  %v2970_v35 = vld [vmem:[%s4379_s7 + $0x54] sm:$0xf0]  ;;  %v2430_v38 = vor.u32 %v2969_v29, %v2429_v28 }
  0x40   : > { %1139 = vmatpush.bf16.msra.mxu3 %v2522_v46  ;;  %2389 = vmatmul.msk.bf16.vlgmr.msrb.gmra.mxu2 %vm693_vm0, %v2924_v55  ;;  %v2968_v36 = vld [vmem:[%s4379_s7 + $0x4c] sm:$0xf]  ;;  %v2439_v37 = vld [vmem:[%s4379_s7 + $0x58] sm:$0xf0]  ;;  %v2434_v39 = vor.u32 %v2967_v32, %v2431_v33  ;;  %v2413_v40 = vld [vmem:[%s4379_s7 + $0x20] sm:$0xf]  ;;  %v2438_v42 = vor.u32 %v2970_v35, %v2437_v34 }
  0x41   : > { %2390 = vmatmul.msk.bf16.vlgmr.msrb.gmra.mxu3 %vm693_vm0, %v2924_v55  ;;  %v2965_v41 = vld [vmem:[%s4379_s7 + $0x2c] sm:$0xf0]  ;;  %v2442_v43 = vor.u32 %v2968_v36, %v2439_v37  ;;  %v2963_v44 = vld [vmem:[%s4379_s7 + $0x24] sm:$0xf]  ;;  %v2415_v45 = vld [vmem:[%s4379_s7 + $0x30] sm:$0xf0] }
  0x42   : > { %1098 = vmatpush.bf16.msra.mxu0 %v2494_v53  ;;  %v2421_v46 = vld [vmem:[%s4379_s7 + $0x28] sm:$0xf]  ;;  %v2966_v47 = vld [vmem:[%s4379_s7 + $0x34] sm:$0xf0]  ;;  %v2964_v48 = vld [vmem:[%s4379_s7 + $0x2c] sm:$0xf]  ;;  %v2414_v51 = vor.u32 %v2965_v41, %v2413_v40  ;;  %v2418_v52 = vor.u32 %v2963_v44, %v2415_v45 }
  0x43   : > { %1112 = vmatpush.bf16.msra.mxu1 %v2498_v54  ;;  %1126 = vmatpush.bf16.msra.mxu2 %v2502_v58  ;;  %v2423_v49 = vld [vmem:[%s4379_s7 + $0x38] sm:$0xf0]  ;;  %v2397_v50 = vld [vmem:[%s4379_s7] sm:$0xf]  ;;  %v2961_v53 = vld [vmem:[%s4379_s7 + $0xc] sm:$0xf0]  ;;  %v2422_v56 = vor.u32 %v2966_v47, %v2421_v46 }
  0x44   : > { %1140 = vmatpush.bf16.msra.mxu3 %v2506_v59  ;;  %v2959_v54 = vld [vmem:[%s4379_s7 + $0x4] sm:$0xf]  ;;  %v2399_v55 = vld [vmem:[%s4379_s7 + $0x10] sm:$0xf0]  ;;  %v2426_v57 = vor.u32 %v2964_v48, %v2423_v49  ;;  %v2405_v58 = vld [vmem:[%s4379_s7 + $0x8] sm:$0xf] }
  0x45   : > { %v2962_v59 = vld [vmem:[%s4379_s7 + $0x14] sm:$0xf0]  ;;  %v2960_v60 = vld [vmem:[%s4379_s7 + $0xc] sm:$0xf]  ;;  %v2407_v61 = vld [vmem:[%s4379_s7 + $0x18] sm:$0xf0]  ;;  %v2402_v4 = vor.u32 %v2959_v54, %v2399_v55 }
  0x46   : > { %1099 = vmatpush.bf16.msra.mxu0 %v2478_v2  ;;  %v2645_v62 = vld [vmem:[%s4380_s8 + $0xe0] sm:$0xf]  ;;  %v3023_v63 = vld [vmem:[%s4380_s8 + $0xec] sm:$0xf0]  ;;  %v3021_v2 = vld [vmem:[%s4380_s8 + $0xe4] sm:$0xf]  ;;  %v2406_v8 = vor.u32 %v2962_v59, %v2405_v58  ;;  %v2410_v9 = vor.u32 %v2960_v60, %v2407_v61 }
  0x47   : > { %1113 = vmatpush.bf16.msra.mxu1 %v2482_v3  ;;  %1127 = vmatpush.bf16.msra.mxu2 %v2486_v6  ;;  %v2773_v0 = vld [vmem:[%s4380_s8 + $0x1e0] sm:$0xf]  ;;  %v3055_v1 = vld [vmem:[%s4380_s8 + $0x1ec] sm:$0xf0]  ;;  %v2398_v3 = vor.u32 %v2961_v53, %v2397_v50  ;;  %v2647_v5 = vld [vmem:[%s4380_s8 + $0xf0] sm:$0xf0]  ;;  %v2646_v10 = vor.u32 %v3023_v63, %v2645_v62 }
  0x48   : > { %1141 = vmatpush.bf16.msra.mxu3 %v2490_v7  ;;  %v3053_v6 = vld [vmem:[%s4380_s8 + $0x1e4] sm:$0xf]  ;;  %v2775_v7 = vld [vmem:[%s4380_s8 + $0x1f0] sm:$0xf0]  ;;  %v2774_v11 = vor.u32 %v3055_v1, %v2773_v0  ;;  %v2629_v13 = vld [vmem:[%s4380_s8 + $0xc0] sm:$0xf] }
  0x49   : > { %v2958_v12 = vld [vmem:[%s553_s17] sm:$0xff]  ;;  %v2778_v16 = vor.u32 %v3053_v6, %v2775_v7  ;;  %v2631_v20 = vld [vmem:[%s4380_s8 + $0xd0] sm:$0xf0]  ;;  %v3007_v50 = vld [vmem:[%s4380_s8 + $0x6c] sm:$0xf0]  ;;  %s2067_s24 = scalar_lea.sflag [#allocation3], %s522_s14 }
  0x4a   : > { %1100 = vmatpush.bf16.msra.mxu0 %v2462_v14  ;;  %v3019_v14 = vld [vmem:[%s4380_s8 + $0xcc] sm:$0xf0]  ;;  %v2757_v17 = vld [vmem:[%s4380_s8 + $0x1c0] sm:$0xf]  ;;  %v3049_v21 = vld [vmem:[%s4380_s8 + $0x1c4] sm:$0xf] }
  0x4b   : > { %1114 = vmatpush.bf16.msra.mxu1 %v2466_v15  ;;  %1128 = vmatpush.bf16.msra.mxu2 %v2470_v18  ;;  %v2650_v15 = vor.u32 %v3021_v2, %v2647_v5  ;;  %v3051_v18 = vld [vmem:[%s4380_s8 + $0x1cc] sm:$0xf0]  ;;  %v2759_v22 = vld [vmem:[%s4380_s8 + $0x1d0] sm:$0xf0]  ;;  %v2630_v23 = vor.u32 %v3019_v14, %v2629_v13  ;;  %v2613_v25 = vld [vmem:[%s4380_s8 + $0xa0] sm:$0xf] }
  0x4c   : > { %1142 = vmatpush.bf16.msra.mxu3 %v2474_v19  ;;  %v3017_v19 = vld [vmem:[%s4380_s8 + $0xc4] sm:$0xf]  ;;  %v2758_v24 = vor.u32 %v3051_v18, %v2757_v17  ;;  %v2762_v28 = vor.u32 %v3049_v21, %v2759_v22  ;;  %v2741_v29 = vld [vmem:[%s4380_s8 + $0x1a0] sm:$0xf]  ;;  %v2615_v32 = vld [vmem:[%s4380_s8 + $0xb0] sm:$0xf0] }
  0x4d   : > { %v3045_v33 = vld [vmem:[%s4380_s8 + $0x1a4] sm:$0xf]  ;;  %v2743_v34 = vld [vmem:[%s4380_s8 + $0x1b0] sm:$0xf0]  ;;  %v2597_v37 = vld [vmem:[%s4380_s8 + $0x80] sm:$0xf] }
  0x4e   : > { %1101 = vmatpush.bf16.msra.mxu0 %v2446_v26  ;;  %v3015_v26 = vld [vmem:[%s4380_s8 + $0xac] sm:$0xf0]  ;;  %v2746_v40 = vor.u32 %v3045_v33, %v2743_v34  ;;  %v2725_v41 = vld [vmem:[%s4380_s8 + $0x180] sm:$0xf]  ;;  %v2599_v44 = vld [vmem:[%s4380_s8 + $0x90] sm:$0xf0] }
  0x4f   : > { %1115 = vmatpush.bf16.msra.mxu1 %v2450_v27  ;;  %1129 = vmatpush.bf16.msra.mxu2 %v2454_v30  ;;  %v2634_v27 = vor.u32 %v3017_v19, %v2631_v20  ;;  %v3047_v30 = vld [vmem:[%s4380_s8 + $0x1ac] sm:$0xf0]  ;;  %v2614_v35 = vor.u32 %v3015_v26, %v2613_v25  ;;  %v3041_v45 = vld [vmem:[%s4380_s8 + $0x184] sm:$0xf]  ;;  %v2727_v46 = vld [vmem:[%s4380_s8 + $0x190] sm:$0xf0] }
  0x50   : > { %1143 = vmatpush.bf16.msra.mxu3 %v2458_v31  ;;  %v3013_v31 = vld [vmem:[%s4380_s8 + $0xa4] sm:$0xf]  ;;  %v2742_v36 = vor.u32 %v3047_v30, %v2741_v29  ;;  %v2581_v49 = vld [vmem:[%s4380_s8 + $0x60] sm:$0xf]  ;;  %v3039_v54 = vld [vmem:[%s4380_s8 + $0x16c] sm:$0xf0] }
  0x51   : > { %v2709_v53 = vld [vmem:[%s4380_s8 + $0x160] sm:$0xf]  ;;  %v3005_v55 = vld [vmem:[%s4380_s8 + $0x64] sm:$0xf]  ;;  %v2711_v58 = vld [vmem:[%s4380_s8 + $0x170] sm:$0xf0]  ;;  %v2582_v59 = vor.u32 %v3007_v50, %v2581_v49 }
  0x52   : > { %1102 = vmatpush.bf16.msra.mxu0 %v2430_v38  ;;  %v3011_v38 = vld [vmem:[%s4380_s8 + $0x8c] sm:$0xf0]  ;;  %v2710_v60 = vor.u32 %v3039_v54, %v2709_v53  ;;  %v2565_v61 = vld [vmem:[%s4380_s8 + $0x40] sm:$0xf]  ;;  %v3033_v5 = vld [vmem:[%s4380_s8 + $0x144] sm:$0xf] }
  0x53   : > { %1116 = vmatpush.bf16.msra.mxu1 %v2434_v39  ;;  %1130 = vmatpush.bf16.msra.mxu2 %v2438_v42  ;;  %v2618_v39 = vor.u32 %v3013_v31, %v2615_v32  ;;  %v3043_v42 = vld [vmem:[%s4380_s8 + $0x18c] sm:$0xf0]  ;;  %v2598_v47 = vor.u32 %v3011_v38, %v2597_v37  ;;  %v2693_v1 = vld [vmem:[%s4380_s8 + $0x140] sm:$0xf]  ;;  %v2695_v6 = vld [vmem:[%s4380_s8 + $0x150] sm:$0xf0] }
  0x54   : > { %1144 = vmatpush.bf16.msra.mxu3 %v2442_v43  ;;  %v3009_v43 = vld [vmem:[%s4380_s8 + $0x84] sm:$0xf]  ;;  %v2726_v48 = vor.u32 %v3043_v42, %v2725_v41  ;;  %v3003_v62 = vld [vmem:[%s4380_s8 + $0x4c] sm:$0xf0]  ;;  %v2677_v13 = vld [vmem:[%s4380_s8 + $0x120] sm:$0xf] }
  0x55   : > { %v3035_v2 = vld [vmem:[%s4380_s8 + $0x14c] sm:$0xf0]  ;;  %v2566_v7 = vor.u32 %v3003_v62, %v2565_v61  ;;  %v3029_v17 = vld [vmem:[%s4380_s8 + $0x124] sm:$0xf]  ;;  %v2679_v18 = vld [vmem:[%s4380_s8 + $0x130] sm:$0xf0] }
  0x56   : > { %1103 = vmatpush.bf16.msra.mxu0 %v2414_v51  ;;  %v2602_v51 = vor.u32 %v3009_v43, %v2599_v44  ;;  %v3031_v14 = vld [vmem:[%s4380_s8 + $0x12c] sm:$0xf0]  ;;  %v2533_v19 = vld [vmem:[%s4380_s8] sm:$0xf]  ;;  %v2993_v25 = vld [vmem:[%s4380_s8 + $0x4] sm:$0xf] }
  0x57   : > { %1117 = vmatpush.bf16.msra.mxu1 %v2418_v52  ;;  %1131 = vmatpush.bf16.msra.mxu2 %v2422_v56  ;;  %v2730_v52 = vor.u32 %v3041_v45, %v2727_v46  ;;  %v2583_v56 = vld [vmem:[%s4380_s8 + $0x70] sm:$0xf0]  ;;  %v2995_v20 = vld [vmem:[%s4380_s8 + $0xc] sm:$0xf0]  ;;  %v2661_v21 = vld [vmem:[%s4380_s8 + $0x100] sm:$0xf] }
  0x58   : > { %1145 = vmatpush.bf16.msra.mxu3 %v2426_v57  ;;  %v3037_v57 = vld [vmem:[%s4380_s8 + $0x164] sm:$0xf]  ;;  %v2586_v63 = vor.u32 %v3005_v55, %v2583_v56  ;;  %v2535_v26 = vld [vmem:[%s4380_s8 + $0x10] sm:$0xf0]  ;;  %v2653_v31 = vld [vmem:[%s4380_s8 + $0xe8] sm:$0xf]  ;;  %v2534_v37 = vor.u32 %v2995_v20, %v2533_v19 }
  0x59   : > { %v2714_v0 = vor.u32 %v3037_v57, %v2711_v58  ;;  %v3025_v29 = vld [vmem:[%s4380_s8 + $0x104] sm:$0xf]  ;;  %v2663_v30 = vld [vmem:[%s4380_s8 + $0x110] sm:$0xf0]  ;;  %v3024_v32 = vld [vmem:[%s4380_s8 + $0xf4] sm:$0xf0]  ;;  %v2538_v42 = vor.u32 %v2993_v25, %v2535_v26 }
  0x5a   : > { %1104 = vmatpush.bf16.msra.mxu0 %v2398_v3  ;;  %v3001_v3 = vld [vmem:[%s4380_s8 + $0x44] sm:$0xf]  ;;  %v2781_v33 = vld [vmem:[%s4380_s8 + $0x1e8] sm:$0xf]  ;;  %v3056_v34 = vld [vmem:[%s4380_s8 + $0x1f4] sm:$0xf0]  ;;  %v2666_v43 = vor.u32 %v3025_v29, %v2663_v30 }
  0x5b   : > { %1118 = vmatpush.bf16.msra.mxu1 %v2402_v4  ;;  %1132 = vmatpush.bf16.msra.mxu2 %v2406_v8  ;;  %v2567_v4 = vld [vmem:[%s4380_s8 + $0x50] sm:$0xf0]  ;;  %v2694_v8 = vor.u32 %v3035_v2, %v2693_v1  ;;  %v2525_v41 = vld [vmem:[%s564_s23] sm:$0xf]  ;;  %v2992_v44 = vld [vmem:[%s564_s23 + $0x4] sm:$0xf0] }
  0x5c   : > { %1146 = vmatpush.bf16.msra.mxu3 %v2410_v9  ;;  %v2549_v9 = vld [vmem:[%s4380_s8 + $0x20] sm:$0xf]  ;;  %v2991_v45 = vld [vmem:[%s564_s23 + $0x4] sm:$0xf]  ;;  %v2527_v46 = vld [vmem:[%s564_s23 + $0x8] sm:$0xf0]  ;;  %v3996_v56 = vor.u32 %v2992_v44, %v2525_v41 }
  0x5d   : > { %1105 = vmatmul.bf16.vlgmr.msra.gmra.mxu0 %v2958_v12  ;;  %v2637_v49 = vld [vmem:[%s4380_s8 + $0xc8] sm:$0xf]  ;;  %v3020_v50 = vld [vmem:[%s4380_s8 + $0xd4] sm:$0xf0]  ;;  %v3018_v55 = vld [vmem:[%s4380_s8 + $0xcc] sm:$0xf]  ;;  %v3998_v57 = vor.u32 %v2991_v45, %v2527_v46 }
  0x5e   : > { %1557 = vmatpush.bf16.msrb.mxu0 %v2646_v10  ;;  %1119 = vmatmul.bf16.vlgmr.msra.gmra.mxu1 %v2958_v12  ;;  %v2999_v10 = vld [vmem:[%s4380_s8 + $0x2c] sm:$0xf0]  ;;  %v2765_v53 = vld [vmem:[%s4380_s8 + $0x1c8] sm:$0xf]  ;;  %v3052_v54 = vld [vmem:[%s4380_s8 + $0x1d4] sm:$0xf0]  ;;  %v2638_v61 = vor.u32 %v3020_v50, %v2637_v49 }
  0x5f   : > { %1571 = vmatpush.bf16.msrb.mxu1 %v2774_v11  ;;  %1585 = vmatpush.bf16.msrb.mxu2 %v2650_v15  ;;  %v2570_v11 = vor.u32 %v3001_v3, %v2567_v4  ;;  %v2997_v15 = vld [vmem:[%s4380_s8 + $0x24] sm:$0xf]  ;;  %v2550_v22 = vor.u32 %v2999_v10, %v2549_v9  ;;  %v2639_v58 = vld [vmem:[%s4380_s8 + $0xd8] sm:$0xf0]  ;;  %v2766_v62 = vor.u32 %v3052_v54, %v2765_v53  ;;  %v2749_v3 = vld [vmem:[%s4380_s8 + $0x1a8] sm:$0xf] }
  0x60   : > { %1599 = vmatpush.bf16.msrb.mxu3 %v2778_v16  ;;  %1133 = vmatmul.bf16.vlgmr.msra.gmra.mxu2 %v2958_v12  ;;  %v2551_v16 = vld [vmem:[%s4380_s8 + $0x30] sm:$0xf0]  ;;  %v2642_v1 = vor.u32 %v3018_v55, %v2639_v58  ;;  %v3048_v4 = vld [vmem:[%s4380_s8 + $0x1b4] sm:$0xf0]  ;;  %v3042_v19 = vld [vmem:[%s4380_s8 + $0x18c] sm:$0xf] }
  0x61   : > { %1147 = vmatmul.bf16.vlgmr.msra.gmra.mxu3 %v2958_v12  ;;  %v2698_v12 = vor.u32 %v3033_v5, %v2695_v6  ;;  %v3014_v5 = vld [vmem:[%s4380_s8 + $0xac] sm:$0xf]  ;;  %v2623_v6 = vld [vmem:[%s4380_s8 + $0xb8] sm:$0xf0]  ;;  %v2750_v10 = vor.u32 %v3048_v4, %v2749_v3  ;;  %s3162_s23 = sshra.s32 %s2084_s29, 4  ;;  %s3168_s0 = scalar_lea.hbm %s4384_s12, 32  ;;  %s3163_s23 = int_to_ptr.hbm [resolvable:$true] %s3162_s23 }
  0x62   : > { %1558 = vmatpush.bf16.msrb.mxu0 %v2630_v23  ;;  %v2678_v23 = vor.u32 %v3031_v14, %v2677_v13  ;;  %v2626_v13 = vor.u32 %v3014_v5, %v2623_v6  ;;  %v2735_v20 = vld [vmem:[%s4380_s8 + $0x198] sm:$0xf0]  ;;  %v3006_v29 = vld [vmem:[%s4380_s8 + $0x6c] sm:$0xf]  ;;  %s3164_s28 = scalar_lea.hbm %s3163_s23, 16  ;;  %p3169_p1 = scmp.lt.s32.totalorder %s3163_s23, %s4384_s12 }
  0x63   : > { %1572 = vmatpush.bf16.msrb.mxu1 %v2758_v24  ;;  %1586 = vmatpush.bf16.msrb.mxu2 %v2634_v27  ;;  %v3027_v24 = vld [vmem:[%s4380_s8 + $0x10c] sm:$0xf0]  ;;  %v2554_v27 = vor.u32 %v2997_v15, %v2551_v16  ;;  %v2733_v15 = vld [vmem:[%s4380_s8 + $0x188] sm:$0xf]  ;;  %v3044_v16 = vld [vmem:[%s4380_s8 + $0x194] sm:$0xf0]  ;;  %v2738_v26 = vor.u32 %v3042_v19, %v2735_v20  ;;  %p3165_p12 = scmp.ne.s32.totalorder %s3163_s23, %s3164_s28  ;;  %p3170_p2 = scmp.lt.s32.totalorder %s3168_s0, %s3164_s28 }
  0x64   : > { %1600 = vmatpush.bf16.msrb.mxu3 %v2762_v28  ;;  %v2682_v28 = vor.u32 %v3029_v17, %v2679_v18  ;;  %v2662_v38 = vor.u32 %v3027_v24, %v2661_v21  ;;  %v3010_v17 = vld [vmem:[%s4380_s8 + $0x8c] sm:$0xf]  ;;  %v2607_v18 = vld [vmem:[%s4380_s8 + $0x98] sm:$0xf0]  ;;  %v3008_v24 = vld [vmem:[%s4380_s8 + $0x74] sm:$0xf0] }
  0x65   : > { %v2610_v25 = vor.u32 %v3010_v17, %v2607_v18  ;;  %v2591_v30 = vld [vmem:[%s4380_s8 + $0x78] sm:$0xf0]  ;;  %v3002_v41 = vld [vmem:[%s4380_s8 + $0x4c] sm:$0xf]  ;;  %v3063_v20 = vld [vmem:[%s4382_s10 + $0x30] sm:$0xff]  ;;  %p3166_p13 = pnand %p3165_p12, %p3335_p4  ;;  %p3171_p3 = por %p3170_p2, %p3169_p1 }
  0x66   : > { %1559 = vmatpush.bf16.msrb.mxu0 %v2614_v35  ;;  %v3022_v35 = vld [vmem:[%s4380_s8 + $0xec] sm:$0xf]  ;;  %v2703_v44 = vld [vmem:[%s4380_s8 + $0x158] sm:$0xf0] }
  0x67   : > { %1573 = vmatpush.bf16.msrb.mxu1 %v2742_v36  ;;  %1587 = vmatpush.bf16.msrb.mxu2 %v2618_v39  ;;  %v2655_v36 = vld [vmem:[%s4380_s8 + $0xf8] sm:$0xf0]  ;;  %v3054_v39 = vld [vmem:[%s4380_s8 + $0x1ec] sm:$0xf]  ;;  %p3167_p0 = pneg %p3166_p13 }
  0x68   : > { %1601 = vmatpush.bf16.msrb.mxu3 %v2746_v40  ;;  %v2783_v40 = vld [vmem:[%s4380_s8 + $0x1f8] sm:$0xf0]  ;;  %v2998_v53 = vld [vmem:[%s4380_s8 + $0x2c] sm:$0xf] }
  0x69   : > { %v2559_v54 = vld [vmem:[%s4380_s8 + $0x38] sm:$0xf0]  ;;  %v3030_v55 = vld [vmem:[%s4380_s8 + $0x12c] sm:$0xf]  ;;  %p3172_p5 = pnand %p3171_p3, %p3167_p0 }
  0x6a   : > { %1560 = vmatpush.bf16.msrb.mxu0 %v2598_v47  ;;  %v2654_v47 = vor.u32 %v3024_v32, %v2653_v31  ;;  %v3038_v31 = vld [vmem:[%s4380_s8 + $0x16c] sm:$0xf]  ;;  %v2719_v32 = vld [vmem:[%s4380_s8 + $0x178] sm:$0xf0] }
  0x6b   : > { %1574 = vmatpush.bf16.msrb.mxu1 %v2726_v48  ;;  %1588 = vmatpush.bf16.msrb.mxu2 %v2602_v51  ;;  %v2782_v48 = vor.u32 %v3056_v34, %v2781_v33  ;;  %v2658_v51 = vor.u32 %v3022_v35, %v2655_v36  ;;  %v2573_v35 = vld [vmem:[%s4380_s8 + $0x48] sm:$0xf]  ;;  %v3004_v36 = vld [vmem:[%s4380_s8 + $0x54] sm:$0xf0]  ;;  %v2687_v58 = vld [vmem:[%s4380_s8 + $0x138] sm:$0xf0] }
  0x6c   : > { %1602 = vmatpush.bf16.msrb.mxu3 %v2730_v52  ;;  %v2786_v52 = vor.u32 %v3054_v39, %v2783_v40  ;;  %v2701_v39 = vld [vmem:[%s4380_s8 + $0x148] sm:$0xf]  ;;  %v3036_v40 = vld [vmem:[%s4380_s8 + $0x154] sm:$0xf0]  ;;  %v2574_v45 = vor.u32 %v3004_v36, %v2573_v35  ;;  %v2994_v3 = vld [vmem:[%s4380_s8 + $0xc] sm:$0xf] }
  0x6d   : > { %v2702_v46 = vor.u32 %v3036_v40, %v2701_v39  ;;  %v2543_v4 = vld [vmem:[%s4380_s8 + $0x18] sm:$0xf0]  ;;  %v3026_v5 = vld [vmem:[%s4380_s8 + $0x10c] sm:$0xf]  ;;  %v3067_v40 = vld [vmem:[%s4382_s10 + $0x50] sm:$0xff] }
  0x6e   : > { %1561 = vmatpush.bf16.msrb.mxu0 %v2582_v59  ;;  %v3050_v59 = vld [vmem:[%s4380_s8 + $0x1cc] sm:$0xf]  ;;  %v2671_v6 = vld [vmem:[%s4380_s8 + $0x118] sm:$0xf0] }
  0x6f   : > { %1575 = vmatpush.bf16.msrb.mxu1 %v2710_v60  ;;  %1589 = vmatpush.bf16.msrb.mxu2 %v2586_v63  ;;  %v2767_v60 = vld [vmem:[%s4380_s8 + $0x1d8] sm:$0xf0]  ;;  %v2621_v63 = vld [vmem:[%s4380_s8 + $0xa8] sm:$0xf] }
  0x70   : > { %1603 = vmatpush.bf16.msrb.mxu3 %v2714_v0  ;;  %v3016_v0 = vld [vmem:[%s4380_s8 + $0xb4] sm:$0xf0]  ;;  %v2770_v2 = vor.u32 %v3050_v59, %v2767_v60  ;;  %v3058_v39 = vld [vmem:[%s4382_s10 + $0x8] sm:$0xff] }
  0x71   : > { %v2622_v9 = vor.u32 %v3016_v0, %v2621_v63  ;;  %v2562_v63 = vor.u32 %v2998_v53, %v2559_v54  ;;  %v2690_v0 = vor.u32 %v3030_v55, %v2687_v58  ;;  %v3077_v58 = vld [vmem:[%s4382_s10 + $0xa0] sm:$0xff] }
  0x72   : > { %1562 = vmatpush.bf16.msrb.mxu0 %v2566_v7  ;;  %v3046_v7 = vld [vmem:[%s4380_s8 + $0x1ac] sm:$0xf] }
  0x73   : > { %1576 = vmatpush.bf16.msrb.mxu1 %v2694_v8  ;;  %1590 = vmatpush.bf16.msrb.mxu2 %v2570_v11  ;;  %v2751_v8 = vld [vmem:[%s4380_s8 + $0x1b8] sm:$0xf0]  ;;  %v2605_v11 = vld [vmem:[%s4380_s8 + $0x88] sm:$0xf] }
  0x74   : > { %1604 = vmatpush.bf16.msrb.mxu3 %v2698_v12  ;;  %v3012_v12 = vld [vmem:[%s4380_s8 + $0x94] sm:$0xf0]  ;;  %v2754_v14 = vor.u32 %v3046_v7, %v2751_v8 }
  0x75   : > { %v2606_v21 = vor.u32 %v3012_v12, %v2605_v11 }
  0x76   : > { %1563 = vmatpush.bf16.msrb.mxu0 %v2550_v22  ;;  %v2734_v22 = vor.u32 %v3044_v16, %v2733_v15 }
  0x77   : > { %1577 = vmatpush.bf16.msrb.mxu1 %v2678_v23  ;;  %1591 = vmatpush.bf16.msrb.mxu2 %v2554_v27  ;;  %v2589_v23 = vld [vmem:[%s4380_s8 + $0x68] sm:$0xf] }
  0x78   : > { %1605 = vmatpush.bf16.msrb.mxu3 %v2682_v28  ;;  %v2717_v27 = vld [vmem:[%s4380_s8 + $0x168] sm:$0xf]  ;;  %v3040_v28 = vld [vmem:[%s4380_s8 + $0x174] sm:$0xf0]  ;;  %v2590_v33 = vor.u32 %v3008_v24, %v2589_v23 }
  0x79   : > { %v2718_v34 = vor.u32 %v3040_v28, %v2717_v27  ;;  %v3070_v28 = vld [vmem:[%s4382_s10 + $0x68] sm:$0xff] }
  0x7a   : > { %1564 = vmatpush.bf16.msrb.mxu0 %v2534_v37  ;;  %v2594_v37 = vor.u32 %v3006_v29, %v2591_v30 }
  0x7b   : > { %1578 = vmatpush.bf16.msrb.mxu1 %v2662_v38  ;;  %1592 = vmatpush.bf16.msrb.mxu2 %v2538_v42  ;;  %v2722_v38 = vor.u32 %v3038_v31, %v2719_v32  ;;  %v2575_v42 = vld [vmem:[%s4380_s8 + $0x58] sm:$0xf0]  ;;  %v3069_v32 = vld [vmem:[%s4382_s10 + $0x60] sm:$0xff] }
  0x7c   : > { %1606 = vmatpush.bf16.msrb.mxu3 %v2666_v43  ;;  %v3034_v43 = vld [vmem:[%s4380_s8 + $0x14c] sm:$0xf]  ;;  %v2578_v49 = vor.u32 %v3002_v41, %v2575_v42  ;;  %v3060_v31 = vld [vmem:[%s4382_s10 + $0x18] sm:$0xff]  ;;  %v3057_v41 = vld [vmem:[%s4382_s10] sm:$0xff] }
  0x7d   : > { %1565 = vmatmul.bf16.vlgmr.msrb.gmra.mxu0 %v3996_v56  ;;  %v2706_v50 = vor.u32 %v3034_v43, %v2703_v44  ;;  %v3080_v42 = vld [vmem:[%s4382_s10 + $0xb8] sm:$0xff]  ;;  %v3066_v43 = vld [vmem:[%s4382_s10 + $0x48] sm:$0xff] }
  0x7e   : > { %1613 = vmatpush.bf16.msra.mxu0 %v2654_v47  ;;  %1579 = vmatmul.bf16.vlgmr.msrb.gmra.mxu1 %v3998_v57  ;;  %v2557_v47 = vld [vmem:[%s4380_s8 + $0x28] sm:$0xf] }
  0x7f   : > { %1627 = vmatpush.bf16.msra.mxu1 %v2782_v48  ;;  %1641 = vmatpush.bf16.msra.mxu2 %v2658_v51  ;;  %v3000_v48 = vld [vmem:[%s4380_s8 + $0x34] sm:$0xf0]  ;;  %v2685_v51 = vld [vmem:[%s4380_s8 + $0x128] sm:$0xf] }
  0x80   : > { %1655 = vmatpush.bf16.msra.mxu3 %v2786_v52  ;;  %1593 = vmatmul.bf16.vlgmr.msrb.gmra.mxu2 %v3996_v56  ;;  %v3032_v52 = vld [vmem:[%s4380_s8 + $0x134] sm:$0xf0]  ;;  %v2558_v59 = vor.u32 %v3000_v48, %v2557_v47 }
  0x81   : > { %1607 = vmatmul.bf16.vlgmr.msrb.gmra.mxu3 %v3998_v57  ;;  %v2686_v60 = vor.u32 %v3032_v52, %v2685_v51  ;;  %v3078_v51 = vld [vmem:[%s4382_s10 + $0xa8] sm:$0xff]  ;;  %v3087_v52 = vld [vmem:[%s4382_s10 + $0xf0] sm:$0xff] }
  0x82   : > { %1614 = vmatpush.bf16.msra.mxu0 %v2638_v61  ;;  %v2541_v61 = vld [vmem:[%s4380_s8 + $0x8] sm:$0xf] }
  0x83   : > { %1628 = vmatpush.bf16.msra.mxu1 %v2766_v62  ;;  %1642 = vmatpush.bf16.msra.mxu2 %v2642_v1  ;;  %v2996_v62 = vld [vmem:[%s4380_s8 + $0x14] sm:$0xf0]  ;;  %v2669_v1 = vld [vmem:[%s4380_s8 + $0x108] sm:$0xf] }
  0x84   : > { %1656 = vmatpush.bf16.msra.mxu3 %v2770_v2  ;;  %v3028_v2 = vld [vmem:[%s4380_s8 + $0x114] sm:$0xf0]  ;;  %v2542_v7 = vor.u32 %v2996_v62, %v2541_v61  ;;  %v4268_v61 = vld [vmem:[%s569_s16] sm:$0xf]  ;;  %s2237_s16 = sshll.u32 %s522_s14, 4 }
  0x85   : > { %v2670_v8 = vor.u32 %v3028_v2, %v2669_v1  ;;  %v1679_v2 = vperm.slane %v4268_v61, 0  ;;  %s524_s17 = scalar_lea.vmem [#allocation2], %s2237_s16 }
  0x86   : > { %1615 = vmatpush.bf16.msra.mxu0 %v2622_v9  ;;  %v2546_v9 = vor.u32 %v2994_v3, %v2543_v4  ;;  %v3076_v3 = vld [vmem:[%s4382_s10 + $0x98] sm:$0xff]  ;;  %v4280_v4 = vld [vmem:[%s4381_s9] sm:$0xf]  ;;  %s2081_s27 = sshll.u32 %s524_s17, 4  ;;  %s2082_s27 = int_to_ptr.vmem [resolvable:$true] %s2081_s27 }
  0x87   : > { %1629 = vmatpush.bf16.msra.mxu1 %v2750_v10  ;;  %1643 = vmatpush.bf16.msra.mxu2 %v2626_v13  ;;  %v2674_v10 = vor.u32 %v3026_v5, %v2671_v6  ;;  %v3085_v5 = vld [vmem:[%s4382_s10 + $0xe0] sm:$0xff] }
  0x88   : > { %1657 = vmatpush.bf16.msra.mxu3 %v2754_v14 }
  0x8a   : > { %1616 = vmatpush.bf16.msra.mxu0 %v2606_v21  ;;  %v3062_v21 = vld [vmem:[%s4382_s10 + $0x28] sm:$0xff] }
  0x8b   : > { %1630 = vmatpush.bf16.msra.mxu1 %v2734_v22  ;;  %1644 = vmatpush.bf16.msra.mxu2 %v2610_v25  ;;  %v3071_v25 = vld [vmem:[%s4382_s10 + $0x70] sm:$0xff] }
  0x8c   : > { %1658 = vmatpush.bf16.msra.mxu3 %v2738_v26  ;;  %v3061_v26 = vld [vmem:[%s4382_s10 + $0x20] sm:$0xff] }
  0x8e   : > { %1617 = vmatpush.bf16.msra.mxu0 %v2590_v33  ;;  %v3059_v33 = vld [vmem:[%s4382_s10 + $0x10] sm:$0xff] }
  0x8f   : > { %1631 = vmatpush.bf16.msra.mxu1 %v2718_v34  ;;  %1645 = vmatpush.bf16.msra.mxu2 %v2594_v37  ;;  %v3068_v34 = vld [vmem:[%s4382_s10 + $0x58] sm:$0xff] }
  0x90   : > { %1659 = vmatpush.bf16.msra.mxu3 %v2722_v38 }
  0x92   : > { %1618 = vmatpush.bf16.msra.mxu0 %v2574_v45 }
  0x93   : > { %1632 = vmatpush.bf16.msra.mxu1 %v2702_v46  ;;  %1646 = vmatpush.bf16.msra.mxu2 %v2578_v49  ;;  %v3079_v46 = vld [vmem:[%s4382_s10 + $0xb0] sm:$0xff]  ;;  %v3065_v49 = vld [vmem:[%s4382_s10 + $0x40] sm:$0xff] }
  0x94   : > { %1660 = vmatpush.bf16.msra.mxu3 %v2706_v50  ;;  %v3088_v50 = vld [vmem:[%s4382_s10 + $0xf8] sm:$0xff] }
  0x96   : > { %1619 = vmatpush.bf16.msra.mxu0 %v2558_v59 }
  0x97   : > { %1633 = vmatpush.bf16.msra.mxu1 %v2686_v60  ;;  %1647 = vmatpush.bf16.msra.mxu2 %v2562_v63 }
  0x98   : > { %1661 = vmatpush.bf16.msra.mxu3 %v2690_v0  ;;  %v3086_v0 = vld [vmem:[%s4382_s10 + $0xe8] sm:$0xff] }
  0x9a   : > { %1620 = vmatpush.bf16.msra.mxu0 %v2542_v7 }
  0x9b   : > { %1634 = vmatpush.bf16.msra.mxu1 %v2670_v8  ;;  %1648 = vmatpush.bf16.msra.mxu2 %v2546_v9  ;;  %v1697_v9 = vperm.slane %v4280_v4, 0 }
  0x9c   : > { %1662 = vmatpush.bf16.msra.mxu3 %v2674_v10 }
  0x9d   : > { %1621 = vmatmul.bf16.vlgmr.msra.gmra.mxu0 %v3996_v56 }
  0x9e   : > { %1635 = vmatmul.bf16.vlgmr.msra.gmra.mxu1 %v3998_v57  ;;  %1649 = vmatmul.bf16.vlgmr.msra.gmra.mxu2 %v3996_v56  ;;  %v3064_v56 = vld [vmem:[%s4382_s10 + $0x38] sm:$0xff] }
  0x9f   : > { %1663 = vmatmul.bf16.vlgmr.msra.gmra.mxu3 %v3998_v57  ;;  %v3072_v57 = vld [vmem:[%s4382_s10 + $0x78] sm:$0xff]  ;;  %2001 = vmatpush.bf16.msrb.mxu0 %v3064_v56 }
  0xa0   : > { %2015 = vmatpush.bf16.msrb.mxu1 %v3072_v57  ;;  %2029 = vmatpush.bf16.msrb.mxu2 %v3080_v42 }
  0xa1   : > { %2043 = vmatpush.bf16.msrb.mxu3 %v3088_v50 }
  0xa3   : > { %2002 = vmatpush.bf16.msrb.mxu0 %v3063_v20 }
  0xa4   : > { %2016 = vmatpush.bf16.msrb.mxu1 %v3071_v25  ;;  %2030 = vmatpush.bf16.msrb.mxu2 %v3079_v46 }
  0xa5   : > { %2044 = vmatpush.bf16.msrb.mxu3 %v3087_v52 }
  0xa7   : > { %2003 = vmatpush.bf16.msrb.mxu0 %v3062_v21 }
  0xa8   : > { %2017 = vmatpush.bf16.msrb.mxu1 %v3070_v28  ;;  %2031 = vmatpush.bf16.msrb.mxu2 %v3078_v51  ;;  %v3074_v28 = vld [vmem:[%s4382_s10 + $0x88] sm:$0xff] }
  0xa9   : > { %2045 = vmatpush.bf16.msrb.mxu3 %v3086_v0 }
  0xaa   : > { %v4163_v13 = vpop.f32.mrf.mxu0 }
  0xab   : > { %v4165_v14 = vpop.f32.mrf.mxu1  ;;  %2004 = vmatpush.bf16.msrb.mxu0 %v3061_v26 }
  0xac   : > { %2018 = vmatpush.bf16.msrb.mxu1 %v3069_v32  ;;  %2032 = vmatpush.bf16.msrb.mxu2 %v3077_v58 }
  0xad   : > { %2046 = vmatpush.bf16.msrb.mxu3 %v3085_v5 }
  0xaf   : > { %2005 = vmatpush.bf16.msrb.mxu0 %v3060_v31  ;;  %v3083_v31 = vld [vmem:[%s4382_s10 + $0xd0] sm:$0xff] }
  0xb0   : > { %2019 = vmatpush.bf16.msrb.mxu1 %v3068_v34  ;;  %2033 = vmatpush.bf16.msrb.mxu2 %v3076_v3  ;;  %v1698_v34 = vperm.slane %v4280_v4, 1 }
  0xb2   : > { %v4171_v18 = vpop.f32.mrf.mxu0 }
  0xb3   : > { %v4167_v15 = vpop.f32.mrf.mxu2  ;;  %v4173_v19 = vpop.f32.mrf.mxu1  ;;  %2006 = vmatpush.bf16.msrb.mxu0 %v3059_v33 }
  0xb4   : > { %v748_v11 = vpop.f32.mrf.mxu3  ;;  %2020 = vmatpush.bf16.msrb.mxu1 %v3067_v40 }
  0xb7   : > { %2007 = vmatpush.bf16.msrb.mxu0 %v3058_v39 }
  0xb8   : > { %2021 = vmatpush.bf16.msrb.mxu1 %v3066_v43 }
  0xba   : > { %v850_v23 = vpop.f32.mrf.mxu0 }
  0xbb   : > { %v4187_v22 = vpop.f32.mrf.mxu2  ;;  %v4189_v24 = vpop.f32.mrf.mxu1  ;;  %2008 = vmatpush.bf16.msrb.mxu0 %v3057_v41  ;;  %v851_v53 = vadd.f32 %v850_v23, %v4163_v13  ;;  %v3075_v13 = vld [vmem:[%s4382_s10 + $0x90] sm:$0xff]  ;;  %v3073_v41 = vld [vmem:[%s4382_s10 + $0x80] sm:$0xff] }
  0xbc   : > { %v4161_v12 = vpop.f32.mrf.mxu3  ;;  %2022 = vmatpush.bf16.msrb.mxu1 %v3065_v49  ;;  %v865_v6 = vadd.f32 %v4189_v24, %v4165_v14  ;;  %2034 = vmatpush.bf16.msrb.mxu2 %v3075_v13  ;;  %v3084_v14 = vld [vmem:[%s4382_s10 + $0xd8] sm:$0xff]  ;;  %v1680_v24 = vperm.slane %v4268_v61, 1 }
  0xbd   : > { %2047 = vmatpush.bf16.msrb.mxu3 %v3084_v14 }
  0xc0   : > { %2035 = vmatpush.bf16.msrb.mxu2 %v3074_v28 }
  0xc1   : > { %2048 = vmatpush.bf16.msrb.mxu3 %v3083_v31 }
  0xc2   : > { %v852_v29 = vpop.f32.mrf.mxu0 }
  0xc3   : > { %v4197_v27 = vpop.f32.mrf.mxu2  ;;  %v4202_v30 = vpop.f32.mrf.mxu1  ;;  %v853_v7 = vadd.f32 %v852_v29, %v4171_v18 }
  0xc4   : > { %v892_v16 = vpop.f32.mrf.mxu3  ;;  %v867_v32 = vadd.f32 %v4202_v30, %v4173_v19  ;;  %2036 = vmatpush.bf16.msrb.mxu2 %v3073_v41  ;;  %v3082_v19 = vld [vmem:[%s4382_s10 + $0xc8] sm:$0xff]  ;;  %v879_v0 = vadd.f32 %v4197_v27, %v4167_v15  ;;  %v3147_v41 = vld [vmem:[%s4383_s11] ss:$0 sm:$0xff] }
  0xc5   : > { %v4169_v17 = vadd.f32 %v892_v16, %v748_v11  ;;  %2049 = vmatpush.bf16.msrb.mxu3 %v3082_v19 }
  0xcb   : > { %v4216_v35 = vpop.f32.mrf.mxu2 }
  0xcc   : > { %v4218_v36 = vpop.f32.mrf.mxu3 }
  0xda   : > { %v1106_v37 = vpop.f32.mrf.mxu0 }
  0xdb   : > { %v1120_v38 = vpop.f32.mrf.mxu1  ;;  %v1153_v62 = vadd.f32 %v1106_v37, %v851_v53 }
  0xdc   : > { %v1154_v16 = vadd.f32 %v1120_v38, %v865_v6 }
  0xe2   : > { %v1108_v47 = vpop.f32.mrf.mxu0 }
  0xe3   : > { %v4235_v44 = vpop.f32.mrf.mxu2  ;;  %v4242_v48 = vpop.f32.mrf.mxu1  ;;  %v1157_v21 = vadd.f32 %v1108_v47, %v853_v7  ;;  %v1681_v7 = vperm.slane %v4268_v61, 2 }
  0xe4   : > { %v4237_v45 = vpop.f32.mrf.mxu3  ;;  %v1158_v42 = vadd.f32 %v4242_v48, %v867_v32  ;;  %v3081_v48 = vld [vmem:[%s4382_s10 + $0xc0] sm:$0xff]  ;;  %v1155_v3 = vadd.f32 %v4235_v44, %v879_v0 }
  0xe5   : > { %2050 = vmatpush.bf16.msrb.mxu3 %v3081_v48  ;;  %v1156_v15 = vadd.f32 %v4237_v45, %v4169_v17 }
  0xeb   : > { %v4261_v54 = vpop.f32.mrf.mxu2 }
  0xec   : > { %v4263_v55 = vpop.f32.mrf.mxu3 }
  0xfa   : > { %v1566_v59 = vpop.f32.mrf.mxu0 }
  0xfb   : > { %v1580_v60 = vpop.f32.mrf.mxu1 }
  0xfc   : > { %v1581_v63 = vadd.f32 %v1580_v60, %v1566_v59 }
  0xfe   : > { %v1669_v1 = vadd.f32 %v1581_v63, %v1153_v62 }
 0x100   : > { %v1687_v8 = vadd.f32 %v1679_v2, %v1669_v1 }
 0x102   : > { %v1568_v57 = vpop.f32.mrf.mxu0  ;;  %v1705_v25 = vadd.f32 %v1697_v9, %v1687_v8  ;;  %v881_v8 = vadd.f32 %v4216_v35, %v4187_v22  ;;  %v895_v35 = vadd.f32 %v4218_v36, %v4161_v12 }
 0x103   : > { %v1594_v10 = vpop.f32.mrf.mxu2  ;;  %v1582_v20 = vpop.f32.mrf.mxu1 }
 0x104   : > { %v1608_v11 = vpop.f32.mrf.mxu3  ;;  %v1583_v23 = vadd.f32 %v1582_v20, %v1568_v57  ;;  %v1721_v37 = vmul.f32 0.2, %v1705_v25  ;;  %vm1713_vm1 = vcmp.gt.f32.partialorder %v1705_v25, 0.0  ;;  %v1159_v44 = vadd.f32 %v4261_v54, %v881_v8 }
 0x105   : > { %v1609_v56 = vadd.f32 %v1608_v11, %v1594_v10  ;;  %v1699_v10 = vperm.slane %v4280_v4, 2  ;;  %v1160_v28 = vadd.f32 %v4263_v55, %v895_v35 }
 0x106   : > { %v1673_v26 = vadd.f32 %v1583_v23, %v1157_v21  ;;  %v1729_v49 = vsel %vm1713_vm1, %v1705_v25, %v1721_v37  ;;  %v1682_v21 = vperm.slane %v4268_v61, 3 }
 0x107   : > { %v1670_v18 = vadd.f32 %v1609_v56, %v1154_v16 }
 0x108   : > { %v1691_v29 = vadd.f32 %v1679_v2, %v1673_v26 }
 0x109   : > { %v1688_v33 = vadd.f32 %v1680_v24, %v1670_v18 }
 0x10a   : > { %v1709_v38 = vadd.f32 %v1697_v9, %v1691_v29 }
 0x10b   : > { %v1596_v39 = vpop.f32.mrf.mxu2  ;;  %v1706_v30 = vadd.f32 %v1698_v34, %v1688_v33 }
 0x10c   : > { %v1610_v40 = vpop.f32.mrf.mxu3  ;;  %v1725_v46 = vmul.f32 0.2, %v1709_v38  ;;  %vm1717_vm2 = vcmp.gt.f32.partialorder %v1709_v38, 0.0 }
 0x10d   : > { %v1611_v43 = vadd.f32 %v1610_v40, %v1596_v39  ;;  %v1722_v53 = vmul.f32 0.2, %v1706_v30  ;;  %vm1714_vm3 = vcmp.gt.f32.partialorder %v1706_v30, 0.0 }
 0x10e   : > { %v1733_v50 = vsel %vm1717_vm2, %v1709_v38, %v1725_v46 }
 0x10f   : > { %v1674_v47 = vadd.f32 %v1611_v43, %v1158_v42  ;;  %v1737_v52 = vpack.c.bf16 %v1733_v50, %v1729_v49  ;;  %v1730_v60 = vsel %vm1714_vm3, %v1706_v30, %v1722_v53 }
 0x111   : > { %v1692_v51 = vadd.f32 %v1680_v24, %v1674_v47  ;;  %2009 = vmatmul.bf16.vlgmr.msrb.gmra.mxu0 %v1737_v52  ;;  %v1700_v24 = vperm.slane %v4280_v4, 3 }
 0x113   : > { %v1710_v58 = vadd.f32 %v1698_v34, %v1692_v51 }
 0x115   : > { %v1726_v59 = vmul.f32 0.2, %v1710_v58  ;;  %vm1718_vm4 = vcmp.gt.f32.partialorder %v1710_v58, 0.0 }
 0x117   : > { %v1734_v62 = vsel %vm1718_vm4, %v1710_v58, %v1726_v59 }
 0x118   : > { %v1738_v63 = vpack.c.bf16 %v1734_v62, %v1730_v60 }
 0x11a   : > { %2023 = vmatmul.bf16.vlgmr.msrb.gmra.mxu1 %v1738_v63  ;;  %v1622_v1 = vpop.f32.mrf.mxu0 }
 0x11b   : > { %v1636_v2 = vpop.f32.mrf.mxu1 }
 0x11c   : > { %v1637_v5 = vadd.f32 %v1636_v2, %v1622_v1 }
 0x11e   : > { %v1671_v6 = vadd.f32 %v1637_v5, %v1155_v3 }
 0x120   : > { %v1689_v9 = vadd.f32 %v1681_v7, %v1671_v6 }
 0x121   : > { %v1650_v11 = vpop.f32.mrf.mxu2 }
 0x122   : > { %v1664_v13 = vpop.f32.mrf.mxu3  ;;  %v1624_v16 = vpop.f32.mrf.mxu0  ;;  %v1707_v23 = vadd.f32 %v1699_v10, %v1689_v9 }
 0x123   : > { %v1665_v27 = vadd.f32 %v1664_v13, %v1650_v11  ;;  %v1638_v56 = vpop.f32.mrf.mxu1 }
 0x124   : > { %v1639_v57 = vadd.f32 %v1638_v56, %v1624_v16  ;;  %v1723_v25 = vmul.f32 0.2, %v1707_v23  ;;  %vm1715_vm5 = vcmp.gt.f32.partialorder %v1707_v23, 0.0 }
 0x125   : > { %v1672_v20 = vadd.f32 %v1665_v27, %v1156_v15 }
 0x126   : > { %v1675_v14 = vadd.f32 %v1639_v57, %v1159_v44  ;;  %v1731_v32 = vsel %vm1715_vm5, %v1707_v23, %v1723_v25 }
 0x127   : > { %v1690_v18 = vadd.f32 %v1682_v21, %v1672_v20 }
 0x128   : > { %v1693_v22 = vadd.f32 %v1681_v7, %v1675_v14 }
 0x129   : > { %v1652_v45 = vpop.f32.mrf.mxu2  ;;  %v1708_v61 = vadd.f32 %v1700_v24, %v1690_v18 }
 0x12a   : > { %v1711_v17 = vadd.f32 %v1699_v10, %v1693_v22  ;;  %v1666_v26 = vpop.f32.mrf.mxu3 }
 0x12b   : > { %v1667_v54 = vadd.f32 %v1666_v26, %v1652_v45  ;;  %v1724_v12 = vmul.f32 0.2, %v1708_v61  ;;  %vm1716_vm7 = vcmp.gt.f32.partialorder %v1708_v61, 0.0 }
 0x12c   : > { %v1727_v29 = vmul.f32 0.2, %v1711_v17  ;;  %vm1719_vm6 = vcmp.gt.f32.partialorder %v1711_v17, 0.0 }
 0x12d   : > { %v1676_v31 = vadd.f32 %v1667_v54, %v1160_v28  ;;  %v1732_v38 = vsel %vm1716_vm7, %v1708_v61, %v1724_v12 }
 0x12e   : > { %v1735_v33 = vsel %vm1719_vm6, %v1711_v17, %v1727_v29 }
 0x12f   : > { %v1694_v34 = vadd.f32 %v1682_v21, %v1676_v31  ;;  %v1739_v37 = vpack.c.bf16 %v1735_v33, %v1731_v32 }
 0x131   : > { %v1712_v36 = vadd.f32 %v1700_v24, %v1694_v34  ;;  %2037 = vmatmul.bf16.vlgmr.msrb.gmra.mxu2 %v1739_v37 }
 0x133   : > { %v1728_v4 = vmul.f32 0.2, %v1712_v36  ;;  %vm1720_vm8 = vcmp.gt.f32.partialorder %v1712_v36, 0.0 }
 0x135   : > { %v1736_v39 = vsel %vm1720_vm8, %v1712_v36, %v1728_v4 }
 0x136   : > { %v1740_v55 = vpack.c.bf16 %v1736_v39, %v1732_v38 }
 0x138   : > { %2051 = vmatmul.bf16.vlgmr.msrb.gmra.mxu3 %v1740_v55 }
 0x18e   : > { %v2010_v40 = vpop.f32.mrf.mxu0 }
 0x18f   : > { %v2011_v46 = vadd.f32 %v3147_v41, %v2010_v40 }
 0x196   : > { %v2012_v47 = vpop.f32.mrf.mxu0 }
 0x197   : > { %v2024_v42 = vpop.f32.mrf.mxu1  ;;  %v2013_v52 = vadd.f32 %v3147_v41, %v2012_v47 }
 0x198   : > { %v2025_v19 = vadd.f32 %v2024_v42, %v2011_v46 }
 0x19f   : > { %v2026_v51 = vpop.f32.mrf.mxu1 }
 0x1a0   : > { %v2027_v58 = vadd.f32 %v2026_v51, %v2013_v52 }
 0x1b4   : > { %v2038_v43 = vpop.f32.mrf.mxu2 }
 0x1b5   : > { %v2039_v30 = vadd.f32 %v2038_v43, %v2025_v19 }
 0x1bb   : > { %v2052_v49 = vpop.f32.mrf.mxu3 }
 0x1bc   : > { %v2053_v50 = vadd.f32 %v2052_v49, %v2039_v30  ;;  %v2040_v53 = vpop.f32.mrf.mxu2 }
 0x1bd   : > { %v2041_v60 = vadd.f32 %v2040_v53, %v2027_v58 }
 0x1be   : > { %vm2057_vm9 = vcmp.gt.f32.partialorder %v2053_v50, 0.0  ;;  %v2059_v48 = vmul.f32 0.2, %v2053_v50 }
 0x1c0   : > { %v2061_v59 = vsel %vm2057_vm9, %v2053_v50, %v2059_v48 }
 0x1c1   : > { %2064 = vst.msk [vmem:[%s524_s17] sm:$0xff] %vm2063_vm10, %v2061_v59 }
 0x1c3   : > { %v2054_v62 = vpop.f32.mrf.mxu3 }
 0x1c4   : > { %v2055_v63 = vadd.f32 %v2054_v62, %v2041_v60 }
 0x1c6   : > { %vm2058_vm11 = vcmp.gt.f32.partialorder %v2055_v63, 0.0  ;;  %v2060_v0 = vmul.f32 0.2, %v2055_v63 }
 0x1c8   : > { %v2062_v1 = vsel %vm2058_vm11, %v2055_v63, %v2060_v0 }
 0x1c9   : > { %2065 = vst.msk [vmem:[%s524_s17 + $0x8] sm:$0xff] %vm2063_vm10, %v2062_v1 }
 0x1ca   : > { %3175 = shalt.err (!%p3172_p5)
}
 0x1cb   : > { %s3228_s14 = smov 128   ;;  %s3229_s30 = smov 8  }
 0x1cc   : > { %3090 = dma.vmem_to_hbm [thread:$0]  (%p3335_p4), %s2082_s27, 256, %s2084_s29, %s2067_s24, %s3228_s14, %s3228_s14, %s3229_s30  }
 0x1cd PF: > { %p3096_p6 = scmp.ge.s32.totalorder %s3226_s26, 2  ;;  %s2098_s6 = sand.u32 1, %s3206_s21  }
 0x1ce   : > { %s2099_s20 = scalar_lea.sflag [#allocation3], %s2098_s6 }
 0x1cf   : > { %p3093_p7 = pnand %p3096_p6, %p3342_p8 }
 0x1d1   : > { %p3094_p9 = pneg %p3093_p7 }
 0x1d3   : > { %3201 = dma.done.wait (%p3094_p9), %s2099_s20, 256  }
 0x1d4   : > { %3203 = vsyncadd (%p3094_p9), %s2099_s20, 4294967040  ;;  %s25_s26 = sadd.s32 1, %s3226_s26   ;;  %s4400_s18 = sld [smem:[#allocation5_spill]] }
 0x1d5   : > { %p22_p10 = scmp.ge.s32.totalorder %s25_s26, 4   ;;  %s4401_s23 = sld [smem:[#allocation8_spill]] }
 0x1d6   : > { %s4402_s24 = sld [smem:[#allocation6_spill]]  ;;  %s4404_s21 = smov %s3210_s22 }
 0x1d7   : > { %s4403_s25 = sld [smem:[#allocation7_spill]]  ;;  %24 = sbr.rel (!%p22_p10) target bundleno = 8 (0x8), region = 115 }
 0x1da   : > { %s4405_s22 = smov %s4400_s18 }
 0x1dc   :  { %2105 = vsyncpa [#allocation3], 1 }
 0x1dd   :  { %2107 = vsyncpa [#allocation3 + $0x1], 1 }

</bundles_post_ra>
